<compile_context>
chip_gen: v6e
topology: v6e:2x2x1
jax: 0.10.0
libtpu: 0.0.40
codegen_flags: <defaults>
</compile_context>

<pallas_src>
import functools
import math

import jax
import jax.numpy as jnp
from jax.experimental import pallas as pl
from jax.experimental.pallas import tpu as pltpu

_VMEM_LIMIT = 32 * 1024 * 1024          # safe scoped limit on v5e/v6e/v7x
_FUSED_VMEM_BUDGET = 20 * 1024 * 1024   # whole-graph-in-VMEM threshold
_RESIDENT_P_BUDGET = 8 * 1024 * 1024    # budget for VMEM-resident P1/P2
_TILE_CANDIDATES = (2048, 1024, 512, 256, 128)


# ----------------------------------------------------------------------------
# Helpers
# ----------------------------------------------------------------------------
def _round_up(x, m):
    return (x + m - 1) // m * m


def _pad2d(a, rows, cols, dtype):
    out = jnp.zeros((rows, cols), dtype=dtype)
    return out.at[: a.shape[0], : a.shape[1]].set(a.astype(dtype))


def _pick_tile(limit):
    """Largest candidate tile (multiple-of-128 power-of-two) <= limit."""
    for c in _TILE_CANDIDATES:
        if c <= limit:
            return c
    return 128


# ----------------------------------------------------------------------------
# Kernels
# ----------------------------------------------------------------------------
def fused_gcn_kernel(x_ref, adj_ref, w1_ref, b1_ref, w2_ref, b2_ref, o_ref,
                     *, nclass):
    """Entire GCN forward for a graph that fits in VMEM (single grid step)."""
    adj = adj_ref[...]
    # P1 = x @ W1 + b1   (f32 accumulate, f32 bias)
    p1 = jnp.dot(x_ref[...], w1_ref[...],
                 preferred_element_type=jnp.float32) + b1_ref[...]
    # H = relu(adj @ P1)
    h = jnp.maximum(
        jnp.dot(adj, p1.astype(adj.dtype), preferred_element_type=jnp.float32),
        0.0)
    # P2 = H @ W2 + b2
    p2 = jnp.dot(h.astype(w2_ref.dtype), w2_ref[...],
                 preferred_element_type=jnp.float32) + b2_ref[...]
    # Z = adj @ P2
    z = jnp.dot(adj, p2.astype(adj.dtype), preferred_element_type=jnp.float32)
    # masked log_softmax over the (padded) class axis
    col = jax.lax.broadcasted_iota(jnp.int32, z.shape, 1)
    z = jnp.where(col < nclass, z, jnp.float32(-1e30))
    m = jnp.max(z, axis=1, keepdims=True)
    s = z - m
    lse = jnp.log(jnp.sum(jnp.exp(s), axis=1, keepdims=True))
    o_ref[...] = (s - lse).astype(o_ref.dtype)


def linear_bias_kernel(x_ref, w_ref, b_ref, o_ref):
    """One row tile of  X @ W + b  (MXU matmul, f32 accumulate, f32 bias)."""
    acc = jnp.dot(x_ref[...], w_ref[...], preferred_element_type=jnp.float32)
    o_ref[...] = (acc + b_ref[...]).astype(o_ref.dtype)


def agg_relu_linear_kernel(adj_ref, p_ref, w_ref, b_ref, o_ref, acc_ref,
                           *, tile_k, p_resident):
    """Row tile of  relu(A @ P) @ W + b ; the A @ P contraction is k-tiled."""
    k = pl.program_id(1)

    @pl.when(k == 0)
    def _init():
        acc_ref[...] = jnp.zeros_like(acc_ref)

    if p_resident:
        start = pl.multiple_of(k * tile_k, 128)
        p = p_ref[pl.ds(start, tile_k), :]
    else:
        p = p_ref[...]

    acc_ref[...] += jnp.dot(adj_ref[...], p,
                            preferred_element_type=jnp.float32)

    @pl.when(k == pl.num_programs(1) - 1)
    def _finalize():
        h = jnp.maximum(acc_ref[...], 0.0).astype(w_ref.dtype)  # ReLU in f32
        z = jnp.dot(h, w_ref[...], preferred_element_type=jnp.float32)
        o_ref[...] = (z + b_ref[...]).astype(o_ref.dtype)


def agg_logsoftmax_kernel(adj_ref, p_ref, o_ref, acc_ref,
                          *, tile_k, p_resident, nclass):
    """Row tile of  log_softmax(A @ P, axis=1); contraction k-tiled.

    The class axis is padded to a multiple of 128 for lane-dense stores;
    padded columns are masked to a large negative before max/exp so they do
    not affect the normalizer.
    """
    k = pl.program_id(1)

    @pl.when(k == 0)
    def _init():
        acc_ref[...] = jnp.zeros_like(acc_ref)

    if p_resident:
        start = pl.multiple_of(k * tile_k, 128)
        p = p_ref[pl.ds(start, tile_k), :]
    else:
        p = p_ref[...]

    acc_ref[...] += jnp.dot(adj_ref[...], p,
                            preferred_element_type=jnp.float32)

    @pl.when(k == pl.num_programs(1) - 1)
    def _finalize():
        logits = acc_ref[...]
        col = jax.lax.broadcasted_iota(jnp.int32, logits.shape, 1)
        logits = jnp.where(col < nclass, logits, jnp.float32(-1e30))
        m = jnp.max(logits, axis=1, keepdims=True)
        shifted = logits - m
        lse = jnp.log(jnp.sum(jnp.exp(shifted), axis=1, keepdims=True))
        o_ref[...] = (shifted - lse).astype(o_ref.dtype)


# ----------------------------------------------------------------------------
# Wrapper
# ----------------------------------------------------------------------------
def gcn_forward(x, adj, w1, b1, w2, b2, *, tile_n=512, tile_k=1024,
                mxu_dtype=jnp.bfloat16, path="auto"):
    """GCN baseline==1 forward (inference).

    path: "auto" (fused single-call when it fits in VMEM, else tiled),
          "fused", or "tiled".
    """
    n, nfeat = x.shape
    nhid = w1.shape[1]
    nclass = w2.shape[1]

    # MXU / lane-dense padding: every matmul dim -> multiple of 128.
    f_pad = _round_up(nfeat, 128)
    h_pad = _round_up(nhid, 128)
    c_pad = _round_up(nclass, 128)

    f32 = jnp.float32
    itemsize = jnp.dtype(mxu_dtype).itemsize

    # ------------------------------------------------------------------ fused
    n_pad_min = _round_up(n, 128)
    fused_bytes = (
        (n_pad_min * n_pad_min + n_pad_min * f_pad
         + f_pad * h_pad + h_pad * c_pad) * itemsize     # VMEM-resident inputs
        + (n_pad_min * h_pad + n_pad_min * c_pad) * 2 * 4  # f32 intermediates
        + n_pad_min * c_pad * 4                             # f32 output
    )
    use_fused = (path == "fused") or (path == "auto"
                                      and fused_bytes <= _FUSED_VMEM_BUDGET)

    if use_fused:
        n_pad = n_pad_min
        xp = _pad2d(x, n_pad, f_pad, mxu_dtype)
        adjp = _pad2d(adj, n_pad, n_pad, mxu_dtype)
        w1p = _pad2d(w1, f_pad, h_pad, mxu_dtype)
        w2p = _pad2d(w2, h_pad, c_pad, mxu_dtype)
        b1p = _pad2d(b1.reshape(1, -1), 1, h_pad, f32)
        b2p = _pad2d(b2.reshape(1, -1), 1, c_pad, f32)

        cost = pl.CostEstimate(
            flops=2 * n_pad * (f_pad * h_pad + n_pad * h_pad
                               + h_pad * c_pad + n_pad * c_pad),
            transcendentals=n_pad * c_pad,
            bytes_accessed=(n_pad * n_pad + n_pad * f_pad + f_pad * h_pad
                            + h_pad * c_pad) * itemsize
            + (h_pad + c_pad) * 4 + n_pad * c_pad * 4,
        )
        out = pl.pallas_call(
            functools.partial(fused_gcn_kernel, nclass=nclass),
            out_shape=jax.ShapeDtypeStruct((n_pad, c_pad), jnp.float32),
            grid=(1,),
            in_specs=[
                pl.BlockSpec((n_pad, f_pad), lambda i: (0, 0)),
                pl.BlockSpec((n_pad, n_pad), lambda i: (0, 0)),
                pl.BlockSpec((f_pad, h_pad), lambda i: (0, 0)),
                pl.BlockSpec((1, h_pad), lambda i: (0, 0)),
                pl.BlockSpec((h_pad, c_pad), lambda i: (0, 0)),
                pl.BlockSpec((1, c_pad), lambda i: (0, 0)),
            ],
            out_specs=pl.BlockSpec((n_pad, c_pad), lambda i: (0, 0)),
            compiler_params=pltpu.CompilerParams(
                dimension_semantics=("arbitrary",),
                vmem_limit_bytes=_VMEM_LIMIT,
            ),
            cost_estimate=cost,
        )(xp, adjp, w1p, b1p, w2p, b2p)
        return out[:n, :nclass]

    # ------------------------------------------------------------------ tiled
    # Tile selection: tile_k and tile_n are power-of-two multiples of 128 with
    # tile_n | tile_k, and n is padded only to a multiple of tile_k (no LCM
    # blow-up of the N^2 adjacency).
    tile_k = _pick_tile(min(tile_k, n_pad_min))
    tile_n = _pick_tile(min(tile_n, tile_k))
    n_pad = _round_up(n, tile_k)
    # Keep >= 2 row tiles so the "parallel" axis can shard across v7x's 2 TCs.
    if n_pad // tile_n < 2 and tile_n > 128:
        tile_n //= 2
    row_tiles = n_pad // tile_n
    k_tiles = n_pad // tile_k
    tile_n1 = tile_k  # stage 1 gets a larger, independent row tile

    xp = _pad2d(x, n_pad, f_pad, mxu_dtype)
    adjp = _pad2d(adj, n_pad, n_pad, mxu_dtype)
    w1p = _pad2d(w1, f_pad, h_pad, mxu_dtype)
    w2p = _pad2d(w2, h_pad, c_pad, mxu_dtype)
    b1p = _pad2d(b1.reshape(1, -1), 1, h_pad, f32)
    b2p = _pad2d(b2.reshape(1, -1), 1, c_pad, f32)

    # Keep P1 / P2 VMEM-resident in stages 2/3 when they fit (double-buffered
    # accounting), instead of re-streaming them once per row tile.
    p1_resident = 2 * n_pad * h_pad * itemsize <= _RESIDENT_P_BUDGET
    p2_resident = 2 * n_pad * c_pad * itemsize <= _RESIDENT_P_BUDGET

    # ---- Stage 1: P1 = x @ W1 + b1  (row-tiled, weights resident) ----------
    cost1 = pl.CostEstimate(
        flops=2 * n_pad * f_pad * h_pad,
        transcendentals=0,
        bytes_accessed=(n_pad * f_pad + f_pad * h_pad + n_pad * h_pad)
        * itemsize + h_pad * 4,
    )
    p1 = pl.pallas_call(
        linear_bias_kernel,
        out_shape=jax.ShapeDtypeStruct((n_pad, h_pad), mxu_dtype),
        grid=(n_pad // tile_n1,),
        in_specs=[
            pl.BlockSpec((tile_n1, f_pad), lambda i: (i, 0)),
            pl.BlockSpec((f_pad, h_pad), lambda i: (0, 0)),
            pl.BlockSpec((1, h_pad), lambda i: (0, 0)),
        ],
        out_specs=pl.BlockSpec((tile_n1, h_pad), lambda i: (i, 0)),
        compiler_params=pltpu.CompilerParams(
            dimension_semantics=("parallel",),
            vmem_limit_bytes=_VMEM_LIMIT,
        ),
        cost_estimate=cost1,
    )(xp, w1p, b1p)

    # ---- Stage 2: P2 = relu(adj @ P1) @ W2 + b2 -----------------------------
    p1_reads = 1 if p1_resident else row_tiles
    cost2 = pl.CostEstimate(
        flops=2 * n_pad * n_pad * h_pad + 2 * n_pad * h_pad * c_pad,
        transcendentals=0,
        bytes_accessed=(n_pad * n_pad + p1_reads * n_pad * h_pad
                        + h_pad * c_pad + n_pad * c_pad) * itemsize
        + c_pad * 4,
    )
    if p1_resident:
        p1_spec = pl.BlockSpec((n_pad, h_pad), lambda i, k: (0, 0))
    else:
        p1_spec = pl.BlockSpec((tile_k, h_pad), lambda i, k: (k, 0))
    p2 = pl.pallas_call(
        functools.partial(agg_relu_linear_kernel, tile_k=tile_k,
                          p_resident=p1_resident),
        out_shape=jax.ShapeDtypeStruct((n_pad, c_pad), mxu_dtype),
        grid=(row_tiles, k_tiles),
        in_specs=[
            pl.BlockSpec((tile_n, tile_k), lambda i, k: (i, k)),
            p1_spec,
            pl.BlockSpec((h_pad, c_pad), lambda i, k: (0, 0)),
            pl.BlockSpec((1, c_pad), lambda i, k: (0, 0)),
        ],
        out_specs=pl.BlockSpec((tile_n, c_pad), lambda i, k: (i, 0)),
        scratch_shapes=[pltpu.VMEM((tile_n, h_pad), jnp.float32)],
        compiler_params=pltpu.CompilerParams(
            dimension_semantics=("parallel", "arbitrary"),
            vmem_limit_bytes=_VMEM_LIMIT,
        ),
        cost_estimate=cost2,
    )(adjp, p1, w2p, b2p)

    # ---- Stage 3: out = log_softmax(adj @ P2, axis=1) ------------------------
    p2_reads = 1 if p2_resident else row_tiles
    cost3 = pl.CostEstimate(
        flops=2 * n_pad * n_pad * c_pad,
        transcendentals=n_pad * c_pad + n_pad,
        bytes_accessed=(n_pad * n_pad + p2_reads * n_pad * c_pad) * itemsize
        + n_pad * c_pad * 4,
    )
    if p2_resident:
        p2_spec = pl.BlockSpec((n_pad, c_pad), lambda i, k: (0, 0))
    else:
        p2_spec = pl.BlockSpec((tile_k, c_pad), lambda i, k: (k, 0))
    out = pl.pallas_call(
        functools.partial(agg_logsoftmax_kernel, tile_k=tile_k,
                          p_resident=p2_resident, nclass=nclass),
        out_shape=jax.ShapeDtypeStruct((n_pad, c_pad), jnp.float32),
        grid=(row_tiles, k_tiles),
        in_specs=[
            pl.BlockSpec((tile_n, tile_k), lambda i, k: (i, k)),
            p2_spec,
        ],
        out_specs=pl.BlockSpec((tile_n, c_pad), lambda i, k: (i, 0)),
        scratch_shapes=[pltpu.VMEM((tile_n, c_pad), jnp.float32)],
        compiler_params=pltpu.CompilerParams(
            dimension_semantics=("parallel", "arbitrary"),
            vmem_limit_bytes=_VMEM_LIMIT,
        ),
        cost_estimate=cost3,
    )(adjp, p2)

    return out[:n, :nclass]


# ----------------------------------------------------------------------------
# References
# ----------------------------------------------------------------------------
def reference_forward(x, adj, w1, b1, w2, b2, cast_dtype=None):
    """Pure-JAX reference.  cast_dtype=None -> exact f32 (PyTorch semantics);
    otherwise uses the same bf16-operand / f32-accumulate precision chain as
    the kernel."""
    if cast_dtype is None:
        h = jnp.maximum(adj @ (x @ w1 + b1), 0.0)
        z = adj @ (h @ w2 + b2)
        return jax.nn.log_softmax(z, axis=1)

    dt = cast_dtype

    def mm(a, b):
        return jnp.dot(a.astype(dt), b.astype(dt),
                       preferred_element_type=jnp.float32)

    p1 = (mm(x, w1) + b1).astype(dt)
    h = jnp.maximum(mm(adj, p1), 0.0).astype(dt)
    p2 = (mm(h, w2) + b2).astype(dt)
    z = mm(adj, p2)
    return jax.nn.log_softmax(z, axis=1)


# ----------------------------------------------------------------------------
# Self-test
# ----------------------------------------------------------------------------
if __name__ == "__main__":
    N, nfeat, nhid, nclass = 300, 96, 64, 10

    key = jax.random.PRNGKey(0)
    kx, ka, k1, k2, k3, k4 = jax.random.split(key, 6)

    x = jax.random.normal(kx, (N, nfeat), dtype=jnp.float32)

    # Row-normalized adjacency with self-loops (dense stand-in for Conlayer).
    a = (jax.random.uniform(ka, (N, N)) < 0.05).astype(jnp.float32)
    a = jnp.minimum(a + jnp.eye(N, dtype=jnp.float32), 1.0)
    adj = a / jnp.sum(a, axis=1, keepdims=True)

    # nn.Linear-style fan-in uniform init (deterministic).
    bound1 = 1.0 / math.sqrt(nfeat)
    w1 = jax.random.uniform(k1, (nfeat, nhid), jnp.float32, -bound1, bound1)
    b1 = jax.random.uniform(k2, (nhid,), jnp.float32, -bound1, bound1)
    bound2 = 1.0 / math.sqrt(nhid)
    w2 = jax.random.uniform(k3, (nhid, nclass), jnp.float32, -bound2, bound2)
    b2 = jax.random.uniform(k4, (nclass,), jnp.float32, -bound2, bound2)

    ref_cast = reference_forward(x, adj, w1, b1, w2, b2, cast_dtype=jnp.bfloat16)
    ref_f32 = reference_forward(x, adj, w1, b1, w2, b2, cast_dtype=None)

    # Auto path (small graph -> fully fused single pallas_call).
    out = gcn_forward(x, adj, w1, b1, w2, b2)
    out = jax.block_until_ready(out)
    assert out.shape == (N, nclass)
    assert bool(jnp.all(jnp.isfinite(out)))
    assert jnp.allclose(out, ref_cast, atol=2e-3, rtol=2e-3), (
        "fused: max |diff| vs matched-precision ref: "
        f"{float(jnp.max(jnp.abs(out - ref_cast)))}")
    assert jnp.allclose(out, ref_f32, atol=5e-2, rtol=5e-2), (
        "fused: max |diff| vs f32 ref: "
        f"{float(jnp.max(jnp.abs(out - ref_f32)))}")

    # Forced tiled path (exercises the large-graph pipeline on small shapes).
    out_t = gcn_forward(x, adj, w1, b1, w2, b2, path="tiled")
    out_t = jax.block_until_ready(out_t)
    assert out_t.shape == (N, nclass)
    assert bool(jnp.all(jnp.isfinite(out_t)))
    assert jnp.allclose(out_t, ref_cast, atol=2e-3, rtol=2e-3), (
        "tiled: max |diff| vs matched-precision ref: "
        f"{float(jnp.max(jnp.abs(out_t - ref_cast)))}")
    assert jnp.allclose(out_t, ref_f32, atol=5e-2, rtol=5e-2), (
        "tiled: max |diff| vs f32 ref: "
        f"{float(jnp.max(jnp.abs(out_t - ref_f32)))}")

    print("KERNEL_OK")
</pallas_src>

<mosaic_0001>
module attributes {stable_mosaic.version = 11 : i64} {
  func.func @fused_gcn_kernel(%arg0: i32, %arg1: memref<384x128xbf16, #tpu.memory_space<vmem>>, %arg2: memref<384x384xbf16, #tpu.memory_space<vmem>>, %arg3: memref<128x128xbf16, #tpu.memory_space<vmem>>, %arg4: memref<1x128xf32, #tpu.memory_space<vmem>>, %arg5: memref<128x128xbf16, #tpu.memory_space<vmem>>, %arg6: memref<1x128xf32, #tpu.memory_space<vmem>>, %arg7: memref<384x128xf32, #tpu.memory_space<vmem>>) attributes {dimension_semantics = [#tpu.dimension_semantics<arbitrary>], iteration_bounds = array<i64: 1>, scalar_prefetch = 0 : i64, scratch_operands = 0 : i64, tpu.core_type = #tpu.core_type<tc>, window_params = [{pipeline_mode = #tpu.pipeline_mode<synchronous>, transform_indices = @transform_0, window_bounds = array<i64: 384, 128>}, {pipeline_mode = #tpu.pipeline_mode<synchronous>, transform_indices = @transform_1, window_bounds = array<i64: 384, 384>}, {pipeline_mode = #tpu.pipeline_mode<synchronous>, transform_indices = @transform_2, window_bounds = array<i64: 128, 128>}, {pipeline_mode = #tpu.pipeline_mode<synchronous>, transform_indices = @transform_3, window_bounds = array<i64: 1, 128>}, {pipeline_mode = #tpu.pipeline_mode<synchronous>, transform_indices = @transform_4, window_bounds = array<i64: 128, 128>}, {pipeline_mode = #tpu.pipeline_mode<synchronous>, transform_indices = @transform_5, window_bounds = array<i64: 1, 128>}, {pipeline_mode = #tpu.pipeline_mode<synchronous>, transform_indices = @transform_6, window_bounds = array<i64: 384, 128>}]} {
    %c0 = arith.constant 0 : index
    %c0_0 = arith.constant 0 : index
    %0 = vector.load %arg2[%c0, %c0_0] : memref<384x384xbf16, #tpu.memory_space<vmem>>, vector<384x384xbf16>
    %c0_1 = arith.constant 0 : index
    %c0_2 = arith.constant 0 : index
    %1 = vector.load %arg1[%c0_1, %c0_2] : memref<384x128xbf16, #tpu.memory_space<vmem>>, vector<384x128xbf16>
    %c0_3 = arith.constant 0 : index
    %c0_4 = arith.constant 0 : index
    %2 = vector.load %arg3[%c0_3, %c0_4] : memref<128x128xbf16, #tpu.memory_space<vmem>>, vector<128x128xbf16>
    %cst = arith.constant dense<0.000000e+00> : vector<384x128xf32>
    %3 = tpu.matmul %1, %2, %cst {dimension_numbers = #tpu.dot_dimension_numbers<[1], [0], [0], [1], [0, 0, 1, 1], [], []>} : vector<384x128xbf16>, vector<128x128xbf16>, vector<384x128xf32> -> vector<384x128xf32>
    %c0_5 = arith.constant 0 : index
    %c0_6 = arith.constant 0 : index
    %4 = vector.load %arg4[%c0_5, %c0_6] : memref<1x128xf32, #tpu.memory_space<vmem>>, vector<1x128xf32>
    %5 = vector.broadcast %4 : vector<1x128xf32> to vector<384x128xf32>
    %6 = arith.addf %3, %5 : vector<384x128xf32>
    %7 = arith.truncf %6 : vector<384x128xf32> to vector<384x128xbf16>
    %cst_7 = arith.constant dense<0.000000e+00> : vector<384x128xf32>
    %8 = tpu.matmul %0, %7, %cst_7 {dimension_numbers = #tpu.dot_dimension_numbers<[1], [0], [0], [1], [0, 0, 1, 1], [], []>} : vector<384x384xbf16>, vector<384x128xbf16>, vector<384x128xf32> -> vector<384x128xf32>
    %cst_8 = arith.constant 0.000000e+00 : f32
    %9 = vector.broadcast %cst_8 : f32 to vector<384x128xf32>
    %10 = arith.maximumf %8, %9 : vector<384x128xf32>
    %11 = arith.truncf %10 : vector<384x128xf32> to vector<384x128xbf16>
    %c0_9 = arith.constant 0 : index
    %c0_10 = arith.constant 0 : index
    %12 = vector.load %arg5[%c0_9, %c0_10] : memref<128x128xbf16, #tpu.memory_space<vmem>>, vector<128x128xbf16>
    %cst_11 = arith.constant dense<0.000000e+00> : vector<384x128xf32>
    %13 = tpu.matmul %11, %12, %cst_11 {dimension_numbers = #tpu.dot_dimension_numbers<[1], [0], [0], [1], [0, 0, 1, 1], [], []>} : vector<384x128xbf16>, vector<128x128xbf16>, vector<384x128xf32> -> vector<384x128xf32>
    %c0_12 = arith.constant 0 : index
    %c0_13 = arith.constant 0 : index
    %14 = vector.load %arg6[%c0_12, %c0_13] : memref<1x128xf32, #tpu.memory_space<vmem>>, vector<1x128xf32>
    %15 = vector.broadcast %14 : vector<1x128xf32> to vector<384x128xf32>
    %16 = arith.addf %13, %15 : vector<384x128xf32>
    %17 = arith.truncf %16 : vector<384x128xf32> to vector<384x128xbf16>
    %cst_14 = arith.constant dense<0.000000e+00> : vector<384x128xf32>
    %18 = tpu.matmul %0, %17, %cst_14 {dimension_numbers = #tpu.dot_dimension_numbers<[1], [0], [0], [1], [0, 0, 1, 1], [], []>} : vector<384x384xbf16>, vector<384x128xbf16>, vector<384x128xf32> -> vector<384x128xf32>
    %19 = tpu.iota {dimensions = array<i32: 1>} : vector<384x128xi32>
    %c10_i32 = arith.constant 10 : i32
    %20 = vector.broadcast %c10_i32 : i32 to vector<384x128xi32>
    %21 = arith.cmpi slt, %19, %20 : vector<384x128xi32>
    %cst_15 = arith.constant -1.000000e+30 : f32
    %22 = vector.broadcast %cst_15 : f32 to vector<384x128xf32>
    %23 = arith.select %21, %18, %22 : vector<384x128xi1>, vector<384x128xf32>
    %cst_16 = arith.constant dense<0xFF800000> : vector<384xf32>
    %24 = vector.multi_reduction <maximumf>, %23, %cst_16 [1] : vector<384x128xf32> to vector<384xf32>
    %25 = vector.shape_cast %24 : vector<384xf32> to vector<384x1xf32>
    %26 = vector.broadcast %25 : vector<384x1xf32> to vector<384x128xf32>
    %27 = arith.subf %23, %26 : vector<384x128xf32>
    %28 = math.exp %27 : vector<384x128xf32>
    %cst_17 = arith.constant dense<0.000000e+00> : vector<384xf32>
    %29 = vector.multi_reduction <add>, %28, %cst_17 [1] : vector<384x128xf32> to vector<384xf32>
    %30 = vector.shape_cast %29 : vector<384xf32> to vector<384x1xf32>
    %31 = math.log %30 : vector<384x1xf32>
    %32 = vector.broadcast %31 : vector<384x1xf32> to vector<384x128xf32>
    %33 = arith.subf %27, %32 : vector<384x128xf32>
    %c0_18 = arith.constant 0 : index
    %c0_19 = arith.constant 0 : index
    %34 = vector.load %arg7[%c0_18, %c0_19] : memref<384x128xf32, #tpu.memory_space<vmem>>, vector<384x128xf32>
    tpu.vector_store %arg7[%c0_18, %c0_19], %33 {strides = array<i32>} : memref<384x128xf32, #tpu.memory_space<vmem>>, vector<384x128xf32>,
    return
  }
  func.func @transform_0(%arg0: i32) -> (i32, i32) {
    %c0_i32 = arith.constant 0 : i32
    %c0_i32_0 = arith.constant 0 : i32
    %c0_i32_1 = arith.constant 0 : i32
    return %c0_i32, %c0_i32_0 : i32, i32
  }
  func.func @transform_1(%arg0: i32) -> (i32, i32) {
    %c0_i32 = arith.constant 0 : i32
    %c0_i32_0 = arith.constant 0 : i32
    %c0_i32_1 = arith.constant 0 : i32
    return %c0_i32, %c0_i32_0 : i32, i32
  }
  func.func @transform_2(%arg0: i32) -> (i32, i32) {
    %c0_i32 = arith.constant 0 : i32
    %c0_i32_0 = arith.constant 0 : i32
    %c0_i32_1 = arith.constant 0 : i32
    return %c0_i32, %c0_i32_0 : i32, i32
  }
  func.func @transform_3(%arg0: i32) -> (i32, i32) {
    %c0_i32 = arith.constant 0 : i32
    %c0_i32_0 = arith.constant 0 : i32
    %c0_i32_1 = arith.constant 0 : i32
    return %c0_i32, %c0_i32_0 : i32, i32
  }
  func.func @transform_4(%arg0: i32) -> (i32, i32) {
    %c0_i32 = arith.constant 0 : i32
    %c0_i32_0 = arith.constant 0 : i32
    %c0_i32_1 = arith.constant 0 : i32
    return %c0_i32, %c0_i32_0 : i32, i32
  }
  func.func @transform_5(%arg0: i32) -> (i32, i32) {
    %c0_i32 = arith.constant 0 : i32
    %c0_i32_0 = arith.constant 0 : i32
    %c0_i32_1 = arith.constant 0 : i32
    return %c0_i32, %c0_i32_0 : i32, i32
  }
  func.func @transform_6(%arg0: i32) -> (i32, i32) {
    %c0_i32 = arith.constant 0 : i32
    %c0_i32_0 = arith.constant 0 : i32
    %c0_i32_1 = arith.constant 0 : i32
    return %c0_i32, %c0_i32_0 : i32, i32
  }
}

</mosaic_0001>

<bundles_post_ra>
// kernel: tpu_custom_call.1
= control target key start
LH: loop header
LB: loop body
LE: loop exit
PB: predicated region body
PF: predicated region fallthrough
CT: control target
= control target key end

     0   :  { %11 = vsyncpa [#allocation3], 0  ;;  %s4753_s0 = inlined_call_operand.hbm [shape: bf16[384,128], index: 0, kind: input, shape index: {}]   ;;  %s4754_s1 = inlined_call_operand.hbm [shape: bf16[384,384], index: 1, kind: input, shape index: {}]   ;;  %s4755_s2 = inlined_call_operand.hbm [shape: bf16[128,128], index: 2, kind: input, shape index: {}]   ;;  %s4756_s3 = inlined_call_operand.vmem [shape: f32[1,128], index: 3, kind: input, shape index: {}]   ;;  %s4757_s4 = inlined_call_operand.hbm [shape: bf16[128,128], index: 4, kind: input, shape index: {}]   ;;  %s4758_s5 = inlined_call_operand.vmem [shape: f32[1,128], index: 5, kind: input, shape index: {}]   ;;  %s4759_s6 = inlined_call_operand.hbm [shape: f32[384,128], index: 6, kind: output, shape index: {}]  }
   0x1   :  { %12 = vsyncpa [#allocation6], 0 }
   0x2   :  { %13 = vsyncpa [#allocation9], 0 }
   0x3   :  { %14 = vsyncpa [#allocation4], 0  ;;  %s3979_s21 = smov [#allocation5]  }
   0x4   :  { %s32_s22 = sshll.u32 %s3979_s21, 4  ;;  %s33_s22 = int_to_ptr.vmem [resolvable:$true] %s32_s22 }
   0x5   :  { %s3879_s23 = scalar_lea.vmem %s33_s22, 9216  ;;  %p3884_p1 = scmp.lt.s32.totalorder %s33_s22, %s33_s22 }
   0x6   :  { %p3880_p0 = scmp.ne.s32.totalorder %s33_s22, %s3879_s23  ;;  %p3885_p2 = scmp.lt.s32.totalorder %s3879_s23, %s3879_s23 }
   0x8   :  { %p3886_p3 = por %p3885_p2, %p3884_p1 }
   0xa   :  { %p3887_p4 = pnand %p3886_p3, %p3880_p0 }
   0xc   :  { %3890 = shalt.err (!%p3887_p4)
}
   0xd   :  { %s3980_s24 = smov 192   ;;  %s3981_s25 = smov 12  }
   0xe   :  { %38 = dma.hbm_to_vmem [thread:$0]  %s4754_s1, 9216, %s33_s22, [#allocation6], %s3980_s24, %s3980_s24, %s3981_s25  }
   0xf   :  { %s3982_s28 = smov [#allocation2]  }
  0x10   :  { %s20_s29 = sshll.u32 %s3982_s28, 4  ;;  %s21_s29 = int_to_ptr.vmem [resolvable:$true] %s20_s29 }
  0x11   :  { %s3899_s30 = scalar_lea.vmem %s21_s29, 3072  ;;  %p3904_p6 = scmp.lt.s32.totalorder %s21_s29, %s21_s29 }
  0x12   :  { %p3900_p5 = scmp.ne.s32.totalorder %s21_s29, %s3899_s30  ;;  %p3905_p7 = scmp.lt.s32.totalorder %s3899_s30, %s3899_s30 }
  0x14   :  { %p3906_p8 = por %p3905_p7, %p3904_p6 }
  0x16   :  { %p3907_p9 = pnand %p3906_p8, %p3900_p5 }
  0x18   :  { %3910 = shalt.err (!%p3907_p9)
}
  0x19   :  { %s3983_s7 = smov 64   ;;  %s3984_s8 = smov 4  }
  0x1a   :  { %26 = dma.hbm_to_vmem [thread:$0]  %s4753_s0, 3072, %s21_s29, [#allocation3], %s3983_s7, %s3983_s7, %s3984_s8  }
  0x1b   :  { %s3985_s11 = smov [#allocation7]   ;;  %s3986_s13 = smov [#allocation8]  }
  0x1c   :  { %s44_s12 = sshll.u32 %s3985_s11, 4  ;;  %s58_s1 = sshll.u32 %s3986_s13, 4  ;;  %s45_s12 = int_to_ptr.vmem [resolvable:$true] %s44_s12  ;;  %s59_s1 = int_to_ptr.vmem [resolvable:$true] %s58_s1 }
  0x1d   :  { %s3919_s14 = scalar_lea.vmem %s45_s12, 1024  ;;  %p3924_p11 = scmp.lt.s32.totalorder %s45_s12, %s45_s12 }
  0x1e   :  { %p3920_p10 = scmp.ne.s32.totalorder %s45_s12, %s3919_s14  ;;  %p3925_p12 = scmp.lt.s32.totalorder %s3919_s14, %s3919_s14 }
  0x20   :  { %p3926_p13 = por %p3925_p12, %p3924_p11 }
  0x22   :  { %p3927_p0 = pnand %p3926_p13, %p3920_p10 }
  0x24   :  { %3930 = shalt.err (!%p3927_p0)
}
  0x25   :  { %50 = dma.hbm_to_vmem [thread:$0]  %s4755_s2, 1024, %s45_s12, [#allocation6], %s3983_s7, %s3983_s7, %s3984_s8  }
  0x26   :  { %s3939_s17 = scalar_lea.vmem %s59_s1, 1024  ;;  %p3944_p2 = scmp.lt.s32.totalorder %s59_s1, %s59_s1 }
  0x27   :  { %p3940_p1 = scmp.ne.s32.totalorder %s59_s1, %s3939_s17  ;;  %p3945_p3 = scmp.lt.s32.totalorder %s3939_s17, %s3939_s17 }
  0x29   :  { %p3946_p4 = por %p3945_p3, %p3944_p2 }
  0x2b   :  { %p3947_p5 = pnand %p3946_p4, %p3940_p1 }
  0x2d   :  { %3950 = shalt.err (!%p3947_p5)
}
  0x2e   :  { %64 = dma.hbm_to_vmem [thread:$0]  %s4757_s4, 1024, %s59_s1, [#allocation9], %s3983_s7, %s3983_s7, %s3984_s8  }
  0x2f   :  { %3971 = dma.done.wait [#allocation3], 3072  }
  0x30   :  { %3972 = vsyncadd [#allocation3], 4294964224 }
  0x31   :  { %3973 = dma.done.wait [#allocation6], 10240  }
  0x32   :  { %3974 = vsyncadd [#allocation6], 4294957056 }
  0x33   :  { %3975 = dma.done.wait [#allocation9], 1024  }
  0x34   :  { %3976 = vsyncadd [#allocation9], 4294966272  ;;  %v3472_v0 = vld [vmem:[#allocation7 + $0x38] sm:$0xff]   ;;  %v3473_v1 = vld [vmem:[#allocation7 + $0x30] sm:$0xff]   ;;  %v3987_v32 = vmov 0  }
  0x35   :  { %3204 = vmatprep.subr.bf16.mxu0 %v3472_v0  ;;  %v3474_v2 = vld [vmem:[#allocation7 + $0x28] sm:$0xff]   ;;  %v3475_v3 = vld [vmem:[#allocation7 + $0x20] sm:$0xff]   ;;  %v3476_v5 = vld [vmem:[#allocation7 + $0x18] sm:$0xff]   ;;  %1072 = vmatprep.subr.bf16.mxu1 %v3987_v32 }
  0x36   :  { %3205 = vmatpush3.bf16.msra.mxu0 %v3472_v0  ;;  %v3480_v4 = vld [vmem:[#allocation2] sm:$0xff]   ;;  %v3477_v6 = vld [vmem:[#allocation7 + $0x10] sm:$0xff]   ;;  %v3478_v7 = vld [vmem:[#allocation7 + $0x8] sm:$0xff]  }
  0x37   :  { %3206 = vmatprep.subr.bf16.mxu0 %v3473_v1  ;;  %3220 = vmatprep.mubr.bf16.mxu0 %v3480_v4  ;;  %v3479_v8 = vld [vmem:[#allocation7] sm:$0xff]   ;;  %v3481_v9 = vld [vmem:[#allocation2 + $0x8] sm:$0xff]   ;;  %v3482_v10 = vld [vmem:[#allocation2 + $0x10] sm:$0xff]  }
  0x38   :  { %v3483_v11 = vld [vmem:[#allocation2 + $0x18] sm:$0xff]   ;;  %v3484_v12 = vld [vmem:[#allocation2 + $0x20] sm:$0xff]   ;;  %v3485_v13 = vld [vmem:[#allocation2 + $0x28] sm:$0xff]  }
  0x39   :  { %v3486_v14 = vld [vmem:[#allocation2 + $0x30] sm:$0xff]   ;;  %v3487_v15 = vld [vmem:[#allocation2 + $0x38] sm:$0xff]   ;;  %v3488_v16 = vld [vmem:[#allocation2 + $0x40] sm:$0xff]  }
  0x3a   :  { %3207 = vmatpush3.bf16.msra.mxu0 %v3473_v1  ;;  %v3489_v17 = vld [vmem:[#allocation2 + $0x48] sm:$0xff]   ;;  %v3490_v18 = vld [vmem:[#allocation2 + $0x50] sm:$0xff]   ;;  %v3491_v19 = vld [vmem:[#allocation2 + $0x58] sm:$0xff]  }
  0x3b   :  { %3208 = vmatprep.subr.bf16.mxu0 %v3474_v2  ;;  %v3492_v20 = vld [vmem:[#allocation2 + $0x60] sm:$0xff]   ;;  %v3493_v21 = vld [vmem:[#allocation2 + $0x68] sm:$0xff]   ;;  %v3494_v22 = vld [vmem:[#allocation2 + $0x70] sm:$0xff]  }
  0x3c   :  { %v3495_v23 = vld [vmem:[#allocation2 + $0x78] sm:$0xff]   ;;  %v3496_v24 = vld [vmem:[#allocation2 + $0x80] sm:$0xff]   ;;  %v3497_v25 = vld [vmem:[#allocation2 + $0x88] sm:$0xff]  }
  0x3d   :  { %v3498_v26 = vld [vmem:[#allocation2 + $0x90] sm:$0xff]   ;;  %v3499_v27 = vld [vmem:[#allocation2 + $0x98] sm:$0xff]   ;;  %v3500_v28 = vld [vmem:[#allocation2 + $0xa0] sm:$0xff]  }
  0x3e   :  { %3209 = vmatpush3.bf16.msra.mxu0 %v3474_v2  ;;  %v3501_v29 = vld [vmem:[#allocation2 + $0xa8] sm:$0xff]   ;;  %v3502_v30 = vld [vmem:[#allocation2 + $0xb0] sm:$0xff]   ;;  %v3503_v31 = vld [vmem:[#allocation2 + $0xb8] sm:$0xff]  }
  0x3f   :  { %3210 = vmatprep.subr.bf16.mxu0 %v3475_v3  ;;  %v4039_v33 = vld [vmem:[#allocation5 + $0x4] ss:$12 sps:$4 sm:$0xff]   ;;  %v3519_v34 = vld [vmem:[#allocation5 + $0x8] ss:$12 sps:$4 sm:$0xff]   ;;  %v4047_v49 = vld [vmem:[%s4756_s3] ss:$0 sm:$0xff] }
  0x40   :  { %1104 = vmatprep.mubr.bf16.mxu1 %v4039_v33 }
  0x42   :  { %3211 = vmatpush3.bf16.msra.mxu0 %v3475_v3 }
  0x43   :  { %3212 = vmatprep.subr.bf16.mxu0 %v3476_v5 }
  0x46   :  { %3213 = vmatpush3.bf16.msra.mxu0 %v3476_v5 }
  0x47   :  { %3214 = vmatprep.subr.bf16.mxu0 %v3477_v6 }
  0x4a   :  { %3215 = vmatpush3.bf16.msra.mxu0 %v3477_v6 }
  0x4b   :  { %3216 = vmatprep.subr.bf16.mxu0 %v3478_v7 }
  0x4e   :  { %3217 = vmatpush3.bf16.msra.mxu0 %v3478_v7 }
  0x4f   :  { %3218 = vmatprep.subr.bf16.mxu0 %v3479_v8 }
  0x52   :  { %3219 = vmatpush3.bf16.msra.mxu0 %v3479_v8 }
  0x55   :  { %3221 = vmatmul.mubr.bf16.vlgmr.msra.gmra.mxu0 %v3481_v9 }
  0x56   :  { %3224 = vmatprep.mubr.bf16.mxu0 %v3482_v10 }
  0x5d   :  { %3225 = vmatmul.mubr.bf16.gmra.mxu0 %v3483_v11 }
  0x5e   :  { %3228 = vmatprep.mubr.bf16.mxu0 %v3484_v12 }
  0x65   :  { %3229 = vmatmul.mubr.bf16.gmra.mxu0 %v3485_v13 }
  0x66   :  { %3232 = vmatprep.mubr.bf16.mxu0 %v3486_v14 }
  0x6d   :  { %3233 = vmatmul.mubr.bf16.gmra.mxu0 %v3487_v15 }
  0x6e   :  { %3236 = vmatprep.mubr.bf16.mxu0 %v3488_v16 }
  0x75   :  { %3237 = vmatmul.mubr.bf16.gmra.mxu0 %v3489_v17 }
  0x76   :  { %3240 = vmatprep.mubr.bf16.mxu0 %v3490_v18 }
  0x7d   :  { %3241 = vmatmul.mubr.bf16.gmra.mxu0 %v3491_v19 }
  0x7e   :  { %3244 = vmatprep.mubr.bf16.mxu0 %v3492_v20 }
  0x85   :  { %3245 = vmatmul.mubr.bf16.gmra.mxu0 %v3493_v21 }
  0x86   :  { %3248 = vmatprep.mubr.bf16.mxu0 %v3494_v22 }
  0x8d   :  { %3249 = vmatmul.mubr.bf16.gmra.mxu0 %v3495_v23 }
  0x8e   :  { %3252 = vmatprep.mubr.bf16.mxu0 %v3496_v24 }
  0x95   :  { %3253 = vmatmul.mubr.bf16.gmra.mxu0 %v3497_v25 }
  0x96   :  { %3256 = vmatprep.mubr.bf16.mxu0 %v3498_v26 }
  0x9d   :  { %3257 = vmatmul.mubr.bf16.gmra.mxu0 %v3499_v27 }
  0x9e   :  { %3260 = vmatprep.mubr.bf16.mxu0 %v3500_v28 }
  0xa5   :  { %3261 = vmatmul.mubr.bf16.gmra.mxu0 %v3501_v29 }
  0xa6   :  { %3264 = vmatprep.mubr.bf16.mxu0 %v3502_v30 }
  0xad   :  { %3265 = vmatmul.mubr.bf16.gmra.mxu0 %v3503_v31 }
  0xae   :  { %3284 = vmatprep.mubr.bf16.mxu0 %v3519_v34 }
 0x115   :  { %v3222_v35 = vpop.f32.mrf.mxu0 }
 0x116   :  { %v482_v18 = vadd.f32 %v3222_v35, %v4047_v49 }
 0x117   :  { %v4042_v36 = vpop.f32.mrf.mxu0 }
 0x118   :  { %v474_v23 = vadd.f32 %v4047_v49, %v4042_v36 }
 0x119   :  { %v3223_v37 = vpop.f32.mrf.mxu0 }
 0x11a   :  { %v485_v15 = vadd.f32 %v3223_v37, %v4047_v49 }
 0x11b   :  { %v476_v38 = vpop.f32.mrf.mxu0 }
 0x11c   :  { %v665_v20 = vpack.c.bf16 %v485_v15, %v482_v18  ;;  %v477_v21 = vadd.f32 %v4047_v49, %v476_v38 }
 0x11d   :  { %v3226_v39 = vpop.f32.mrf.mxu0 }
 0x11e   :  { %v498_v8 = vadd.f32 %v3226_v39, %v4047_v49  ;;  %v664_v25 = vpack.c.bf16 %v477_v21, %v474_v23  ;;  %v3510_v21 = vld [vmem:[#allocation5 + $0x34] ss:$12 sps:$4 sm:$0xff]  }
 0x11f   :  { %v489_v40 = vpop.f32.mrf.mxu0 }
 0x120   :  { %v490_v13 = vadd.f32 %v4047_v49, %v489_v40 }
 0x121   :  { %v3227_v41 = vpop.f32.mrf.mxu0 }
 0x122   :  { %v501_v5 = vadd.f32 %v3227_v41, %v4047_v49 }
 0x123   :  { %v492_v42 = vpop.f32.mrf.mxu0 }
 0x124   :  { %v667_v10 = vpack.c.bf16 %v501_v5, %v498_v8  ;;  %v493_v11 = vadd.f32 %v4047_v49, %v492_v42 }
 0x125   :  { %v3230_v43 = vpop.f32.mrf.mxu0 }
 0x126   :  { %v514_v62 = vadd.f32 %v3230_v43, %v4047_v49  ;;  %v666_v16 = vpack.c.bf16 %v493_v11, %v490_v13 }
 0x127   :  { %v505_v44 = vpop.f32.mrf.mxu0 }
 0x128   :  { %v506_v3 = vadd.f32 %v4047_v49, %v505_v44 }
 0x129   :  { %v3231_v45 = vpop.f32.mrf.mxu0 }
 0x12a   :  { %v517_v59 = vadd.f32 %v3231_v45, %v4047_v49 }
 0x12b   :  { %v508_v46 = vpop.f32.mrf.mxu0 }
 0x12c   :  { %v669_v0 = vpack.c.bf16 %v517_v59, %v514_v62  ;;  %v509_v1 = vadd.f32 %v4047_v49, %v508_v46 }
 0x12d   :  { %v3234_v47 = vpop.f32.mrf.mxu0 }
 0x12e   :  { %v530_v51 = vadd.f32 %v3234_v47, %v4047_v49  ;;  %v668_v6 = vpack.c.bf16 %v509_v1, %v506_v3 }
 0x12f   :  { %v521_v48 = vpop.f32.mrf.mxu0 }
 0x130   :  { %v522_v57 = vadd.f32 %v4047_v49, %v521_v48 }
 0x131   :  { %v3235_v50 = vpop.f32.mrf.mxu0 }
 0x132   :  { %v533_v52 = vadd.f32 %v3235_v50, %v4047_v49 }
 0x133   :  { %v524_v53 = vpop.f32.mrf.mxu0 }
 0x134   :  { %v525_v54 = vadd.f32 %v4047_v49, %v524_v53  ;;  %v671_v55 = vpack.c.bf16 %v533_v52, %v530_v51 }
 0x135   :  { %v4052_v56 = vpop.f32.mrf.mxu0 }
 0x136   :  { %1073 = vmatpush1.bf16.msra.mxu1 %v671_v55  ;;  %v670_v60 = vpack.c.bf16 %v525_v54, %v522_v57  ;;  %v546_v1 = vadd.f32 %v4052_v56, %v4047_v49 }
 0x137   :  { %v4055_v58 = vpop.f32.mrf.mxu0  ;;  %1074 = vmatprep.subr.bf16.mxu1 %v3987_v32 }
 0x139   :  { %v4059_v61 = vpop.f32.mrf.mxu0 }
 0x13a   :  { %1075 = vmatpush1.bf16.msra.mxu1 %v670_v60  ;;  %v549_v60 = vadd.f32 %v4059_v61, %v4047_v49 }
 0x13b   :  { %v4062_v63 = vpop.f32.mrf.mxu0  ;;  %1076 = vmatprep.subr.bf16.mxu1 %v3987_v32 }
 0x13c   :  { %v673_v3 = vpack.c.bf16 %v549_v60, %v546_v1  ;;  %v3539_v60 = vld [vmem:[#allocation5 + $0xdc] ss:$12 sps:$4 sm:$0xff]   ;;  %v3541_v1 = vld [vmem:[#allocation5 + $0xd8] ss:$12 sps:$4 sm:$0xff]  }
 0x13d   :  { %v4066_v2 = vpop.f32.mrf.mxu0 }
 0x13e   :  { %1077 = vmatpush1.bf16.msra.mxu1 %v669_v0  ;;  %v562_v51 = vadd.f32 %v4066_v2, %v4047_v49 }
 0x13f   :  { %v4069_v4 = vpop.f32.mrf.mxu0  ;;  %1078 = vmatprep.subr.bf16.mxu1 %v3987_v32 }
 0x140   :  { %v554_v57 = vadd.f32 %v4047_v49, %v4069_v4  ;;  %v541_v4 = vadd.f32 %v4047_v49, %v4062_v63 }
 0x141   :  { %v3243_v7 = vpop.f32.mrf.mxu0 }
 0x142   :  { %1079 = vmatpush1.bf16.msra.mxu1 %v668_v6  ;;  %v565_v47 = vadd.f32 %v3243_v7, %v4047_v49  ;;  %v538_v6 = vadd.f32 %v4047_v49, %v4055_v58 }
 0x143   :  { %v556_v9 = vpop.f32.mrf.mxu0  ;;  %1080 = vmatprep.subr.bf16.mxu1 %v3987_v32 }
 0x144   :  { %v675_v53 = vpack.c.bf16 %v565_v47, %v562_v51  ;;  %v557_v54 = vadd.f32 %v4047_v49, %v556_v9  ;;  %v672_v61 = vpack.c.bf16 %v541_v4, %v538_v6  ;;  %v3504_v9 = vld [vmem:[#allocation5] ss:$12 sps:$4 sm:$0xff]   ;;  %v3525_v47 = vld [vmem:[#allocation5 + $0x50] ss:$12 sps:$4 sm:$0xff]   ;;  %v3558_v4 = vld [vmem:[#allocation5 + $0x128] ss:$12 sps:$4 sm:$0xff]  }
 0x145   :  { %v3246_v12 = vpop.f32.mrf.mxu0  ;;  %v3531_v51 = vld [vmem:[#allocation5 + $0xac] ss:$12 sps:$4 sm:$0xff]  }
 0x146   :  { %1081 = vmatpush1.bf16.msra.mxu1 %v667_v10  ;;  %v578_v40 = vadd.f32 %v3246_v12, %v4047_v49  ;;  %v674_v62 = vpack.c.bf16 %v557_v54, %v554_v57  ;;  %v3507_v12 = vld [vmem:[#allocation5 + $0x1c] ss:$12 sps:$4 sm:$0xff]   ;;  %v3545_v6 = vld [vmem:[#allocation5 + $0x10c] ss:$12 sps:$4 sm:$0xff]  }
 0x147   :  { %v569_v14 = vpop.f32.mrf.mxu0  ;;  %1082 = vmatprep.subr.bf16.mxu1 %v3987_v32  ;;  %v3535_v54 = vld [vmem:[#allocation5 + $0xb0] ss:$12 sps:$4 sm:$0xff]   ;;  %v3548_v57 = vld [vmem:[#allocation5 + $0xc8] ss:$12 sps:$4 sm:$0xff]  }
 0x148   :  { %v570_v45 = vadd.f32 %v4047_v49, %v569_v14 }
 0x149   :  { %v3247_v17 = vpop.f32.mrf.mxu0 }
 0x14a   :  { %1083 = vmatpush1.bf16.msra.mxu1 %v666_v16  ;;  %v581_v37 = vadd.f32 %v3247_v17, %v4047_v49 }
 0x14b   :  { %v572_v19 = vpop.f32.mrf.mxu0  ;;  %1084 = vmatprep.subr.bf16.mxu1 %v3987_v32 }
 0x14c   :  { %v677_v42 = vpack.c.bf16 %v581_v37, %v578_v40  ;;  %v573_v43 = vadd.f32 %v4047_v49, %v572_v19  ;;  %v3515_v37 = vld [vmem:[#allocation5 + $0x48] ss:$12 sps:$4 sm:$0xff]  }
 0x14d   :  { %v3250_v22 = vpop.f32.mrf.mxu0 }
 0x14e   :  { %1085 = vmatpush1.bf16.msra.mxu1 %v665_v20  ;;  %v594_v27 = vadd.f32 %v3250_v22, %v4047_v49  ;;  %v676_v48 = vpack.c.bf16 %v573_v43, %v570_v45  ;;  %v3509_v20 = vld [vmem:[#allocation5 + $0x18] ss:$12 sps:$4 sm:$0xff]   ;;  %v3521_v45 = vld [vmem:[#allocation5 + $0x7c] ss:$12 sps:$4 sm:$0xff]  }
 0x14f   :  { %v585_v24 = vpop.f32.mrf.mxu0  ;;  %1086 = vmatprep.subr.bf16.mxu1 %v3987_v32  ;;  %v3516_v43 = vld [vmem:[#allocation5 + $0x64] ss:$12 sps:$4 sm:$0xff]  }
 0x150   :  { %v586_v35 = vadd.f32 %v4047_v49, %v585_v24 }
 0x151   :  { %v3251_v26 = vpop.f32.mrf.mxu0 }
 0x152   :  { %v597_v28 = vadd.f32 %v3251_v26, %v4047_v49  ;;  %1087 = vmatpush1.bf16.msra.mxu1 %v664_v25  ;;  %v3512_v25 = vld [vmem:[#allocation5 + $0x30] ss:$12 sps:$4 sm:$0xff]  }
 0x153   :  { %v588_v29 = vpop.f32.mrf.mxu0  ;;  %1088 = vmatprep.subr.bf16.mxu1 %v3987_v32 }
 0x154   :  { %v679_v30 = vpack.c.bf16 %v597_v28, %v594_v27  ;;  %v589_v31 = vadd.f32 %v4047_v49, %v588_v29  ;;  %v3513_v29 = vld [vmem:[#allocation5 + $0x4c] ss:$12 sps:$4 sm:$0xff]  }
 0x155   :  { %v4089_v34 = vpop.f32.mrf.mxu0 }
 0x156   :  { %1089 = vmatpush2.bf16.msra.mxu1 %v679_v30  ;;  %v678_v38 = vpack.c.bf16 %v589_v31, %v586_v35  ;;  %v610_v30 = vadd.f32 %v4089_v34, %v4047_v49 }
 0x157   :  { %v4092_v36 = vpop.f32.mrf.mxu0  ;;  %1090 = vmatprep.subr.bf16.mxu1 %v3987_v32 }
 0x159   :  { %v4096_v39 = vpop.f32.mrf.mxu0 }
 0x15a   :  { %1091 = vmatpush2.bf16.msra.mxu1 %v678_v38  ;;  %v613_v31 = vadd.f32 %v4096_v39, %v4047_v49  ;;  %v602_v38 = vadd.f32 %v4047_v49, %v4092_v36  ;;  %v3518_v39 = vld [vmem:[#allocation5 + $0x60] ss:$12 sps:$4 sm:$0xff]   ;;  %v3523_v36 = vld [vmem:[#allocation5 + $0x78] ss:$12 sps:$4 sm:$0xff]  }
 0x15b   :  { %v4099_v41 = vpop.f32.mrf.mxu0  ;;  %1092 = vmatprep.subr.bf16.mxu1 %v3987_v32 }
 0x15c   :  { %v681_v40 = vpack.c.bf16 %v613_v31, %v610_v30  ;;  %v3568_v30 = vld [vmem:[#allocation5 + $0x184] ss:$12 sps:$4 sm:$0xff]  }
 0x15d   :  { %v3258_v44 = vpop.f32.mrf.mxu0  ;;  %v3596_v31 = vld [vmem:[#allocation5 + $0x230] ss:$12 sps:$4 sm:$0xff]  }
 0x15e   :  { %1093 = vmatpush2.bf16.msra.mxu1 %v677_v42  ;;  %v626_v23 = vadd.f32 %v3258_v44, %v4047_v49  ;;  %v605_v42 = vadd.f32 %v4047_v49, %v4099_v41  ;;  %v3520_v44 = vld [vmem:[#allocation5 + $0x20] ss:$12 sps:$4 sm:$0xff]   ;;  %v3529_v41 = vld [vmem:[#allocation5 + $0x68] ss:$12 sps:$4 sm:$0xff]  }
 0x15f   :  { %v4104_v46 = vpop.f32.mrf.mxu0  ;;  %1094 = vmatprep.subr.bf16.mxu1 %v3987_v32 }
 0x160   :  { %v618_v26 = vadd.f32 %v4047_v49, %v4104_v46  ;;  %v680_v34 = vpack.c.bf16 %v605_v42, %v602_v38  ;;  %v3524_v46 = vld [vmem:[#allocation5 + $0x38] ss:$12 sps:$4 sm:$0xff]   ;;  %v3576_v42 = vld [vmem:[#allocation5 + $0x1b0] ss:$12 sps:$4 sm:$0xff]  }
 0x161   :  { %v3259_v50 = vpop.f32.mrf.mxu0  ;;  %v3573_v38 = vld [vmem:[#allocation5 + $0x198] ss:$12 sps:$4 sm:$0xff]  }
 0x162   :  { %1095 = vmatpush2.bf16.msra.mxu1 %v676_v48  ;;  %v629_v24 = vadd.f32 %v3259_v50, %v4047_v49  ;;  %v3528_v48 = vld [vmem:[#allocation5 + $0x90] ss:$12 sps:$4 sm:$0xff]   ;;  %v3530_v50 = vld [vmem:[#allocation5 + $0x80] ss:$12 sps:$4 sm:$0xff]  }
 0x163   :  { %v620_v52 = vpop.f32.mrf.mxu0  ;;  %1096 = vmatprep.subr.bf16.mxu1 %v3987_v32 }
 0x164   :  { %v683_v27 = vpack.c.bf16 %v629_v24, %v626_v23  ;;  %v621_v28 = vadd.f32 %v4047_v49, %v620_v52  ;;  %v3534_v52 = vld [vmem:[#allocation5 + $0x98] ss:$12 sps:$4 sm:$0xff]   ;;  %v3590_v23 = vld [vmem:[#allocation5 + $0x1e8] ss:$12 sps:$4 sm:$0xff]  }
 0x165   :  { %v3262_v55 = vpop.f32.mrf.mxu0  ;;  %v3607_v24 = vld [vmem:[#allocation8] sm:$0xff]  }
 0x166   :  { %1097 = vmatpush2.bf16.msra.mxu1 %v675_v53  ;;  %v642_v58 = vadd.f32 %v3262_v55, %v4047_v49  ;;  %v682_v35 = vpack.c.bf16 %v621_v28, %v618_v26  ;;  %v3533_v53 = vld [vmem:[#allocation5 + $0xa8] ss:$12 sps:$4 sm:$0xff]   ;;  %v3536_v55 = vld [vmem:[#allocation5 + $0xc4] ss:$12 sps:$4 sm:$0xff]   ;;  %v3565_v26 = vld [vmem:[#allocation5 + $0x16c] ss:$12 sps:$4 sm:$0xff]  }
 0x167   :  { %v633_v59 = vpop.f32.mrf.mxu0  ;;  %1098 = vmatprep.subr.bf16.mxu1 %v3987_v32  ;;  %v3595_v28 = vld [vmem:[#allocation5 + $0x218] ss:$12 sps:$4 sm:$0xff]  }
 0x168   :  { %v634_v17 = vadd.f32 %v4047_v49, %v633_v59  ;;  %v3538_v59 = vld [vmem:[#allocation5 + $0xc0] ss:$12 sps:$4 sm:$0xff]  }
 0x169   :  { %v3263_v0 = vpop.f32.mrf.mxu0 }
 0x16a   :  { %1099 = vmatpush2.bf16.msra.mxu1 %v674_v62  ;;  %v645_v13 = vadd.f32 %v3263_v0, %v4047_v49  ;;  %v3549_v62 = vld [vmem:[#allocation5 + $0xe0] ss:$12 sps:$4 sm:$0xff]   ;;  %v3553_v0 = vld [vmem:[#allocation5 + $0xf8] ss:$12 sps:$4 sm:$0xff]  }
 0x16b   :  { %v636_v2 = vpop.f32.mrf.mxu0  ;;  %1100 = vmatprep.subr.bf16.mxu1 %v3987_v32 }
 0x16c   :  { %v685_v18 = vpack.c.bf16 %v645_v13, %v642_v58  ;;  %v637_v19 = vadd.f32 %v4047_v49, %v636_v2  ;;  %v3542_v2 = vld [vmem:[#allocation5 + $0xf4] ss:$12 sps:$4 sm:$0xff]  }
 0x16d   :  { %v3266_v5 = vpop.f32.mrf.mxu0  ;;  %v3603_v58 = vld [vmem:[#allocation8 + $0x20] sm:$0xff]  }
 0x16e   :  { %1101 = vmatpush2.bf16.msra.mxu1 %v673_v3  ;;  %v658_v8 = vadd.f32 %v3266_v5, %v4047_v49  ;;  %v684_v22 = vpack.c.bf16 %v637_v19, %v634_v17  ;;  %v3554_v3 = vld [vmem:[#allocation5 + $0x110] ss:$12 sps:$4 sm:$0xff]   ;;  %v3552_v13 = vld [vmem:[#allocation5 + $0x120] ss:$12 sps:$4 sm:$0xff]   ;;  %v3585_v17 = vld [vmem:[#allocation5 + $0x1b8] ss:$12 sps:$4 sm:$0xff]  }
 0x16f   :  { %v649_v7 = vpop.f32.mrf.mxu0  ;;  %1102 = vmatprep.subr.bf16.mxu1 %v3987_v32  ;;  %v3544_v5 = vld [vmem:[#allocation5 + $0xf0] ss:$12 sps:$4 sm:$0xff]   ;;  %v3557_v19 = vld [vmem:[#allocation5 + $0x138] ss:$12 sps:$4 sm:$0xff]  }
 0x170   :  { %v650_v10 = vadd.f32 %v4047_v49, %v649_v7  ;;  %v3559_v7 = vld [vmem:[#allocation5 + $0x140] ss:$12 sps:$4 sm:$0xff]  }
 0x171   :  { %v3267_v56 = vpop.f32.mrf.mxu0 }
 0x172   :  { %v661_v11 = vadd.f32 %v3267_v56, %v4047_v49  ;;  %1103 = vmatpush2.bf16.msra.mxu1 %v672_v61  ;;  %v3600_v61 = vld [vmem:[#allocation8 + $0x38] sm:$0xff]   ;;  %v3601_v56 = vld [vmem:[#allocation8 + $0x30] sm:$0xff]  }
 0x173   :  { %v652_v63 = vpop.f32.mrf.mxu0  ;;  %1914 = vmatprep.subr.bf16.mxu1 %v3987_v32 }
 0x174   :  { %v687_v14 = vpack.c.bf16 %v661_v11, %v658_v8  ;;  %v653_v15 = vadd.f32 %v4047_v49, %v652_v63  ;;  %v3526_v49 = vld [vmem:[#allocation5 + $0x94] ss:$12 sps:$4 sm:$0xff]   ;;  %v3563_v8 = vld [vmem:[#allocation5 + $0x158] ss:$12 sps:$4 sm:$0xff]   ;;  %v3564_v11 = vld [vmem:[#allocation5 + $0x170] ss:$12 sps:$4 sm:$0xff]  }
 0x175   :  { %1105 = vmatmul.mubr.bf16.vlgmr.msra.gmra.mxu1 %v3504_v9  ;;  %v3547_v9 = vld [vmem:[#allocation5 + $0x108] ss:$12 sps:$4 sm:$0xff]  }
 0x176   :  { %v686_v16 = vpack.c.bf16 %v653_v15, %v650_v10  ;;  %3268 = vmatprep.subr.bf16.mxu0 %v687_v14  ;;  %1112 = vmatprep.mubr.bf16.mxu1 %v3507_v12  ;;  %v3550_v10 = vld [vmem:[#allocation5 + $0x124] ss:$12 sps:$4 sm:$0xff]   ;;  %v3602_v12 = vld [vmem:[#allocation8 + $0x28] sm:$0xff]  }
 0x177   :  { %3269 = vmatpush3.bf16.msra.mxu0 %v687_v14  ;;  %v3580_v63 = vld [vmem:[#allocation5 + $0x188] ss:$12 sps:$4 sm:$0xff]   ;;  %v3581_v15 = vld [vmem:[#allocation5 + $0x1a0] ss:$12 sps:$4 sm:$0xff]  }
 0x178   :  { %3270 = vmatprep.subr.bf16.mxu0 %v686_v16  ;;  %v3555_v14 = vld [vmem:[#allocation5 + $0x13c] ss:$12 sps:$4 sm:$0xff]  }
 0x17b   :  { %3271 = vmatpush3.bf16.msra.mxu0 %v686_v16  ;;  %v3604_v16 = vld [vmem:[#allocation8 + $0x18] sm:$0xff]  }
 0x17c   :  { %3272 = vmatprep.subr.bf16.mxu0 %v685_v18 }
 0x17d   :  { %1113 = vmatmul.mubr.bf16.gmra.mxu1 %v3509_v20  ;;  %v3560_v20 = vld [vmem:[#allocation5 + $0x154] ss:$12 sps:$4 sm:$0xff]  }
 0x17e   :  { %1120 = vmatprep.mubr.bf16.mxu1 %v3510_v21  ;;  %v3586_v21 = vld [vmem:[#allocation5 + $0x1d0] ss:$12 sps:$4 sm:$0xff]  }
 0x17f   :  { %3273 = vmatpush3.bf16.msra.mxu0 %v685_v18  ;;  %v3605_v18 = vld [vmem:[#allocation8 + $0x10] sm:$0xff]  }
 0x180   :  { %3274 = vmatprep.subr.bf16.mxu0 %v684_v22 }
 0x183   :  { %3275 = vmatpush3.bf16.msra.mxu0 %v684_v22  ;;  %v3606_v22 = vld [vmem:[#allocation8 + $0x8] sm:$0xff]  }
 0x184   :  { %3276 = vmatprep.subr.bf16.mxu0 %v683_v27 }
 0x185   :  { %1121 = vmatmul.mubr.bf16.gmra.mxu1 %v3512_v25  ;;  %v3562_v25 = vld [vmem:[#allocation5 + $0x150] ss:$12 sps:$4 sm:$0xff]  }
 0x186   :  { %1128 = vmatprep.mubr.bf16.mxu1 %v3513_v29  ;;  %v3567_v29 = vld [vmem:[#allocation5 + $0x168] ss:$12 sps:$4 sm:$0xff]  }
 0x187   :  { %3277 = vmatpush3.bf16.msra.mxu0 %v683_v27  ;;  %v3591_v27 = vld [vmem:[#allocation5 + $0x200] ss:$12 sps:$4 sm:$0xff]  }
 0x188   :  { %3278 = vmatprep.subr.bf16.mxu0 %v682_v35 }
 0x18b   :  { %3279 = vmatpush3.bf16.msra.mxu0 %v682_v35  ;;  %v3570_v35 = vld [vmem:[#allocation5 + $0x180] ss:$12 sps:$4 sm:$0xff]  }
 0x18c   :  { %3280 = vmatprep.subr.bf16.mxu0 %v681_v40 }
 0x18d   :  { %1129 = vmatmul.mubr.bf16.gmra.mxu1 %v3515_v37  ;;  %v3571_v37 = vld [vmem:[#allocation5 + $0x19c] ss:$12 sps:$4 sm:$0xff]  }
 0x18e   :  { %1136 = vmatprep.mubr.bf16.mxu1 %v3516_v43  ;;  %v3577_v43 = vld [vmem:[#allocation5 + $0x1cc] ss:$12 sps:$4 sm:$0xff]  }
 0x18f   :  { %3281 = vmatpush3.bf16.msra.mxu0 %v681_v40  ;;  %v3574_v40 = vld [vmem:[#allocation5 + $0x1b4] ss:$12 sps:$4 sm:$0xff]  }
 0x190   :  { %3282 = vmatprep.subr.bf16.mxu0 %v680_v34 }
 0x193   :  { %3283 = vmatpush3.bf16.msra.mxu0 %v680_v34  ;;  %v3579_v34 = vld [vmem:[#allocation5 + $0x1c8] ss:$12 sps:$4 sm:$0xff]  }
 0x194   :  { %3332 = vmatprep.subr.bf16.mxu0 %v3600_v61 }
 0x195   :  { %1137 = vmatmul.mubr.bf16.gmra.mxu1 %v3518_v39  ;;  %v3582_v39 = vld [vmem:[#allocation5 + $0x1e4] ss:$12 sps:$4 sm:$0xff]  }
 0x196   :  { %3285 = vmatmul.mubr.bf16.vlgmr.msra.gmra.mxu0 %v3520_v44  ;;  %1144 = vmatprep.mubr.bf16.mxu1 %v3521_v45  ;;  %v3584_v44 = vld [vmem:[#allocation5 + $0x1e0] ss:$12 sps:$4 sm:$0xff]   ;;  %v3587_v45 = vld [vmem:[#allocation5 + $0x1fc] ss:$12 sps:$4 sm:$0xff]  }
 0x197   :  { %3288 = vmatprep.mubr.bf16.mxu0 %v3524_v46  ;;  %3333 = vmatpush3.bf16.msra.mxu0 %v3600_v61  ;;  %v3589_v46 = vld [vmem:[#allocation5 + $0x1f8] ss:$12 sps:$4 sm:$0xff]  }
 0x198   :  { %3334 = vmatprep.subr.bf16.mxu0 %v3601_v56 }
 0x19b   :  { %3335 = vmatpush3.bf16.msra.mxu0 %v3601_v56 }
 0x19c   :  { %3336 = vmatprep.subr.bf16.mxu0 %v3602_v12 }
 0x19d   :  { %1145 = vmatmul.mubr.bf16.gmra.mxu1 %v3523_v36  ;;  %v3592_v36 = vld [vmem:[#allocation5 + $0x214] ss:$12 sps:$4 sm:$0xff]  }
 0x19e   :  { %3289 = vmatmul.mubr.bf16.gmra.mxu0 %v3525_v47  ;;  %1152 = vmatprep.mubr.bf16.mxu1 %v3526_v49  ;;  %v3594_v47 = vld [vmem:[#allocation5 + $0x210] ss:$12 sps:$4 sm:$0xff]   ;;  %v3597_v49 = vld [vmem:[#allocation5 + $0x22c] ss:$12 sps:$4 sm:$0xff]  }
 0x19f   :  { %3292 = vmatprep.mubr.bf16.mxu0 %v3529_v41  ;;  %3337 = vmatpush3.bf16.msra.mxu0 %v3602_v12  ;;  %v3599_v41 = vld [vmem:[#allocation5 + $0x228] ss:$12 sps:$4 sm:$0xff]  }
 0x1a0   :  { %3338 = vmatprep.subr.bf16.mxu0 %v3603_v58 }
 0x1a3   :  { %3339 = vmatpush3.bf16.msra.mxu0 %v3603_v58 }
 0x1a4   :  { %3340 = vmatprep.subr.bf16.mxu0 %v3604_v16 }
 0x1a5   :  { %1153 = vmatmul.mubr.bf16.gmra.mxu1 %v3528_v48 }
 0x1a6   :  { %3293 = vmatmul.mubr.bf16.gmra.mxu0 %v3530_v50  ;;  %1160 = vmatprep.mubr.bf16.mxu1 %v3531_v51 }
 0x1a7   :  { %3296 = vmatprep.mubr.bf16.mxu0 %v3534_v52  ;;  %3341 = vmatpush3.bf16.msra.mxu0 %v3604_v16 }
 0x1a8   :  { %3342 = vmatprep.subr.bf16.mxu0 %v3605_v18 }
 0x1ab   :  { %3343 = vmatpush3.bf16.msra.mxu0 %v3605_v18 }
 0x1ac   :  { %3344 = vmatprep.subr.bf16.mxu0 %v3606_v22 }
 0x1ad   :  { %1161 = vmatmul.mubr.bf16.gmra.mxu1 %v3533_v53 }
 0x1ae   :  { %3297 = vmatmul.mubr.bf16.gmra.mxu0 %v3535_v54  ;;  %1168 = vmatprep.mubr.bf16.mxu1 %v3536_v55 }
 0x1af   :  { %3300 = vmatprep.mubr.bf16.mxu0 %v3548_v57  ;;  %3345 = vmatpush3.bf16.msra.mxu0 %v3606_v22 }
 0x1b0   :  { %3346 = vmatprep.subr.bf16.mxu0 %v3607_v24 }
 0x1b3   :  { %3347 = vmatpush3.bf16.msra.mxu0 %v3607_v24 }
 0x1b5   :  { %1169 = vmatmul.mubr.bf16.gmra.mxu1 %v3538_v59 }
 0x1b6   :  { %1176 = vmatprep.mubr.bf16.mxu1 %v3539_v60  ;;  %3301 = vmatmul.mubr.bf16.gmra.mxu0 %v3549_v62 }
 0x1b7   :  { %3304 = vmatprep.mubr.bf16.mxu0 %v3553_v0 }
 0x1bd   :  { %1177 = vmatmul.mubr.bf16.gmra.mxu1 %v3541_v1 }
 0x1be   :  { %1184 = vmatprep.mubr.bf16.mxu1 %v3542_v2  ;;  %3305 = vmatmul.mubr.bf16.gmra.mxu0 %v3554_v3 }
 0x1bf   :  { %3308 = vmatprep.mubr.bf16.mxu0 %v3558_v4 }
 0x1c5   :  { %1185 = vmatmul.mubr.bf16.gmra.mxu1 %v3544_v5 }
 0x1c6   :  { %1192 = vmatprep.mubr.bf16.mxu1 %v3545_v6  ;;  %3309 = vmatmul.mubr.bf16.gmra.mxu0 %v3559_v7 }
 0x1c7   :  { %3312 = vmatprep.mubr.bf16.mxu0 %v3563_v8 }
 0x1cd   :  { %1193 = vmatmul.mubr.bf16.gmra.mxu1 %v3547_v9 }
 0x1ce   :  { %1200 = vmatprep.mubr.bf16.mxu1 %v3550_v10  ;;  %3313 = vmatmul.mubr.bf16.gmra.mxu0 %v3564_v11 }
 0x1cf   :  { %3316 = vmatprep.mubr.bf16.mxu0 %v3580_v63 }
 0x1d5   :  { %1201 = vmatmul.mubr.bf16.gmra.mxu1 %v3552_v13 }
 0x1d6   :  { %1208 = vmatprep.mubr.bf16.mxu1 %v3555_v14  ;;  %3317 = vmatmul.mubr.bf16.gmra.mxu0 %v3581_v15 }
 0x1d7   :  { %3320 = vmatprep.mubr.bf16.mxu0 %v3585_v17 }
 0x1dd   :  { %1209 = vmatmul.mubr.bf16.gmra.mxu1 %v3557_v19 }
 0x1de   :  { %1216 = vmatprep.mubr.bf16.mxu1 %v3560_v20  ;;  %3321 = vmatmul.mubr.bf16.gmra.mxu0 %v3586_v21 }
 0x1df   :  { %3324 = vmatprep.mubr.bf16.mxu0 %v3590_v23 }
 0x1e5   :  { %1217 = vmatmul.mubr.bf16.gmra.mxu1 %v3562_v25 }
 0x1e6   :  { %1224 = vmatprep.mubr.bf16.mxu1 %v3565_v26  ;;  %3325 = vmatmul.mubr.bf16.gmra.mxu0 %v3591_v27 }
 0x1e7   :  { %3328 = vmatprep.mubr.bf16.mxu0 %v3595_v28 }
 0x1ed   :  { %1225 = vmatmul.mubr.bf16.gmra.mxu1 %v3567_v29 }
 0x1ee   :  { %1232 = vmatprep.mubr.bf16.mxu1 %v3568_v30  ;;  %3329 = vmatmul.mubr.bf16.gmra.mxu0 %v3596_v31 }
 0x1f5   :  { %1233 = vmatmul.mubr.bf16.gmra.mxu1 %v3570_v35 }
 0x1f6   :  { %1240 = vmatprep.mubr.bf16.mxu1 %v3571_v37 }
 0x1fd   :  { %1241 = vmatmul.mubr.bf16.gmra.mxu1 %v3573_v38 }
 0x1fe   :  { %1248 = vmatprep.mubr.bf16.mxu1 %v3574_v40 }
 0x205   :  { %1249 = vmatmul.mubr.bf16.gmra.mxu1 %v3576_v42 }
 0x206   :  { %1256 = vmatprep.mubr.bf16.mxu1 %v3577_v43 }
 0x20d   :  { %1257 = vmatmul.mubr.bf16.gmra.mxu1 %v3579_v34 }
 0x20e   :  { %1264 = vmatprep.mubr.bf16.mxu1 %v3582_v39 }
 0x215   :  { %1265 = vmatmul.mubr.bf16.gmra.mxu1 %v3584_v44 }
 0x216   :  { %1272 = vmatprep.mubr.bf16.mxu1 %v3587_v45 }
 0x21d   :  { %1273 = vmatmul.mubr.bf16.gmra.mxu1 %v3589_v46 }
 0x21e   :  { %1280 = vmatprep.mubr.bf16.mxu1 %v3592_v36 }
 0x225   :  { %1281 = vmatmul.mubr.bf16.gmra.mxu1 %v3594_v47 }
 0x226   :  { %1288 = vmatprep.mubr.bf16.mxu1 %v3597_v49 }
 0x22d   :  { %1289 = vmatmul.mubr.bf16.gmra.mxu1 %v3599_v41 }
 0x22e   :  { %1946 = vmatprep.mubr.bf16.mxu1 %v4039_v33 }
 0x235   :  { %v1106_v48 = vpop.f32.mrf.mxu1 }
 0x237   :  { %v1108_v50 = vpop.f32.mrf.mxu1 }
 0x239   :  { %v1109_v51 = vpop.f32.mrf.mxu1 }
 0x23b   :  { %v1111_v52 = vpop.f32.mrf.mxu1 }
 0x23d   :  { %v1114_v53 = vpop.f32.mrf.mxu1 }
 0x23f   :  { %v1116_v54 = vpop.f32.mrf.mxu1 }
 0x241   :  { %v1117_v55 = vpop.f32.mrf.mxu1 }
 0x243   :  { %v1119_v57 = vpop.f32.mrf.mxu1 }
 0x245   :  { %v1122_v59 = vpop.f32.mrf.mxu1 }
 0x247   :  { %v1124_v60 = vpop.f32.mrf.mxu1 }
 0x249   :  { %v1125_v62 = vpop.f32.mrf.mxu1 }
 0x24b   :  { %v1127_v0 = vpop.f32.mrf.mxu1 }
 0x24d   :  { %v1130_v1 = vpop.f32.mrf.mxu1 }
 0x24f   :  { %v1132_v2 = vpop.f32.mrf.mxu1 }
 0x251   :  { %v1133_v3 = vpop.f32.mrf.mxu1 }
 0x253   :  { %v1135_v4 = vpop.f32.mrf.mxu1 }
 0x255   :  { %v1138_v5 = vpop.f32.mrf.mxu1 }
 0x256   :  { %v3286_v6 = vpop.f32.mrf.mxu0 }
 0x257   :  { %v1140_v7 = vpop.f32.mrf.mxu1  ;;  %v1340_v11 = vadd.f32 %v3286_v6, %v1114_v53 }
 0x258   :  { %v1331_v33 = vpop.f32.mrf.mxu0 }
 0x259   :  { %v1141_v61 = vpop.f32.mrf.mxu1  ;;  %v1332_v56 = vadd.f32 %v1331_v33, %v1106_v48  ;;  %v1524_v18 = vmax.f32 %v1340_v11, 0.0 }
 0x25a   :  { %v3287_v8 = vpop.f32.mrf.mxu0 }
 0x25b   :  { %v1343_v9 = vadd.f32 %v3287_v8, %v1117_v55  ;;  %v1143_v10 = vpop.f32.mrf.mxu1  ;;  %v1522_v15 = vmax.f32 %v1332_v56, 0.0 }
 0x25c   :  { %v1334_v12 = vpop.f32.mrf.mxu0 }
 0x25d   :  { %v1335_v63 = vadd.f32 %v1334_v12, %v1109_v51  ;;  %v1146_v58 = vpop.f32.mrf.mxu1  ;;  %v1525_v13 = vmax.f32 %v1343_v9, 0.0 }
 0x25e   :  { %v3290_v14 = vpop.f32.mrf.mxu0 }
 0x25f   :  { %v1523_v16 = vmax.f32 %v1335_v63, 0.0  ;;  %v1148_v17 = vpop.f32.mrf.mxu1  ;;  %v1571_v22 = vpack.c.bf16 %v1525_v13, %v1524_v18  ;;  %v1356_v27 = vadd.f32 %v3290_v14, %v1130_v1 }
 0x260   :  { %v1347_v19 = vpop.f32.mrf.mxu0 }
 0x261   :  { %v1149_v20 = vpop.f32.mrf.mxu1  ;;  %v1570_v21 = vpack.c.bf16 %v1523_v16, %v1522_v15  ;;  %v1348_v24 = vadd.f32 %v1347_v19, %v1122_v59  ;;  %v1528_v42 = vmax.f32 %v1356_v27, 0.0 }
 0x262   :  { %v3291_v23 = vpop.f32.mrf.mxu0 }
 0x263   :  { %v1359_v25 = vadd.f32 %v3291_v23, %v1133_v3  ;;  %v1151_v26 = vpop.f32.mrf.mxu1  ;;  %3348 = vmatprep.mubr.bf16.mxu0 %v1570_v21  ;;  %v1526_v37 = vmax.f32 %v1348_v24, 0.0 }
 0x264   :  { %v1350_v28 = vpop.f32.mrf.mxu0  ;;  %3349 = vmatmul.mubr.bf16.vlgmr.msra.gmra.mxu0 %v1571_v22 }
 0x265   :  { %v1351_v29 = vadd.f32 %v1350_v28, %v1125_v62  ;;  %v1154_v30 = vpop.f32.mrf.mxu1  ;;  %v1529_v31 = vmax.f32 %v1359_v25, 0.0 }
 0x266   :  { %v3294_v35 = vpop.f32.mrf.mxu0 }
 0x267   :  { %v1527_v38 = vmax.f32 %v1351_v29, 0.0  ;;  %v1156_v40 = vpop.f32.mrf.mxu1  ;;  %v1573_v44 = vpack.c.bf16 %v1529_v31, %v1528_v42  ;;  %v1372_v49 = vadd.f32 %v3294_v35, %v1146_v58 }
 0x268   :  { %v1363_v43 = vpop.f32.mrf.mxu0 }
 0x269   :  { %v1157_v34 = vpop.f32.mrf.mxu1  ;;  %v1572_v39 = vpack.c.bf16 %v1527_v38, %v1526_v37  ;;  %v1364_v46 = vadd.f32 %v1363_v43, %v1138_v5  ;;  %v1532_v57 = vmax.f32 %v1372_v49, 0.0 }
 0x26a   :  { %v3295_v45 = vpop.f32.mrf.mxu0 }
 0x26b   :  { %v1375_v36 = vadd.f32 %v3295_v45, %v1149_v20  ;;  %v1159_v47 = vpop.f32.mrf.mxu1  ;;  %3352 = vmatprep.mubr.bf16.mxu0 %v1572_v39  ;;  %v1530_v53 = vmax.f32 %v1364_v46, 0.0 }
 0x26c   :  { %v1366_v41 = vpop.f32.mrf.mxu0  ;;  %3353 = vmatmul.mubr.bf16.gmra.mxu0 %v1573_v44 }
 0x26d   :  { %v1367_v48 = vadd.f32 %v1366_v41, %v1141_v61  ;;  %v1162_v50 = vpop.f32.mrf.mxu1  ;;  %v1533_v51 = vmax.f32 %v1375_v36, 0.0 }
 0x26e   :  { %v3298_v52 = vpop.f32.mrf.mxu0 }
 0x26f   :  { %v1531_v54 = vmax.f32 %v1367_v48, 0.0  ;;  %v1164_v55 = vpop.f32.mrf.mxu1  ;;  %v1575_v0 = vpack.c.bf16 %v1533_v51, %v1532_v57  ;;  %v1388_v5 = vadd.f32 %v3298_v52, %v1162_v50 }
 0x270   :  { %v1379_v59 = vpop.f32.mrf.mxu0 }
 0x271   :  { %v1165_v60 = vpop.f32.mrf.mxu1  ;;  %v1574_v62 = vpack.c.bf16 %v1531_v54, %v1530_v53  ;;  %v1380_v2 = vadd.f32 %v1379_v59, %v1154_v30  ;;  %v1536_v11 = vmax.f32 %v1388_v5, 0.0 }
 0x272   :  { %v3299_v1 = vpop.f32.mrf.mxu0 }
 0x273   :  { %v1391_v3 = vadd.f32 %v3299_v1, %v1165_v60  ;;  %v1167_v4 = vpop.f32.mrf.mxu1  ;;  %3356 = vmatprep.mubr.bf16.mxu0 %v1574_v62  ;;  %v1534_v56 = vmax.f32 %v1380_v2, 0.0 }
 0x274   :  { %v1382_v6 = vpop.f32.mrf.mxu0  ;;  %3357 = vmatmul.mubr.bf16.gmra.mxu0 %v1575_v0 }
 0x275   :  { %v1383_v7 = vadd.f32 %v1382_v6, %v1157_v34  ;;  %v1170_v33 = vpop.f32.mrf.mxu1  ;;  %v1537_v61 = vmax.f32 %v1391_v3, 0.0 }
 0x276   :  { %v3302_v8 = vpop.f32.mrf.mxu0 }
 0x277   :  { %v1535_v9 = vmax.f32 %v1383_v7, 0.0  ;;  %v1172_v10 = vpop.f32.mrf.mxu1  ;;  %v1577_v13 = vpack.c.bf16 %v1537_v61, %v1536_v11 }
 0x278   :  { %v1395_v12 = vpop.f32.mrf.mxu0 }
 0x279   :  { %v1173_v63 = vpop.f32.mrf.mxu1  ;;  %v1576_v58 = vpack.c.bf16 %v1535_v9, %v1534_v56  ;;  %v1396_v16 = vadd.f32 %v1395_v12, %v1170_v33 }
 0x27a   :  { %v3303_v14 = vpop.f32.mrf.mxu0 }
 0x27b   :  { %v1175_v15 = vpop.f32.mrf.mxu1  ;;  %3360 = vmatprep.mubr.bf16.mxu0 %v1576_v58  ;;  %v1538_v22 = vmax.f32 %v1396_v16, 0.0 }
 0x27c   :  { %3361 = vmatmul.mubr.bf16.gmra.mxu0 %v1577_v13  ;;  %v1398_v17 = vpop.f32.mrf.mxu0 }
 0x27d   :  { %v1178_v18 = vpop.f32.mrf.mxu1  ;;  %v1399_v19 = vadd.f32 %v1398_v17, %v1173_v63 }
 0x27e   :  { %v3306_v20 = vpop.f32.mrf.mxu0  ;;  %v1404_v24 = vadd.f32 %v3302_v8, %v1178_v18 }
 0x27f   :  { %v1180_v21 = vpop.f32.mrf.mxu1  ;;  %v1539_v23 = vmax.f32 %v1399_v19, 0.0 }
 0x280   :  { %v1411_v25 = vpop.f32.mrf.mxu0  ;;  %v1540_v31 = vmax.f32 %v1404_v24, 0.0 }
 0x281   :  { %v1181_v26 = vpop.f32.mrf.mxu1  ;;  %v1578_v27 = vpack.c.bf16 %v1539_v23, %v1538_v22 }
 0x282   :  { %v1407_v28 = vadd.f32 %v3303_v14, %v1181_v26  ;;  %v3307_v30 = vpop.f32.mrf.mxu0 }
 0x283   :  { %v1183_v29 = vpop.f32.mrf.mxu1  ;;  %3364 = vmatprep.mubr.bf16.mxu0 %v1578_v27 }
 0x284   :  { %v1541_v35 = vmax.f32 %v1407_v28, 0.0  ;;  %v1414_v42 = vpop.f32.mrf.mxu0 }
 0x285   :  { %v1186_v37 = vpop.f32.mrf.mxu1 }
 0x286   :  { %v1579_v38 = vpack.c.bf16 %v1541_v35, %v1540_v31  ;;  %v1412_v43 = vadd.f32 %v1411_v25, %v1186_v37  ;;  %v3310_v45 = vpop.f32.mrf.mxu0 }
 0x287   :  { %v1188_v40 = vpop.f32.mrf.mxu1 }
 0x288   :  { %3365 = vmatmul.mubr.bf16.gmra.mxu0 %v1579_v38  ;;  %v1542_v46 = vmax.f32 %v1412_v43, 0.0  ;;  %v1427_v48 = vpop.f32.mrf.mxu0 }
 0x289   :  { %v1189_v34 = vpop.f32.mrf.mxu1 }
 0x28a   :  { %v1415_v39 = vadd.f32 %v1414_v42, %v1189_v34  ;;  %v3311_v54 = vpop.f32.mrf.mxu0 }
 0x28b   :  { %v1191_v44 = vpop.f32.mrf.mxu1 }
 0x28c   :  { %v1543_v36 = vmax.f32 %v1415_v39, 0.0  ;;  %v1430_v0 = vpop.f32.mrf.mxu0 }
 0x28d   :  { %v1194_v47 = vpop.f32.mrf.mxu1 }
 0x28e   :  { %v1580_v49 = vpack.c.bf16 %v1543_v36, %v1542_v46  ;;  %v1420_v50 = vadd.f32 %v3306_v20, %v1194_v47  ;;  %v3314_v5 = vpop.f32.mrf.mxu0 }
 0x28f   :  { %v1196_v41 = vpop.f32.mrf.mxu1 }
 0x290   :  { %3368 = vmatprep.mubr.bf16.mxu0 %v1580_v49  ;;  %v1544_v55 = vmax.f32 %v1420_v50, 0.0  ;;  %v1443_v56 = vpop.f32.mrf.mxu0 }
 0x291   :  { %v1197_v51 = vpop.f32.mrf.mxu1 }
 0x292   :  { %v1423_v52 = vadd.f32 %v3307_v30, %v1197_v51  ;;  %v3315_v63 = vpop.f32.mrf.mxu0 }
 0x293   :  { %v1199_v53 = vpop.f32.mrf.mxu1 }
 0x294   :  { %v1545_v57 = vmax.f32 %v1423_v52, 0.0  ;;  %v1446_v17 = vpop.f32.mrf.mxu0 }
 0x295   :  { %v1202_v59 = vpop.f32.mrf.mxu1 }
 0x296   :  { %v1581_v60 = vpack.c.bf16 %v1545_v57, %v1544_v55  ;;  %v1428_v1 = vadd.f32 %v1427_v48, %v1202_v59  ;;  %v3318_v22 = vpop.f32.mrf.mxu0 }
 0x297   :  { %v1204_v62 = vpop.f32.mrf.mxu1 }
 0x298   :  { %3369 = vmatmul.mubr.bf16.gmra.mxu0 %v1581_v60  ;;  %v1546_v6 = vmax.f32 %v1428_v1, 0.0  ;;  %v1459_v28 = vpop.f32.mrf.mxu0 }
 0x299   :  { %v1205_v2 = vpop.f32.mrf.mxu1 }
 0x29a   :  { %v1431_v3 = vadd.f32 %v1430_v0, %v1205_v2  ;;  %v3319_v37 = vpop.f32.mrf.mxu0 }
 0x29b   :  { %v1207_v4 = vpop.f32.mrf.mxu1 }
 0x29c   :  { %v1547_v7 = vmax.f32 %v1431_v3, 0.0  ;;  %v1462_v44 = vpop.f32.mrf.mxu0 }
 0x29d   :  { %v1210_v33 = vpop.f32.mrf.mxu1 }
 0x29e   :  { %v1582_v61 = vpack.c.bf16 %v1547_v7, %v1546_v6  ;;  %v1436_v9 = vadd.f32 %v3310_v45, %v1210_v33  ;;  %v3322_v49 = vpop.f32.mrf.mxu0 }
 0x29f   :  { %v1212_v8 = vpop.f32.mrf.mxu1 }
 0x2a0   :  { %3372 = vmatprep.mubr.bf16.mxu0 %v1582_v61  ;;  %v1548_v58 = vmax.f32 %v1436_v9, 0.0  ;;  %v1475_v53 = vpop.f32.mrf.mxu0 }
 0x2a1   :  { %v1213_v10 = vpop.f32.mrf.mxu1 }
 0x2a2   :  { %v1439_v11 = vadd.f32 %v3311_v54, %v1213_v10  ;;  %v3323_v60 = vpop.f32.mrf.mxu0 }
 0x2a3   :  { %v1215_v12 = vpop.f32.mrf.mxu1 }
 0x2a4   :  { %v1549_v13 = vmax.f32 %v1439_v11, 0.0  ;;  %v1478_v4 = vpop.f32.mrf.mxu0 }
 0x2a5   :  { %v1218_v14 = vpop.f32.mrf.mxu1 }
 0x2a6   :  { %v1583_v15 = vpack.c.bf16 %v1549_v13, %v1548_v58  ;;  %v1444_v18 = vadd.f32 %v1443_v56, %v1218_v14  ;;  %v3326_v61 = vpop.f32.mrf.mxu0 }
 0x2a7   :  { %v1220_v16 = vpop.f32.mrf.mxu1 }
 0x2a8   :  { %3373 = vmatmul.mubr.bf16.gmra.mxu0 %v1583_v15  ;;  %v1550_v23 = vmax.f32 %v1444_v18, 0.0  ;;  %v1491_v12 = vpop.f32.mrf.mxu0 }
 0x2a9   :  { %v1221_v19 = vpop.f32.mrf.mxu1 }
 0x2aa   :  { %v1447_v20 = vadd.f32 %v1446_v17, %v1221_v19  ;;  %v3327_v15 = vpop.f32.mrf.mxu0 }
 0x2ab   :  { %v1223_v21 = vpop.f32.mrf.mxu1 }
 0x2ac   :  { %v1551_v24 = vmax.f32 %v1447_v20, 0.0  ;;  %v1494_v21 = vpop.f32.mrf.mxu0 }
 0x2ad   :  { %v1226_v25 = vpop.f32.mrf.mxu1 }
 0x2ae   :  { %v1584_v26 = vpack.c.bf16 %v1551_v24, %v1550_v23  ;;  %v1452_v29 = vadd.f32 %v3314_v5, %v1226_v25 }
 0x2af   :  { %v1228_v27 = vpop.f32.mrf.mxu1 }
 0x2b0   :  { %3376 = vmatprep.mubr.bf16.mxu0 %v1584_v26  ;;  %v1552_v38 = vmax.f32 %v1452_v29, 0.0  ;;  %v3330_v26 = vpop.f32.mrf.mxu0 }
 0x2b1   :  { %v1229_v30 = vpop.f32.mrf.mxu1 }
 0x2b2   :  { %v1455_v31 = vadd.f32 %v3315_v63, %v1229_v30 }
 0x2b3   :  { %v1231_v35 = vpop.f32.mrf.mxu1 }
 0x2b4   :  { %v1553_v40 = vmax.f32 %v1455_v31, 0.0  ;;  %v1507_v35 = vpop.f32.mrf.mxu0 }
 0x2b5   :  { %v1234_v42 = vpop.f32.mrf.mxu1 }
 0x2b6   :  { %v1585_v43 = vpack.c.bf16 %v1553_v40, %v1552_v38  ;;  %v1460_v34 = vadd.f32 %v1459_v28, %v1234_v42 }
 0x2b7   :  { %v1236_v39 = vpop.f32.mrf.mxu1 }
 0x2b8   :  { %3377 = vmatmul.mubr.bf16.gmra.mxu0 %v1585_v43  ;;  %v1554_v46 = vmax.f32 %v1460_v34, 0.0  ;;  %v3331_v43 = vpop.f32.mrf.mxu0 }
 0x2b9   :  { %v1237_v45 = vpop.f32.mrf.mxu1 }
 0x2ba   :  { %v1463_v36 = vadd.f32 %v1462_v44, %v1237_v45 }
 0x2bb   :  { %v1239_v47 = vpop.f32.mrf.mxu1 }
 0x2bc   :  { %v1555_v41 = vmax.f32 %v1463_v36, 0.0  ;;  %v1510_v36 = vpop.f32.mrf.mxu0 }
 0x2bd   :  { %v1242_v48 = vpop.f32.mrf.mxu1 }
 0x2be   :  { %v1468_v50 = vadd.f32 %v3318_v22, %v1242_v48  ;;  %v1586_v51 = vpack.c.bf16 %v1555_v41, %v1554_v46 }
 0x2bf   :  { %v1244_v52 = vpop.f32.mrf.mxu1 }
 0x2c0   :  { %3380 = vmatprep.mubr.bf16.mxu0 %v1586_v51  ;;  %v1556_v55 = vmax.f32 %v1468_v50, 0.0 }
 0x2c1   :  { %v1245_v54 = vpop.f32.mrf.mxu1 }
 0x2c2   :  { %v1471_v57 = vadd.f32 %v3319_v37, %v1245_v54 }
 0x2c3   :  { %v1247_v59 = vpop.f32.mrf.mxu1 }
 0x2c4   :  { %v1557_v62 = vmax.f32 %v1471_v57, 0.0 }
 0x2c5   :  { %v1250_v0 = vpop.f32.mrf.mxu1 }
 0x2c6   :  { %v1587_v1 = vpack.c.bf16 %v1557_v62, %v1556_v55  ;;  %v1476_v2 = vadd.f32 %v1475_v53, %v1250_v0 }
 0x2c7   :  { %v1252_v3 = vpop.f32.mrf.mxu1 }
 0x2c8   :  { %3381 = vmatmul.mubr.bf16.gmra.mxu0 %v1587_v1  ;;  %v1558_v6 = vmax.f32 %v1476_v2, 0.0  ;;  %v3800_v1 = vld [vmem:[#allocation5 + $0x8] ss:$12 sps:$4 sm:$0xff]  }
 0x2c9   :  { %v1253_v5 = vpop.f32.mrf.mxu1 }
 0x2ca   :  { %v1479_v7 = vadd.f32 %v1478_v4, %v1253_v5 }
 0x2cb   :  { %v1255_v33 = vpop.f32.mrf.mxu1 }
 0x2cc   :  { %v1559_v8 = vmax.f32 %v1479_v7, 0.0 }
 0x2cd   :  { %v1258_v56 = vpop.f32.mrf.mxu1 }
 0x2ce   :  { %v1484_v9 = vadd.f32 %v3322_v49, %v1258_v56  ;;  %v1588_v10 = vpack.c.bf16 %v1559_v8, %v1558_v6 }
 0x2cf   :  { %v1260_v11 = vpop.f32.mrf.mxu1 }
 0x2d0   :  { %3384 = vmatprep.mubr.bf16.mxu0 %v1588_v10  ;;  %v1560_v58 = vmax.f32 %v1484_v9, 0.0 }
 0x2d1   :  { %v1261_v63 = vpop.f32.mrf.mxu1 }
 0x2d2   :  { %v1487_v13 = vadd.f32 %v3323_v60, %v1261_v63  ;;  %v4151_v63 = vld [vmem:[%s4758_s5] ss:$0 sm:$0xff]  ;;  %s3988_s5 = smov [#allocation10]  }
 0x2d3   :  { %v1263_v14 = vpop.f32.mrf.mxu1  ;;  %s2948_s20 = sshll.u32 %s3988_s5, 4  ;;  %s2949_s20 = int_to_ptr.vmem [resolvable:$true] %s2948_s20 }
 0x2d4   :  { %v1561_v16 = vmax.f32 %v1487_v13, 0.0  ;;  %s3951_s21 = scalar_lea.vmem %s2949_s20, 6144  ;;  %p3956_p7 = scmp.lt.s32.totalorder %s2949_s20, %s2949_s20 }
 0x2d5   :  { %v1266_v17 = vpop.f32.mrf.mxu1  ;;  %p3952_p6 = scmp.ne.s32.totalorder %s2949_s20, %s3951_s21  ;;  %p3957_p8 = scmp.lt.s32.totalorder %s3951_s21, %s3951_s21 }
 0x2d6   :  { %v1589_v18 = vpack.c.bf16 %v1561_v16, %v1560_v58  ;;  %v1492_v19 = vadd.f32 %v1491_v12, %v1266_v17 }
 0x2d7   :  { %v1268_v20 = vpop.f32.mrf.mxu1  ;;  %p3958_p9 = por %p3957_p8, %p3956_p7 }
 0x2d8   :  { %3385 = vmatmul.mubr.bf16.gmra.mxu0 %v1589_v18  ;;  %v1562_v23 = vmax.f32 %v1492_v19, 0.0 }
 0x2d9   :  { %v1269_v22 = vpop.f32.mrf.mxu1  ;;  %p3959_p10 = pnand %p3958_p9, %p3952_p6 }
 0x2da   :  { %v1495_v24 = vadd.f32 %v1494_v21, %v1269_v22 }
 0x2db   :  { %v1271_v25 = vpop.f32.mrf.mxu1 }
 0x2dc   :  { %v1563_v27 = vmax.f32 %v1495_v24, 0.0 }
 0x2dd   :  { %v1274_v28 = vpop.f32.mrf.mxu1 }
 0x2de   :  { %v1500_v29 = vadd.f32 %v3326_v61, %v1274_v28  ;;  %v1590_v30 = vpack.c.bf16 %v1563_v27, %v1562_v23 }
 0x2df   :  { %v1276_v31 = vpop.f32.mrf.mxu1 }
 0x2e0   :  { %3388 = vmatprep.mubr.bf16.mxu0 %v1590_v30  ;;  %v1564_v38 = vmax.f32 %v1500_v29, 0.0 }
 0x2e1   :  { %v1277_v37 = vpop.f32.mrf.mxu1 }
 0x2e2   :  { %v1503_v40 = vadd.f32 %v3327_v15, %v1277_v37 }
 0x2e3   :  { %v1279_v42 = vpop.f32.mrf.mxu1 }
 0x2e4   :  { %v1565_v34 = vmax.f32 %v1503_v40, 0.0 }
 0x2e5   :  { %v1282_v39 = vpop.f32.mrf.mxu1 }
 0x2e6   :  { %v1591_v44 = vpack.c.bf16 %v1565_v34, %v1564_v38  ;;  %v1508_v45 = vadd.f32 %v1507_v35, %v1282_v39 }
 0x2e7   :  { %v1284_v46 = vpop.f32.mrf.mxu1 }
 0x2e8   :  { %3389 = vmatmul.mubr.bf16.gmra.mxu0 %v1591_v44  ;;  %v1566_v49 = vmax.f32 %v1508_v45, 0.0 }
 0x2e9   :  { %v1285_v47 = vpop.f32.mrf.mxu1 }
 0x2ea   :  { %v1511_v41 = vadd.f32 %v1510_v36, %v1285_v47 }
 0x2eb   :  { %v1287_v48 = vpop.f32.mrf.mxu1 }
 0x2ec   :  { %v1567_v50 = vmax.f32 %v1511_v41, 0.0 }
 0x2ed   :  { %v1290_v51 = vpop.f32.mrf.mxu1 }
 0x2ee   :  { %v1516_v52 = vadd.f32 %v3330_v26, %v1290_v51  ;;  %v1592_v53 = vpack.c.bf16 %v1567_v50, %v1566_v49 }
 0x2ef   :  { %v1292_v54 = vpop.f32.mrf.mxu1 }
 0x2f0   :  { %3392 = vmatprep.mubr.bf16.mxu0 %v1592_v53  ;;  %v1568_v57 = vmax.f32 %v1516_v52, 0.0 }
 0x2f1   :  { %v1293_v55 = vpop.f32.mrf.mxu1 }
 0x2f2   :  { %v1519_v59 = vadd.f32 %v3331_v43, %v1293_v55 }
 0x2f3   :  { %v1295_v60 = vpop.f32.mrf.mxu1 }
 0x2f4   :  { %v1569_v62 = vmax.f32 %v1519_v59, 0.0 }
 0x2f6   :  { %v1593_v0 = vpack.c.bf16 %v1569_v62, %v1568_v57 }
 0x2f8   :  { %3393 = vmatmul.mubr.bf16.gmra.mxu0 %v1593_v0 }
 0x2f9   :  { %3412 = vmatprep.mubr.bf16.mxu0 %v3800_v1 }
 0x324   :  { %v3350_v2 = vpop.f32.mrf.mxu0 }
 0x325   :  { %v1708_v42 = vadd.f32 %v3350_v2, %v4151_v63 }
 0x326   :  { %v1699_v3 = vpop.f32.mrf.mxu0 }
 0x327   :  { %v1700_v45 = vadd.f32 %v4151_v63, %v1699_v3 }
 0x328   :  { %v3351_v4 = vpop.f32.mrf.mxu0 }
 0x329   :  { %v1711_v38 = vadd.f32 %v3351_v4, %v4151_v63 }
 0x32a   :  { %v1702_v5 = vpop.f32.mrf.mxu0 }
 0x32b   :  { %v1891_v34 = vpack.c.bf16 %v1711_v38, %v1708_v42  ;;  %v1703_v39 = vadd.f32 %v4151_v63, %v1702_v5  ;;  %v3807_v38 = vld [vmem:[#allocation5 + $0x48] ss:$12 sps:$4 sm:$0xff]  }
 0x32c   :  { %v3354_v6 = vpop.f32.mrf.mxu0 }
 0x32d   :  { %v1724_v28 = vadd.f32 %v3354_v6, %v4151_v63  ;;  %v1890_v46 = vpack.c.bf16 %v1703_v39, %v1700_v45 }
 0x32e   :  { %v1715_v7 = vpop.f32.mrf.mxu0 }
 0x32f   :  { %v1716_v35 = vadd.f32 %v4151_v63, %v1715_v7 }
 0x330   :  { %v3355_v33 = vpop.f32.mrf.mxu0 }
 0x331   :  { %v1727_v26 = vadd.f32 %v3355_v33, %v4151_v63 }
 0x332   :  { %v1718_v61 = vpop.f32.mrf.mxu0 }
 0x333   :  { %v1893_v30 = vpack.c.bf16 %v1727_v26, %v1724_v28  ;;  %v1719_v31 = vadd.f32 %v4151_v63, %v1718_v61  ;;  %v3803_v26 = vld [vmem:[#allocation5 + $0x18] ss:$12 sps:$4 sm:$0xff]   ;;  %v3804_v28 = vld [vmem:[#allocation5 + $0x34] ss:$12 sps:$4 sm:$0xff]  }
 0x334   :  { %v3358_v8 = vpop.f32.mrf.mxu0 }
 0x335   :  { %v1740_v21 = vadd.f32 %v3358_v8, %v4151_v63  ;;  %v1892_v40 = vpack.c.bf16 %v1719_v31, %v1716_v35  ;;  %v3805_v31 = vld [vmem:[#allocation5 + $0x30] ss:$12 sps:$4 sm:$0xff]   ;;  %v3806_v35 = vld [vmem:[#allocation5 + $0x4c] ss:$12 sps:$4 sm:$0xff]  }
 0x336   :  { %v1731_v56 = vpop.f32.mrf.mxu0 }
 0x337   :  { %v1732_v24 = vadd.f32 %v4151_v63, %v1731_v56 }
 0x338   :  { %v3359_v9 = vpop.f32.mrf.mxu0 }
 0x339   :  { %v1743_v19 = vadd.f32 %v3359_v9, %v4151_v63 }
 0x33a   :  { %v1734_v10 = vpop.f32.mrf.mxu0 }
 0x33b   :  { %v1895_v22 = vpack.c.bf16 %v1743_v19, %v1740_v21  ;;  %v1735_v23 = vadd.f32 %v4151_v63, %v1734_v10 }
 0x33c   :  { %v3362_v11 = vpop.f32.mrf.mxu0 }
 0x33d   :  { %v1756_v13 = vadd.f32 %v3362_v11, %v4151_v63  ;;  %v1894_v27 = vpack.c.bf16 %v1735_v23, %v1732_v24  ;;  %v3802_v24 = vld [vmem:[#allocation5 + $0x1c] ss:$12 sps:$4 sm:$0xff]  }
 0x33e   :  { %v1747_v12 = vpop.f32.mrf.mxu0 }
 0x33f   :  { %v1748_v18 = vadd.f32 %v4151_v63, %v1747_v12 }
 0x340   :  { %v3363_v58 = vpop.f32.mrf.mxu0 }
 0x341   :  { %v1759_v14 = vadd.f32 %v3363_v58, %v4151_v63 }
 0x342   :  { %v1750_v15 = vpop.f32.mrf.mxu0 }
 0x343   :  { %v1897_v16 = vpack.c.bf16 %v1759_v14, %v1756_v13  ;;  %v1751_v17 = vadd.f32 %v4151_v63, %v1750_v15 }
 0x345   :  { %1915 = vmatpush1.bf16.msra.mxu1 %v1897_v16  ;;  %v1896_v20 = vpack.c.bf16 %v1751_v17, %v1748_v18 }
 0x346   :  { %1916 = vmatprep.subr.bf16.mxu1 %v3987_v32 }
 0x348   :  { %v4164_v25 = vpop.f32.mrf.mxu0 }
 0x349   :  { %1917 = vmatpush1.bf16.msra.mxu1 %v1896_v20  ;;  %v1772_v14 = vadd.f32 %v4164_v25, %v4151_v63 }
 0x34a   :  { %1918 = vmatprep.subr.bf16.mxu1 %v3987_v32  ;;  %v4169_v29 = vpop.f32.mrf.mxu0 }
 0x34b   :  { %v1764_v19 = vadd.f32 %v4151_v63, %v4169_v29 }
 0x34c   :  { %v3367_v37 = vpop.f32.mrf.mxu0 }
 0x34d   :  { %1919 = vmatpush1.bf16.msra.mxu1 %v1895_v22  ;;  %v1775_v58 = vadd.f32 %v3367_v37, %v4151_v63  ;;  %v3801_v22 = vld [vmem:[#allocation5] ss:$12 sps:$4 sm:$0xff]  }
 0x34e   :  { %1920 = vmatprep.subr.bf16.mxu1 %v3987_v32  ;;  %v1766_v43 = vpop.f32.mrf.mxu0 }
 0x34f   :  { %v1899_v16 = vpack.c.bf16 %v1775_v58, %v1772_v14  ;;  %v1767_v17 = vadd.f32 %v4151_v63, %v1766_v43  ;;  %v3819_v58 = vld [vmem:[#allocation5 + $0xdc] ss:$12 sps:$4 sm:$0xff]   ;;  %v3823_v14 = vld [vmem:[#allocation5 + $0xf4] ss:$12 sps:$4 sm:$0xff]  }
 0x351   :  { %1921 = vmatpush1.bf16.msra.mxu1 %v1894_v27  ;;  %v1898_v20 = vpack.c.bf16 %v1767_v17, %v1764_v19  ;;  %v3826_v17 = vld [vmem:[#allocation5 + $0x80] ss:$12 sps:$4 sm:$0xff]   ;;  %v3828_v19 = vld [vmem:[#allocation5 + $0x98] ss:$12 sps:$4 sm:$0xff]  }
 0x352   :  { %1922 = vmatprep.subr.bf16.mxu1 %v3987_v32 }
 0x355   :  { %1923 = vmatpush1.bf16.msra.mxu1 %v1893_v30 }
 0x356   :  { %1924 = vmatprep.subr.bf16.mxu1 %v3987_v32 }
 0x358   :  { %v3370_v44 = vpop.f32.mrf.mxu0 }
 0x359   :  { %1925 = vmatpush1.bf16.msra.mxu1 %v1892_v40  ;;  %v1788_v8 = vadd.f32 %v3370_v44, %v4151_v63  ;;  %v3808_v40 = vld [vmem:[#allocation5 + $0x64] ss:$12 sps:$4 sm:$0xff]  }
 0x35a   :  { %1926 = vmatprep.subr.bf16.mxu1 %v3987_v32  ;;  %v1779_v36 = vpop.f32.mrf.mxu0 }
 0x35b   :  { %v1780_v11 = vadd.f32 %v4151_v63, %v1779_v36 }
 0x35c   :  { %v3371_v47 = vpop.f32.mrf.mxu0 }
 0x35d   :  { %1927 = vmatpush1.bf16.msra.mxu1 %v1891_v34  ;;  %v1791_v33 = vadd.f32 %v3371_v47, %v4151_v63  ;;  %v3809_v47 = vld [vmem:[#allocation5 + $0x60] ss:$12 sps:$4 sm:$0xff]  }
 0x35e   :  { %1928 = vmatprep.subr.bf16.mxu1 %v3987_v32  ;;  %v1782_v49 = vpop.f32.mrf.mxu0 }
 0x35f   :  { %v1901_v9 = vpack.c.bf16 %v1791_v33, %v1788_v8  ;;  %v1783_v10 = vadd.f32 %v4151_v63, %v1782_v49 }
 0x361   :  { %1929 = vmatpush1.bf16.msra.mxu1 %v1890_v46  ;;  %v1900_v13 = vpack.c.bf16 %v1783_v10, %v1780_v11  ;;  %v3816_v10 = vld [vmem:[#allocation5 + $0xc4] ss:$12 sps:$4 sm:$0xff]   ;;  %v3817_v11 = vld [vmem:[#allocation5 + $0xc0] ss:$12 sps:$4 sm:$0xff]  }
 0x362   :  { %1930 = vmatprep.subr.bf16.mxu1 %v3987_v32 }
 0x368   :  { %v3374_v41 = vpop.f32.mrf.mxu0 }
 0x369   :  { %v1804_v3 = vadd.f32 %v3374_v41, %v4151_v63 }
 0x36a   :  { %v1795_v48 = vpop.f32.mrf.mxu0 }
 0x36b   :  { %v1796_v6 = vadd.f32 %v4151_v63, %v1795_v48 }
 0x36c   :  { %v3375_v50 = vpop.f32.mrf.mxu0 }
 0x36d   :  { %v1807_v1 = vadd.f32 %v3375_v50, %v4151_v63  ;;  %v3810_v50 = vld [vmem:[#allocation5 + $0x7c] ss:$12 sps:$4 sm:$0xff]  }
 0x36e   :  { %v1798_v51 = vpop.f32.mrf.mxu0 }
 0x36f   :  { %v1903_v4 = vpack.c.bf16 %v1807_v1, %v1804_v3  ;;  %v1799_v5 = vadd.f32 %v4151_v63, %v1798_v51 }
 0x371   :  { %v1902_v61 = vpack.c.bf16 %v1799_v5, %v1796_v6  ;;  %v3814_v6 = vld [vmem:[#allocation5 + $0xac] ss:$12 sps:$4 sm:$0xff]  }
 0x378   :  { %v3378_v52 = vpop.f32.mrf.mxu0 }
 0x379   :  { %v1820_v55 = vadd.f32 %v3378_v52, %v4151_v63 }
 0x37a   :  { %v1811_v53 = vpop.f32.mrf.mxu0 }
 0x37b   :  { %v1812_v0 = vadd.f32 %v4151_v63, %v1811_v53 }
 0x37c   :  { %v3379_v54 = vpop.f32.mrf.mxu0 }
 0x37d   :  { %v1823_v57 = vadd.f32 %v3379_v54, %v4151_v63  ;;  %v3811_v54 = vld [vmem:[#allocation5 + $0x78] ss:$12 sps:$4 sm:$0xff]  }
 0x37e   :  { %v1814_v59 = vpop.f32.mrf.mxu0 }
 0x37f   :  { %v1905_v60 = vpack.c.bf16 %v1823_v57, %v1820_v55  ;;  %v1815_v62 = vadd.f32 %v4151_v63, %v1814_v59 }
 0x381   :  { %1931 = vmatpush2.bf16.msra.mxu1 %v1905_v60  ;;  %v1904_v2 = vpack.c.bf16 %v1815_v62, %v1812_v0  ;;  %v3812_v60 = vld [vmem:[#allocation5 + $0x94] ss:$12 sps:$4 sm:$0xff]  }
 0x382   :  { %1932 = vmatprep.subr.bf16.mxu1 %v3987_v32 }
 0x385   :  { %1933 = vmatpush2.bf16.msra.mxu1 %v1904_v2  ;;  %v3813_v2 = vld [vmem:[#allocation5 + $0x90] ss:$12 sps:$4 sm:$0xff]  }
 0x386   :  { %1934 = vmatprep.subr.bf16.mxu1 %v3987_v32 }
 0x388   :  { %v4192_v7 = vpop.f32.mrf.mxu0 }
 0x389   :  { %1935 = vmatpush2.bf16.msra.mxu1 %v1903_v4  ;;  %v1836_v3 = vadd.f32 %v4192_v7, %v4151_v63 }
 0x38a   :  { %1936 = vmatprep.subr.bf16.mxu1 %v3987_v32  ;;  %v4197_v56 = vpop.f32.mrf.mxu0 }
 0x38b   :  { %v1828_v33 = vadd.f32 %v4151_v63, %v4197_v56  ;;  %v3820_v56 = vld [vmem:[#allocation5 + $0x38] ss:$12 sps:$4 sm:$0xff]  }
 0x38c   :  { %v4202_v12 = vpop.f32.mrf.mxu0 }
 0x38d   :  { %1937 = vmatpush2.bf16.msra.mxu1 %v1902_v61  ;;  %v1839_v4 = vadd.f32 %v4202_v12, %v4151_v63  ;;  %v3818_v12 = vld [vmem:[#allocation5 + $0x20] ss:$12 sps:$4 sm:$0xff]  }
 0x38e   :  { %1938 = vmatprep.subr.bf16.mxu1 %v3987_v32  ;;  %v4208_v15 = vpop.f32.mrf.mxu0 }
 0x38f   :  { %v1907_v61 = vpack.c.bf16 %v1839_v4, %v1836_v3  ;;  %v1831_v8 = vadd.f32 %v4151_v63, %v4208_v15  ;;  %v3824_v15 = vld [vmem:[#allocation5 + $0x68] ss:$12 sps:$4 sm:$0xff]  }
 0x391   :  { %1939 = vmatpush2.bf16.msra.mxu1 %v1901_v9  ;;  %v3815_v9 = vld [vmem:[#allocation5 + $0xa8] ss:$12 sps:$4 sm:$0xff]   ;;  %v1906_v7 = vpack.c.bf16 %v1831_v8, %v1828_v33 }
 0x392   :  { %1940 = vmatprep.subr.bf16.mxu1 %v3987_v32 }
 0x395   :  { %1941 = vmatpush2.bf16.msra.mxu1 %v1900_v13  ;;  %v3821_v13 = vld [vmem:[#allocation5 + $0xd8] ss:$12 sps:$4 sm:$0xff]  }
 0x396   :  { %1942 = vmatprep.subr.bf16.mxu1 %v3987_v32 }
 0x398   :  { %v3386_v18 = vpop.f32.mrf.mxu0 }
 0x399   :  { %1943 = vmatpush2.bf16.msra.mxu1 %v1899_v16  ;;  %v1852_v55 = vadd.f32 %v3386_v18, %v4151_v63  ;;  %v3825_v16 = vld [vmem:[#allocation5 + $0xf0] ss:$12 sps:$4 sm:$0xff]   ;;  %v3827_v18 = vld [vmem:[#allocation5 + $0x10c] ss:$12 sps:$4 sm:$0xff]  }
 0x39a   :  { %1944 = vmatprep.subr.bf16.mxu1 %v3987_v32  ;;  %v1843_v21 = vpop.f32.mrf.mxu0 }
 0x39b   :  { %v1844_v62 = vadd.f32 %v4151_v63, %v1843_v21  ;;  %v3830_v21 = vld [vmem:[#allocation5 + $0xb0] ss:$12 sps:$4 sm:$0xff]  }
 0x39c   :  { %v3387_v23 = vpop.f32.mrf.mxu0 }
 0x39d   :  { %1945 = vmatpush2.bf16.msra.mxu1 %v1898_v20  ;;  %v1855_v57 = vadd.f32 %v3387_v23, %v4151_v63  ;;  %v3829_v20 = vld [vmem:[#allocation5 + $0x108] ss:$12 sps:$4 sm:$0xff]  }
 0x39e   :  { %v1846_v25 = vpop.f32.mrf.mxu0  ;;  %v3832_v23 = vld [vmem:[#allocation5 + $0xc8] ss:$12 sps:$4 sm:$0xff]  }
 0x39f   :  { %v1909_v0 = vpack.c.bf16 %v1855_v57, %v1852_v55  ;;  %v1847_v1 = vadd.f32 %v4151_v63, %v1846_v25  ;;  %v3834_v25 = vld [vmem:[#allocation5 + $0xe0] ss:$12 sps:$4 sm:$0xff]   ;;  %v3863_v55 = vld [vmem:[#allocation5 + $0x230] ss:$12 sps:$4 sm:$0xff]  }
 0x3a0   :  { %1947 = vmatmul.mubr.bf16.vlgmr.msra.gmra.mxu1 %v3801_v22  ;;  %v3831_v22 = vld [vmem:[#allocation5 + $0x124] ss:$12 sps:$4 sm:$0xff]   ;;  %v3864_v57 = vld [vmem:[#allocation5 + $0x1e0] ss:$12 sps:$4 sm:$0xff]  }
 0x3a1   :  { %1954 = vmatprep.mubr.bf16.mxu1 %v3802_v24  ;;  %v1908_v5 = vpack.c.bf16 %v1847_v1, %v1844_v62  ;;  %v3833_v24 = vld [vmem:[#allocation5 + $0x120] ss:$12 sps:$4 sm:$0xff]  }
 0x3a2   :  { %v3867_v62 = vld [vmem:[#allocation5 + $0x214] ss:$12 sps:$4 sm:$0xff]   ;;  %v3869_v1 = vld [vmem:[#allocation5 + $0x22c] ss:$12 sps:$4 sm:$0xff]  }
 0x3a8   :  { %1955 = vmatmul.mubr.bf16.gmra.mxu1 %v3803_v26  ;;  %v3390_v27 = vpop.f32.mrf.mxu0  ;;  %v3835_v26 = vld [vmem:[#allocation5 + $0x13c] ss:$12 sps:$4 sm:$0xff]  }
 0x3a9   :  { %1962 = vmatprep.mubr.bf16.mxu1 %v3804_v28  ;;  %v1868_v49 = vadd.f32 %v3390_v27, %v4151_v63  ;;  %v3836_v27 = vld [vmem:[#allocation5 + $0xf8] ss:$12 sps:$4 sm:$0xff]  }
 0x3aa   :  { %v1859_v30 = vpop.f32.mrf.mxu0  ;;  %v3837_v28 = vld [vmem:[#allocation5 + $0x138] ss:$12 sps:$4 sm:$0xff]  }
 0x3ab   :  { %v1860_v51 = vadd.f32 %v4151_v63, %v1859_v30  ;;  %v3838_v30 = vld [vmem:[#allocation5 + $0x110] ss:$12 sps:$4 sm:$0xff]  }
 0x3ac   :  { %v3391_v29 = vpop.f32.mrf.mxu0 }
 0x3ad   :  { %v1871_v41 = vadd.f32 %v3391_v29, %v4151_v63  ;;  %v3840_v29 = vld [vmem:[#allocation5 + $0x128] ss:$12 sps:$4 sm:$0xff]  }
 0x3ae   :  { %v1862_v32 = vpop.f32.mrf.mxu0 }
 0x3af   :  { %v1911_v52 = vpack.c.bf16 %v1871_v41, %v1868_v49  ;;  %v1863_v53 = vadd.f32 %v4151_v63, %v1862_v32  ;;  %v3842_v32 = vld [vmem:[#allocation5 + $0x140] ss:$12 sps:$4 sm:$0xff]   ;;  %v3856_v41 = vld [vmem:[#allocation5 + $0x1e8] ss:$12 sps:$4 sm:$0xff]  }
 0x3b0   :  { %1963 = vmatmul.mubr.bf16.gmra.mxu1 %v3805_v31  ;;  %v3839_v31 = vld [vmem:[#allocation5 + $0x154] ss:$12 sps:$4 sm:$0xff]  }
 0x3b1   :  { %1970 = vmatprep.mubr.bf16.mxu1 %v3806_v35  ;;  %v1910_v59 = vpack.c.bf16 %v1863_v53, %v1860_v51  ;;  %v3841_v35 = vld [vmem:[#allocation5 + $0x150] ss:$12 sps:$4 sm:$0xff]   ;;  %v3855_v49 = vld [vmem:[#allocation5 + $0x1b4] ss:$12 sps:$4 sm:$0xff]  }
 0x3b2   :  { %v3859_v51 = vld [vmem:[#allocation5 + $0x200] ss:$12 sps:$4 sm:$0xff]   ;;  %v3861_v53 = vld [vmem:[#allocation5 + $0x1c8] ss:$12 sps:$4 sm:$0xff]  }
 0x3b8   :  { %v3394_v37 = vpop.f32.mrf.mxu0  ;;  %1971 = vmatmul.mubr.bf16.gmra.mxu1 %v3807_v38  ;;  %v3844_v38 = vld [vmem:[#allocation5 + $0x158] ss:$12 sps:$4 sm:$0xff]  }
 0x3b9   :  { %1978 = vmatprep.mubr.bf16.mxu1 %v3808_v40  ;;  %v1884_v43 = vadd.f32 %v3394_v37, %v4151_v63  ;;  %v3843_v37 = vld [vmem:[#allocation5 + $0x16c] ss:$12 sps:$4 sm:$0xff]   ;;  %v3845_v40 = vld [vmem:[#allocation5 + $0x168] ss:$12 sps:$4 sm:$0xff]  }
 0x3ba   :  { %v1875_v42 = vpop.f32.mrf.mxu0 }
 0x3bb   :  { %v1876_v39 = vadd.f32 %v4151_v63, %v1875_v42  ;;  %v3846_v42 = vld [vmem:[#allocation5 + $0x170] ss:$12 sps:$4 sm:$0xff]  }
 0x3bc   :  { %v3395_v34 = vpop.f32.mrf.mxu0 }
 0x3bd   :  { %v1887_v44 = vadd.f32 %v3395_v34, %v4151_v63  ;;  %v3848_v34 = vld [vmem:[#allocation5 + $0x188] ss:$12 sps:$4 sm:$0xff]  }
 0x3be   :  { %v1878_v45 = vpop.f32.mrf.mxu0 }
 0x3bf   :  { %v1913_v46 = vpack.c.bf16 %v1887_v44, %v1884_v43  ;;  %v1879_v36 = vadd.f32 %v4151_v63, %v1878_v45  ;;  %v3822_v63 = vld [vmem:[#allocation5 + $0x50] ss:$12 sps:$4 sm:$0xff]   ;;  %v3850_v44 = vld [vmem:[#allocation5 + $0x1a0] ss:$12 sps:$4 sm:$0xff]  }
 0x3c0   :  { %1979 = vmatmul.mubr.bf16.gmra.mxu1 %v3809_v47  ;;  %v3847_v43 = vld [vmem:[#allocation5 + $0x184] ss:$12 sps:$4 sm:$0xff]   ;;  %v3851_v45 = vld [vmem:[#allocation5 + $0x19c] ss:$12 sps:$4 sm:$0xff]  }
 0x3c1   :  { %v1912_v48 = vpack.c.bf16 %v1879_v36, %v1876_v39  ;;  %3396 = vmatprep.subr.bf16.mxu0 %v1913_v46  ;;  %1986 = vmatprep.mubr.bf16.mxu1 %v3810_v50  ;;  %v3849_v39 = vld [vmem:[#allocation5 + $0x180] ss:$12 sps:$4 sm:$0xff]   ;;  %v3853_v36 = vld [vmem:[#allocation5 + $0x198] ss:$12 sps:$4 sm:$0xff]   ;;  %v3854_v47 = vld [vmem:[#allocation5 + $0x1d0] ss:$12 sps:$4 sm:$0xff]  }
 0x3c2   :  { %3397 = vmatpush3.bf16.msra.mxu0 %v1913_v46  ;;  %v3852_v46 = vld [vmem:[#allocation5 + $0x1b8] ss:$12 sps:$4 sm:$0xff]  }
 0x3c3   :  { %3398 = vmatprep.subr.bf16.mxu0 %v1912_v48  ;;  %v3858_v50 = vld [vmem:[#allocation5 + $0x1cc] ss:$12 sps:$4 sm:$0xff]  }
 0x3c6   :  { %3399 = vmatpush3.bf16.msra.mxu0 %v1912_v48  ;;  %v3857_v48 = vld [vmem:[#allocation5 + $0x1b0] ss:$12 sps:$4 sm:$0xff]  }
 0x3c7   :  { %3400 = vmatprep.subr.bf16.mxu0 %v1911_v52 }
 0x3c8   :  { %1987 = vmatmul.mubr.bf16.gmra.mxu1 %v3811_v54  ;;  %v3862_v54 = vld [vmem:[#allocation5 + $0x1e4] ss:$12 sps:$4 sm:$0xff]  }
 0x3c9   :  { %1994 = vmatprep.mubr.bf16.mxu1 %v3812_v60  ;;  %v3866_v60 = vld [vmem:[#allocation5 + $0x1f8] ss:$12 sps:$4 sm:$0xff]  }
 0x3ca   :  { %3401 = vmatpush3.bf16.msra.mxu0 %v1911_v52  ;;  %v3860_v52 = vld [vmem:[#allocation5 + $0x218] ss:$12 sps:$4 sm:$0xff]  }
 0x3cb   :  { %3402 = vmatprep.subr.bf16.mxu0 %v1910_v59 }
 0x3ce   :  { %3403 = vmatpush3.bf16.msra.mxu0 %v1910_v59  ;;  %v3865_v59 = vld [vmem:[#allocation5 + $0x1fc] ss:$12 sps:$4 sm:$0xff]  }
 0x3cf   :  { %3404 = vmatprep.subr.bf16.mxu0 %v1909_v0 }
 0x3d0   :  { %1995 = vmatmul.mubr.bf16.gmra.mxu1 %v3813_v2  ;;  %v3870_v2 = vld [vmem:[#allocation5 + $0x228] ss:$12 sps:$4 sm:$0xff]  }
 0x3d1   :  { %2002 = vmatprep.mubr.bf16.mxu1 %v3814_v6 }
 0x3d2   :  { %3405 = vmatpush3.bf16.msra.mxu0 %v1909_v0  ;;  %v3868_v0 = vld [vmem:[#allocation5 + $0x210] ss:$12 sps:$4 sm:$0xff]  }
 0x3d3   :  { %3406 = vmatprep.subr.bf16.mxu0 %v1908_v5 }
 0x3d6   :  { %3407 = vmatpush3.bf16.msra.mxu0 %v1908_v5 }
 0x3d7   :  { %3408 = vmatprep.subr.bf16.mxu0 %v1907_v61 }
 0x3d8   :  { %2003 = vmatmul.mubr.bf16.gmra.mxu1 %v3815_v9 }
 0x3d9   :  { %2010 = vmatprep.mubr.bf16.mxu1 %v3816_v10 }
 0x3da   :  { %3409 = vmatpush3.bf16.msra.mxu0 %v1907_v61 }
 0x3db   :  { %3410 = vmatprep.subr.bf16.mxu0 %v1906_v7 }
 0x3de   :  { %3411 = vmatpush3.bf16.msra.mxu0 %v1906_v7 }
 0x3e0   :  { %2011 = vmatmul.mubr.bf16.gmra.mxu1 %v3817_v11 }
 0x3e1   :  { %3413 = vmatmul.mubr.bf16.vlgmr.msra.gmra.mxu0 %v3818_v12  ;;  %2018 = vmatprep.mubr.bf16.mxu1 %v3819_v58 }
 0x3e2   :  { %3416 = vmatprep.mubr.bf16.mxu0 %v3820_v56 }
 0x3e8   :  { %2019 = vmatmul.mubr.bf16.gmra.mxu1 %v3821_v13 }
 0x3e9   :  { %3417 = vmatmul.mubr.bf16.gmra.mxu0 %v3822_v63  ;;  %2026 = vmatprep.mubr.bf16.mxu1 %v3823_v14 }
 0x3ea   :  { %3420 = vmatprep.mubr.bf16.mxu0 %v3824_v15 }
 0x3f0   :  { %2027 = vmatmul.mubr.bf16.gmra.mxu1 %v3825_v16 }
 0x3f1   :  { %3421 = vmatmul.mubr.bf16.gmra.mxu0 %v3826_v17  ;;  %2034 = vmatprep.mubr.bf16.mxu1 %v3827_v18 }
 0x3f2   :  { %3424 = vmatprep.mubr.bf16.mxu0 %v3828_v19 }
 0x3f8   :  { %2035 = vmatmul.mubr.bf16.gmra.mxu1 %v3829_v20 }
 0x3f9   :  { %3425 = vmatmul.mubr.bf16.gmra.mxu0 %v3830_v21  ;;  %2042 = vmatprep.mubr.bf16.mxu1 %v3831_v22 }
 0x3fa   :  { %3428 = vmatprep.mubr.bf16.mxu0 %v3832_v23 }
 0x400   :  { %2043 = vmatmul.mubr.bf16.gmra.mxu1 %v3833_v24 }
 0x401   :  { %3429 = vmatmul.mubr.bf16.gmra.mxu0 %v3834_v25  ;;  %2050 = vmatprep.mubr.bf16.mxu1 %v3835_v26 }
 0x402   :  { %3432 = vmatprep.mubr.bf16.mxu0 %v3836_v27  ;;  %v2364_v27 = vlaneseq }
 0x408   :  { %2051 = vmatmul.mubr.bf16.gmra.mxu1 %v3837_v28 }
 0x409   :  { %3433 = vmatmul.mubr.bf16.gmra.mxu0 %v3838_v30  ;;  %2058 = vmatprep.mubr.bf16.mxu1 %v3839_v31  ;;  %v4246_v31 = vand.u32 127, %v2364_v27 }
 0x40a   :  { %3436 = vmatprep.mubr.bf16.mxu0 %v3840_v29 }
 0x40b   :  { %vm2366_vm0 = vcmp.lt.s32.totalorder %v4246_v31, 10 }
 0x410   :  { %2059 = vmatmul.mubr.bf16.gmra.mxu1 %v3841_v35 }
 0x411   :  { %3437 = vmatmul.mubr.bf16.gmra.mxu0 %v3842_v32  ;;  %2066 = vmatprep.mubr.bf16.mxu1 %v3843_v37 }
 0x412   :  { %3440 = vmatprep.mubr.bf16.mxu0 %v3844_v38 }
 0x418   :  { %2067 = vmatmul.mubr.bf16.gmra.mxu1 %v3845_v40 }
 0x419   :  { %3441 = vmatmul.mubr.bf16.gmra.mxu0 %v3846_v42  ;;  %2074 = vmatprep.mubr.bf16.mxu1 %v3847_v43 }
 0x41a   :  { %3444 = vmatprep.mubr.bf16.mxu0 %v3848_v34 }
 0x420   :  { %2075 = vmatmul.mubr.bf16.gmra.mxu1 %v3849_v39 }
 0x421   :  { %3445 = vmatmul.mubr.bf16.gmra.mxu0 %v3850_v44  ;;  %2082 = vmatprep.mubr.bf16.mxu1 %v3851_v45 }
 0x422   :  { %3448 = vmatprep.mubr.bf16.mxu0 %v3852_v46 }
 0x428   :  { %2083 = vmatmul.mubr.bf16.gmra.mxu1 %v3853_v36 }
 0x429   :  { %3449 = vmatmul.mubr.bf16.gmra.mxu0 %v3854_v47  ;;  %2090 = vmatprep.mubr.bf16.mxu1 %v3855_v49 }
 0x42a   :  { %3452 = vmatprep.mubr.bf16.mxu0 %v3856_v41 }
 0x430   :  { %2091 = vmatmul.mubr.bf16.gmra.mxu1 %v3857_v48 }
 0x431   :  { %2098 = vmatprep.mubr.bf16.mxu1 %v3858_v50  ;;  %3453 = vmatmul.mubr.bf16.gmra.mxu0 %v3859_v51 }
 0x432   :  { %3456 = vmatprep.mubr.bf16.mxu0 %v3860_v52 }
 0x438   :  { %2099 = vmatmul.mubr.bf16.gmra.mxu1 %v3861_v53 }
 0x439   :  { %2106 = vmatprep.mubr.bf16.mxu1 %v3862_v54  ;;  %3457 = vmatmul.mubr.bf16.gmra.mxu0 %v3863_v55 }
 0x440   :  { %2107 = vmatmul.mubr.bf16.gmra.mxu1 %v3864_v57 }
 0x441   :  { %2114 = vmatprep.mubr.bf16.mxu1 %v3865_v59 }
 0x448   :  { %2115 = vmatmul.mubr.bf16.gmra.mxu1 %v3866_v60 }
 0x449   :  { %2122 = vmatprep.mubr.bf16.mxu1 %v3867_v62 }
 0x450   :  { %2123 = vmatmul.mubr.bf16.gmra.mxu1 %v3868_v0 }
 0x451   :  { %2130 = vmatprep.mubr.bf16.mxu1 %v3869_v1 }
 0x458   :  { %2131 = vmatmul.mubr.bf16.gmra.mxu1 %v3870_v2 }
 0x460   :  { %v1948_v3 = vpop.f32.mrf.mxu1 }
 0x462   :  { %v1950_v4 = vpop.f32.mrf.mxu1 }
 0x464   :  { %v1951_v5 = vpop.f32.mrf.mxu1 }
 0x466   :  { %v1953_v6 = vpop.f32.mrf.mxu1 }
 0x468   :  { %v1956_v33 = vpop.f32.mrf.mxu1 }
 0x46a   :  { %v1958_v61 = vpop.f32.mrf.mxu1 }
 0x46c   :  { %v1959_v8 = vpop.f32.mrf.mxu1 }
 0x46e   :  { %v1961_v9 = vpop.f32.mrf.mxu1 }
 0x470   :  { %v1964_v7 = vpop.f32.mrf.mxu1 }
 0x472   :  { %v1966_v10 = vpop.f32.mrf.mxu1 }
 0x474   :  { %v1967_v11 = vpop.f32.mrf.mxu1 }
 0x476   :  { %v1969_v12 = vpop.f32.mrf.mxu1 }
 0x478   :  { %v1972_v58 = vpop.f32.mrf.mxu1 }
 0x47a   :  { %v1974_v56 = vpop.f32.mrf.mxu1 }
 0x47c   :  { %v1975_v13 = vpop.f32.mrf.mxu1 }
 0x47e   :  { %v1977_v63 = vpop.f32.mrf.mxu1 }
 0x480   :  { %v4234_v14 = vpop.f32.mrf.mxu1 }
 0x482   :  { %v1982_v15 = vpop.f32.mrf.mxu1 }
 0x484   :  { %v4236_v16 = vpop.f32.mrf.mxu1 }
 0x486   :  { %v1985_v17 = vpop.f32.mrf.mxu1 }
 0x488   :  { %v1988_v18 = vpop.f32.mrf.mxu1 }
 0x48a   :  { %v1990_v19 = vpop.f32.mrf.mxu1 }
 0x48c   :  { %v1991_v20 = vpop.f32.mrf.mxu1 }
 0x48e   :  { %v1993_v21 = vpop.f32.mrf.mxu1 }
 0x490   :  { %v4238_v22 = vpop.f32.mrf.mxu1 }
 0x492   :  { %v1998_v23 = vpop.f32.mrf.mxu1 }
 0x494   :  { %v4240_v24 = vpop.f32.mrf.mxu1 }
 0x496   :  { %v2001_v25 = vpop.f32.mrf.mxu1 }
 0x498   :  { %v4242_v26 = vpop.f32.mrf.mxu1 }
 0x49a   :  { %v2006_v28 = vpop.f32.mrf.mxu1 }
 0x49c   :  { %v4244_v30 = vpop.f32.mrf.mxu1 }
 0x49e   :  { %v2009_v29 = vpop.f32.mrf.mxu1 }
 0x4a0   :  { %v4248_v35 = vpop.f32.mrf.mxu1 }
 0x4a1   :  { %v3414_v32 = vpop.f32.mrf.mxu0 }
 0x4a2   :  { %v2182_v37 = vadd.f32 %v3414_v32, %v1956_v33  ;;  %v2014_v38 = vpop.f32.mrf.mxu1 }
 0x4a3   :  { %v2173_v40 = vpop.f32.mrf.mxu0 }
 0x4a4   :  { %v2174_v42 = vadd.f32 %v2173_v40, %v1948_v3  ;;  %v4251_v43 = vpop.f32.mrf.mxu1  ;;  %v4255_v34 = vsel %vm2366_vm0, %v2182_v37, -1e+30 }
 0x4a5   :  { %v3415_v39 = vpop.f32.mrf.mxu0  ;;  %2419 = vmax.xlane.f32.xlu1 %v4255_v34 }
 0x4a6   :  { %v2185_v44 = vadd.f32 %v3415_v39, %v1959_v8  ;;  %v2017_v45 = vpop.f32.mrf.mxu1  ;;  %v4260_v46 = vsel %vm2366_vm0, %v2174_v42, -1e+30 }
 0x4a7   :  { %v2176_v36 = vpop.f32.mrf.mxu0  ;;  %2415 = vmax.xlane.f32.xlu0 %v4260_v46 }
 0x4a8   :  { %v2177_v47 = vadd.f32 %v2176_v36, %v1951_v5  ;;  %v2020_v49 = vpop.f32.mrf.mxu1  ;;  %v4265_v41 = vsel %vm2366_vm0, %v2185_v44, -1e+30 }
 0x4a9   :  { %v3418_v48 = vpop.f32.mrf.mxu0  ;;  %2421 = vmax.xlane.f32.xlu1 %v4265_v41 }
 0x4aa   :  { %v2198_v50 = vadd.f32 %v3418_v48, %v1972_v58  ;;  %v2022_v51 = vpop.f32.mrf.mxu1  ;;  %v4270_v52 = vsel %vm2366_vm0, %v2177_v47, -1e+30 }
 0x4ab   :  { %v2189_v53 = vpop.f32.mrf.mxu0  ;;  %2417 = vmax.xlane.f32.xlu0 %v4270_v52 }
 0x4ac   :  { %v4273_v54 = vpop.f32.mrf.mxu1  ;;  %v2190_v57 = vadd.f32 %v2189_v53, %v1964_v7  ;;  %v4277_v62 = vsel %vm2366_vm0, %v2198_v50, -1e+30 }
 0x4ad   :  { %v3419_v55 = vpop.f32.mrf.mxu0 }
 0x4ae   :  { %v2201_v59 = vadd.f32 %v3419_v55, %v1975_v13  ;;  %v2025_v60 = vpop.f32.mrf.mxu1  ;;  %v4289_v33 = vsel %vm2366_vm0, %v2190_v57, -1e+30 }
 0x4af   :  { %v2192_v0 = vpop.f32.mrf.mxu0  ;;  %2427 = vmax.xlane.f32.xlu0 %v4277_v62 }
 0x4b0   :  { %v2193_v1 = vadd.f32 %v2192_v0, %v1967_v11  ;;  %v4280_v2 = vpop.f32.mrf.mxu1  ;;  %v4284_v3 = vsel %vm2366_vm0, %v2201_v59, -1e+30 }
 0x4b1   :  { %v3422_v4 = vpop.f32.mrf.mxu0  ;;  %2429 = vmax.xlane.f32.xlu1 %v4284_v3 }
 0x4b2   :  { %v2214_v5 = vadd.f32 %v3422_v4, %v1988_v18  ;;  %v2030_v6 = vpop.f32.mrf.mxu1  ;;  %v4296_v9 = vsel %vm2366_vm0, %v2193_v1, -1e+30 }
 0x4b3   :  { %v2205_v61 = vpop.f32.mrf.mxu0  ;;  %2423 = vmax.xlane.f32.xlu0 %v4289_v33 }
 0x4b4   :  { %v4292_v8 = vpop.f32.mrf.mxu1  ;;  %v2206_v10 = vadd.f32 %v2205_v61, %v4234_v14  ;;  %v4302_v58 = vsel %vm2366_vm0, %v2214_v5, -1e+30 }
 0x4b5   :  { %v3423_v7 = vpop.f32.mrf.mxu0  ;;  %2425 = vmax.xlane.f32.xlu1 %v4296_v9 }
 0x4b6   :  { %v2217_v11 = vadd.f32 %v3423_v7, %v1991_v20  ;;  %v2033_v12 = vpop.f32.mrf.mxu1  ;;  %v4314_v19 = vsel %vm2366_vm0, %v2206_v10, -1e+30 }
 0x4b7   :  { %v2208_v56 = vpop.f32.mrf.mxu0  ;;  %2435 = vmax.xlane.f32.xlu0 %v4302_v58 }
 0x4b8   :  { %v2209_v13 = vadd.f32 %v2208_v56, %v4236_v16  ;;  %v2036_v63 = vpop.f32.mrf.mxu1  ;;  %v4308_v15 = vsel %vm2366_vm0, %v2217_v11, -1e+30 }
 0x4b9   :  { %v3426_v17 = vpop.f32.mrf.mxu0  ;;  %2437 = vmax.xlane.f32.xlu1 %v4308_v15 }
 0x4ba   :  { %v2230_v14 = vadd.f32 %v3426_v17, %v4242_v26  ;;  %v2038_v18 = vpop.f32.mrf.mxu1  ;;  %v4319_v16 = vsel %vm2366_vm0, %v2209_v13, -1e+30 }
 0x4bb   :  { %v2221_v20 = vpop.f32.mrf.mxu0  ;;  %2431 = vmax.xlane.f32.xlu0 %v4314_v19 }
 0x4bc   :  { %v2039_v21 = vpop.f32.mrf.mxu1  ;;  %v2222_v25 = vadd.f32 %v2221_v20, %v4238_v22  ;;  %v4326_v28 = vsel %vm2366_vm0, %v2230_v14, -1e+30 }
 0x4bd   :  { %v3427_v23 = vpop.f32.mrf.mxu0  ;;  %2433 = vmax.xlane.f32.xlu1 %v4319_v16 }
 0x4be   :  { %v2233_v26 = vadd.f32 %v3427_v23, %v4244_v30  ;;  %v2041_v27 = vpop.f32.mrf.mxu1  ;;  %v4337_v42 = vsel %vm2366_vm0, %v2222_v25, -1e+30 }
 0x4bf   :  { %v2224_v29 = vpop.f32.mrf.mxu0  ;;  %2443 = vmax.xlane.f32.xlu0 %v4326_v28 }
 0x4c0   :  { %v2225_v32 = vadd.f32 %v2224_v29, %v4240_v24  ;;  %v2044_v37 = vpop.f32.mrf.mxu1  ;;  %v4332_v38 = vsel %vm2366_vm0, %v2233_v26, -1e+30 }
 0x4c1   :  { %v3430_v40 = vpop.f32.mrf.mxu0  ;;  %2445 = vmax.xlane.f32.xlu1 %v4332_v38 }
 0x4c2   :  { %v2246_v22 = vadd.f32 %v3430_v40, %v2020_v49  ;;  %v2046_v30 = vpop.f32.mrf.mxu1  ;;  %v4342_v24 = vsel %vm2366_vm0, %v2225_v32, -1e+30 }
 0x4c3   :  { %v2237_v39 = vpop.f32.mrf.mxu0  ;;  %2439 = vmax.xlane.f32.xlu0 %v4337_v42 }
 0x4c4   :  { %v2047_v44 = vpop.f32.mrf.mxu1  ;;  %v2238_v36 = vadd.f32 %v2237_v39, %v4248_v35  ;;  %v4349_v48 = vsel %vm2366_vm0, %v2246_v22, -1e+30 }
 0x4c5   :  { %v3431_v45 = vpop.f32.mrf.mxu0  ;;  %2441 = vmax.xlane.f32.xlu1 %v4342_v24 }
 0x4c6   :  { %v2249_v47 = vadd.f32 %v3431_v45, %v4273_v54  ;;  %v2049_v49 = vpop.f32.mrf.mxu1  ;;  %v4360_v59 = vsel %vm2366_vm0, %v2238_v36, -1e+30 }
 0x4c7   :  { %v2240_v50 = vpop.f32.mrf.mxu0  ;;  %2451 = vmax.xlane.f32.xlu0 %v4349_v48 }
 0x4c8   :  { %v2241_v51 = vadd.f32 %v2240_v50, %v4251_v43  ;;  %v2052_v53 = vpop.f32.mrf.mxu1  ;;  %v4355_v55 = vsel %vm2366_vm0, %v2249_v47, -1e+30 }
 0x4c9   :  { %v3434_v57 = vpop.f32.mrf.mxu0  ;;  %2453 = vmax.xlane.f32.xlu1 %v4355_v55 }
 0x4ca   :  { %v2262_v35 = vadd.f32 %v3434_v57, %v2036_v63  ;;  %v2054_v54 = vpop.f32.mrf.mxu1  ;;  %v4365_v43 = vsel %vm2366_vm0, %v2241_v51, -1e+30 }
 0x4cb   :  { %v2253_v60 = vpop.f32.mrf.mxu0  ;;  %2447 = vmax.xlane.f32.xlu0 %v4360_v59 }
 0x4cc   :  { %v2055_v0 = vpop.f32.mrf.mxu1  ;;  %v2254_v4 = vadd.f32 %v2253_v60, %v4280_v2  ;;  %v4371_v61 = vsel %vm2366_vm0, %v2262_v35, -1e+30 }
 0x4cd   :  { %v3435_v1 = vpop.f32.mrf.mxu0  ;;  %2449 = vmax.xlane.f32.xlu1 %v4365_v43 }
 0x4ce   :  { %v2265_v5 = vadd.f32 %v3435_v1, %v2039_v21  ;;  %v2057_v6 = vpop.f32.mrf.mxu1  ;;  %v4382_v63 = vsel %vm2366_vm0, %v2254_v4, -1e+30 }
 0x4cf   :  { %v2256_v7 = vpop.f32.mrf.mxu0  ;;  %2459 = vmax.xlane.f32.xlu0 %v4371_v61 }
 0x4d0   :  { %v2257_v10 = vadd.f32 %v2256_v7, %v4292_v8  ;;  %v2060_v11 = vpop.f32.mrf.mxu1  ;;  %v4377_v12 = vsel %vm2366_vm0, %v2265_v5, -1e+30 }
 0x4d1   :  { %v3438_v56 = vpop.f32.mrf.mxu0  ;;  %2461 = vmax.xlane.f32.xlu1 %v4377_v12 }
 0x4d2   :  { %v2278_v2 = vadd.f32 %v3438_v56, %v2052_v53  ;;  %v2062_v13 = vpop.f32.mrf.mxu1  ;;  %v4387_v8 = vsel %vm2366_vm0, %v2257_v10, -1e+30 }
 0x4d3   :  { %v2269_v17 = vpop.f32.mrf.mxu0  ;;  %2455 = vmax.xlane.f32.xlu0 %v4382_v63 }
 0x4d4   :  { %v2063_v14 = vpop.f32.mrf.mxu1  ;;  %v2270_v20 = vadd.f32 %v2269_v17, %v2044_v37  ;;  %v4392_v25 = vsel %vm2366_vm0, %v2278_v2, -1e+30 }
 0x4d5   :  { %v3439_v18 = vpop.f32.mrf.mxu0  ;;  %2457 = vmax.xlane.f32.xlu1 %v4387_v8 }
 0x4d6   :  { %v2281_v21 = vadd.f32 %v3439_v18, %v2055_v0  ;;  %v2065_v23 = vpop.f32.mrf.mxu1  ;;  %v4402_v30 = vsel %vm2366_vm0, %v2270_v20, -1e+30 }
 0x4d7   :  { %v2272_v26 = vpop.f32.mrf.mxu0  ;;  %2467 = vmax.xlane.f32.xlu0 %v4392_v25 }
 0x4d8   :  { %v2273_v27 = vadd.f32 %v2272_v26, %v2047_v44  ;;  %v2068_v29 = vpop.f32.mrf.mxu1  ;;  %v4397_v32 = vsel %vm2366_vm0, %v2281_v21, -1e+30 }
 0x4d9   :  { %v3442_v40 = vpop.f32.mrf.mxu0  ;;  %2469 = vmax.xlane.f32.xlu1 %v4397_v32 }
 0x4da   :  { %v2294_v22 = vadd.f32 %v3442_v40, %v2068_v29  ;;  %v2070_v37 = vpop.f32.mrf.mxu1  ;;  %v4407_v44 = vsel %vm2366_vm0, %v2273_v27, -1e+30 }
 0x4db   :  { %v2285_v39 = vpop.f32.mrf.mxu0  ;;  %2463 = vmax.xlane.f32.xlu0 %v4402_v30 }
 0x4dc   :  { %v2071_v45 = vpop.f32.mrf.mxu1  ;;  %v2286_v47 = vadd.f32 %v2285_v39, %v2060_v11  ;;  %v4412_v51 = vsel %vm2366_vm0, %v2294_v22, -1e+30 }
 0x4dd   :  { %v3443_v36 = vpop.f32.mrf.mxu0  ;;  %2465 = vmax.xlane.f32.xlu1 %v4407_v44 }
 0x4de   :  { %v2297_v49 = vadd.f32 %v3443_v36, %v2071_v45  ;;  %v2073_v50 = vpop.f32.mrf.mxu1  ;;  %v4422_v1 = vsel %vm2366_vm0, %v2286_v47, -1e+30 }
 0x4df   :  { %v2288_v53 = vpop.f32.mrf.mxu0  ;;  %2475 = vmax.xlane.f32.xlu0 %v4412_v51 }
 0x4e0   :  { %v2289_v57 = vadd.f32 %v2288_v53, %v2063_v14  ;;  %v2076_v35 = vpop.f32.mrf.mxu1  ;;  %v4417_v54 = vsel %vm2366_vm0, %v2297_v49, -1e+30 }
 0x4e1   :  { %v3446_v60 = vpop.f32.mrf.mxu0  ;;  %2477 = vmax.xlane.f32.xlu1 %v4417_v54 }
 0x4e2   :  { %v2078_v0 = vpop.f32.mrf.mxu1  ;;  %v4427_v7 = vsel %vm2366_vm0, %v2289_v57, -1e+30 }
 0x4e3   :  { %v2301_v4 = vpop.f32.mrf.mxu0  ;;  %2471 = vmax.xlane.f32.xlu0 %v4422_v1 }
 0x4e4   :  { %v2302_v5 = vadd.f32 %v2301_v4, %v2076_v35  ;;  %v2079_v6 = vpop.f32.mrf.mxu1 }
 0x4e5   :  { %v3447_v10 = vpop.f32.mrf.mxu0  ;;  %2473 = vmax.xlane.f32.xlu1 %v4427_v7 }
 0x4e6   :  { %v2081_v11 = vpop.f32.mrf.mxu1  ;;  %v4432_v56 = vsel %vm2366_vm0, %v2302_v5, -1e+30 }
 0x4e7   :  { %v2304_v2 = vpop.f32.mrf.mxu0  ;;  %2479 = vmax.xlane.f32.xlu0 %v4432_v56 }
 0x4e8   :  { %v2305_v13 = vadd.f32 %v2304_v2, %v2079_v6  ;;  %v2084_v17 = vpop.f32.mrf.mxu1 }
 0x4e9   :  { %v2310_v14 = vadd.f32 %v3446_v60, %v2084_v17  ;;  %v3450_v18 = vpop.f32.mrf.mxu0 }
 0x4ea   :  { %v2086_v20 = vpop.f32.mrf.mxu1  ;;  %v4437_v21 = vsel %vm2366_vm0, %v2305_v13, -1e+30 }
 0x4eb   :  { %2481 = vmax.xlane.f32.xlu1 %v4437_v21  ;;  %v4442_v23 = vsel %vm2366_vm0, %v2310_v14, -1e+30  ;;  %v2317_v26 = vpop.f32.mrf.mxu0 }
 0x4ec   :  { %2483 = vmax.xlane.f32.xlu0 %v4442_v23  ;;  %v2087_v27 = vpop.f32.mrf.mxu1 }
 0x4ed   :  { %v2313_v29 = vadd.f32 %v3447_v10, %v2087_v27  ;;  %v3451_v22 = vpop.f32.mrf.mxu0 }
 0x4ee   :  { %v2089_v40 = vpop.f32.mrf.mxu1 }
 0x4ef   :  { %v4447_v37 = vsel %vm2366_vm0, %v2313_v29, -1e+30  ;;  %v2320_v47 = vpop.f32.mrf.mxu0 }
 0x4f0   :  { %2485 = vmax.xlane.f32.xlu1 %v4447_v37  ;;  %v2092_v39 = vpop.f32.mrf.mxu1 }
 0x4f1   :  { %v2318_v45 = vadd.f32 %v2317_v26, %v2092_v39  ;;  %v3454_v35 = vpop.f32.mrf.mxu0 }
 0x4f2   :  { %v2094_v36 = vpop.f32.mrf.mxu1 }
 0x4f3   :  { %v4452_v49 = vsel %vm2366_vm0, %v2318_v45, -1e+30  ;;  %v2333_v6 = vpop.f32.mrf.mxu0 }
 0x4f4   :  { %2487 = vmax.xlane.f32.xlu0 %v4452_v49  ;;  %v2095_v50 = vpop.f32.mrf.mxu1 }
 0x4f5   :  { %v2321_v53 = vadd.f32 %v2320_v47, %v2095_v50  ;;  %v3455_v17 = vpop.f32.mrf.mxu0 }
 0x4f6   :  { %v2097_v57 = vpop.f32.mrf.mxu1 }
 0x4f7   :  { %v4457_v60 = vsel %vm2366_vm0, %v2321_v53, -1e+30  ;;  %v2336_v27 = vpop.f32.mrf.mxu0 }
 0x4f8   :  { %2489 = vmax.xlane.f32.xlu1 %v4457_v60  ;;  %v2100_v0 = vpop.f32.mrf.mxu1 }
 0x4f9   :  { %v2326_v4 = vadd.f32 %v3450_v18, %v2100_v0  ;;  %v3458_v47 = vpop.f32.mrf.mxu0 }
 0x4fa   :  { %v2102_v5 = vpop.f32.mrf.mxu1 }
 0x4fb   :  { %v4462_v10 = vsel %vm2366_vm0, %v2326_v4, -1e+30  ;;  %v2349_v4 = vpop.f32.mrf.mxu0 }
 0x4fc   :  { %2491 = vmax.xlane.f32.xlu0 %v4462_v10  ;;  %v2103_v11 = vpop.f32.mrf.mxu1 }
 0x4fd   :  { %v2329_v2 = vadd.f32 %v3451_v22, %v2103_v11 }
 0x4fe   :  { %v2105_v13 = vpop.f32.mrf.mxu1 }
 0x4ff   :  { %v4467_v14 = vsel %vm2366_vm0, %v2329_v2, -1e+30  ;;  %v3459_v13 = vpop.f32.mrf.mxu0 }
 0x500   :  { %2493 = vmax.xlane.f32.xlu1 %v4467_v14  ;;  %v2108_v20 = vpop.f32.mrf.mxu1 }
 0x501   :  { %v2334_v18 = vadd.f32 %v2333_v6, %v2108_v20 }
 0x502   :  { %v2110_v26 = vpop.f32.mrf.mxu1 }
 0x503   :  { %v4472_v29 = vsel %vm2366_vm0, %v2334_v18, -1e+30  ;;  %v2352_v26 = vpop.f32.mrf.mxu0 }
 0x504   :  { %2495 = vmax.xlane.f32.xlu0 %v4472_v29  ;;  %v2111_v40 = vpop.f32.mrf.mxu1 }
 0x505   :  { %v2337_v22 = vadd.f32 %v2336_v27, %v2111_v40 }
 0x506   :  { %v2113_v39 = vpop.f32.mrf.mxu1 }
 0x507   :  { %v4477_v45 = vsel %vm2366_vm0, %v2337_v22, -1e+30 }
 0x508   :  { %2497 = vmax.xlane.f32.xlu1 %v4477_v45  ;;  %v2116_v36 = vpop.f32.mrf.mxu1 }
 0x509   :  { %v2342_v50 = vadd.f32 %v3454_v35, %v2116_v36 }
 0x50a   :  { %v2118_v53 = vpop.f32.mrf.mxu1 }
 0x50b   :  { %v4482_v57 = vsel %vm2366_vm0, %v2342_v50, -1e+30 }
 0x50c   :  { %2499 = vmax.xlane.f32.xlu0 %v4482_v57  ;;  %v2119_v0 = vpop.f32.mrf.mxu1 }
 0x50d   :  { %v2345_v5 = vadd.f32 %v3455_v17, %v2119_v0 }
 0x50e   :  { %v2121_v6 = vpop.f32.mrf.mxu1 }
 0x50f   :  { %v4487_v11 = vsel %vm2366_vm0, %v2345_v5, -1e+30 }
 0x510   :  { %2501 = vmax.xlane.f32.xlu1 %v4487_v11  ;;  %v2124_v2 = vpop.f32.mrf.mxu1 }
 0x511   :  { %v2350_v35 = vadd.f32 %v2349_v4, %v2124_v2 }
 0x512   :  { %v2126_v20 = vpop.f32.mrf.mxu1 }
 0x513   :  { %v4492_v18 = vsel %vm2366_vm0, %v2350_v35, -1e+30 }
 0x514   :  { %2503 = vmax.xlane.f32.xlu0 %v4492_v18  ;;  %v2127_v27 = vpop.f32.mrf.mxu1 }
 0x515   :  { %v2353_v17 = vadd.f32 %v2352_v26, %v2127_v27 }
 0x516   :  { %v2129_v40 = vpop.f32.mrf.mxu1 }
 0x517   :  { %v4497_v22 = vsel %vm2366_vm0, %v2353_v17, -1e+30 }
 0x518   :  { %2505 = vmax.xlane.f32.xlu1 %v4497_v22  ;;  %v2132_v39 = vpop.f32.mrf.mxu1 }
 0x519   :  { %v2358_v36 = vadd.f32 %v3458_v47, %v2132_v39 }
 0x51a   :  { %v2134_v50 = vpop.f32.mrf.mxu1 }
 0x51b   :  { %v4502_v53 = vsel %vm2366_vm0, %v2358_v36, -1e+30 }
 0x51c   :  { %2507 = vmax.xlane.f32.xlu0 %v4502_v53  ;;  %v2135_v0 = vpop.f32.mrf.mxu1 }
 0x51d   :  { %v2361_v4 = vadd.f32 %v3459_v13, %v2135_v0 }
 0x51e   :  { %v2137_v5 = vpop.f32.mrf.mxu1 }
 0x51f   :  { %v4507_v6 = vsel %vm2366_vm0, %v2361_v4, -1e+30 }
 0x520   :  { %2509 = vmax.xlane.f32.xlu1 %v4507_v6 }
 0x52e   :  { %v2420_v2 = vpop.xlane.xlu1 %2419 }
 0x52f   :  { %v4511_v35 = vsub.f32 %v4255_v34, %v2420_v2 }
 0x530   :  { %v2416_v47 = vpop.xlane.xlu0 %2415 }
 0x531   :  { %v2563_v20 = vmul.f32 1.442695, %v4511_v35  ;;  %v4515_v26 = vsub.f32 %v4260_v46, %v2416_v47 }
 0x532   :  { %v2422_v27 = vpop.xlane.xlu1 %2421 }
 0x533   :  { %3608 = vpow2.f32 %v2563_v20  ;;  %v2559_v13 = vmul.f32 1.442695, %v4515_v26  ;;  %v4519_v31 = vsub.f32 %v4265_v41, %v2422_v27 }
 0x534   :  { %v2418_v17 = vpop.xlane.xlu0 %2417 }
 0x535   :  { %v2565_v40 = vmul.f32 1.442695, %v4519_v31  ;;  %v4523_v39 = vsub.f32 %v4270_v52, %v2418_v17  ;;  %3610 = vpow2.f32 %v2559_v13 }
 0x537   :  { %3612 = vpow2.f32 %v2565_v40  ;;  %v2561_v34 = vmul.f32 1.442695, %v4523_v39 }
 0x538   :  { %v2428_v36 = vpop.xlane.xlu0 %2427 }
 0x539   :  { %v4527_v46 = vsub.f32 %v4277_v62, %v2428_v36  ;;  %3614 = vpow2.f32 %v2561_v34 }
 0x53a   :  { %v2430_v50 = vpop.xlane.xlu1 %2429 }
 0x53b   :  { %v2571_v0 = vmul.f32 1.442695, %v4527_v46  ;;  %v4531_v41 = vsub.f32 %v4284_v3, %v2430_v50 }
 0x53c   :  { %v2424_v4 = vpop.xlane.xlu0 %2423 }
 0x53d   :  { %3616 = vpow2.f32 %v2571_v0  ;;  %v2573_v52 = vmul.f32 1.442695, %v4531_v41  ;;  %v4535_v5 = vsub.f32 %v4289_v33, %v2424_v4 }
 0x53e   :  { %v2426_v2 = vpop.xlane.xlu1 %2425 }
 0x53f   :  { %3618 = vpow2.f32 %v2573_v52  ;;  %v2567_v47 = vmul.f32 1.442695, %v4535_v5  ;;  %v4539_v62 = vsub.f32 %v4296_v9, %v2426_v2 }
 0x540   :  { %v3609_v20 = vpop.eup %3608  ;;  %v2436_v27 = vpop.xlane.xlu0 %2435 }
 0x541   :  { %3620 = vpow2.f32 %v2567_v47  ;;  %v2569_v3 = vmul.f32 1.442695, %v4539_v62  ;;  %v4543_v13 = vsub.f32 %v4302_v58, %v2436_v27  ;;  %2659 = vadd.xlane.f32.xlu0 %v3609_v20 }
 0x542   :  { %v2438_v17 = vpop.xlane.xlu1 %2437  ;;  %v3611_v40 = vpop.eup %3610 }
 0x543   :  { %3622 = vpow2.f32 %v2569_v3  ;;  %v2579_v33 = vmul.f32 1.442695, %v4543_v13  ;;  %v4547_v34 = vsub.f32 %v4308_v15, %v2438_v17 }
 0x544   :  { %v3613_v36 = vpop.eup %3612  ;;  %v2432_v9 = vpop.xlane.xlu0 %2431 }
 0x545   :  { %3624 = vpow2.f32 %v2579_v33  ;;  %v2581_v50 = vmul.f32 1.442695, %v4547_v34  ;;  %v4551_v0 = vsub.f32 %v4314_v19, %v2432_v9  ;;  %2655 = vadd.xlane.f32.xlu0 %v3611_v40  ;;  %2661 = vadd.xlane.f32.xlu1 %v3613_v36 }
 0x546   :  { %v2434_v58 = vpop.xlane.xlu1 %2433  ;;  %v3615_v2 = vpop.eup %3614 }
 0x547   :  { %3626 = vpow2.f32 %v2581_v50  ;;  %v2575_v4 = vmul.f32 1.442695, %v4551_v0  ;;  %v4555_v52 = vsub.f32 %v4319_v16, %v2434_v58 }
 0x548   :  { %v2444_v15 = vpop.xlane.xlu0 %2443 }
 0x549   :  { %3628 = vpow2.f32 %v2575_v4  ;;  %v2577_v47 = vmul.f32 1.442695, %v4555_v52  ;;  %v4559_v20 = vsub.f32 %v4326_v28, %v2444_v15  ;;  %2657 = vadd.xlane.f32.xlu1 %v3615_v2 }
 0x54a   :  { %v3617_v19 = vpop.eup %3616  ;;  %v2446_v27 = vpop.xlane.xlu1 %2445 }
 0x54b   :  { %3630 = vpow2.f32 %v2577_v47  ;;  %v2587_v3 = vmul.f32 1.442695, %v4559_v20  ;;  %v4563_v17 = vsub.f32 %v4332_v38, %v2446_v27  ;;  %2667 = vadd.xlane.f32.xlu0 %v3617_v19 }
 0x54c   :  { %v3619_v16 = vpop.eup %3618  ;;  %v2440_v40 = vpop.xlane.xlu0 %2439 }
 0x54d   :  { %3632 = vpow2.f32 %v2587_v3  ;;  %v2589_v33 = vmul.f32 1.442695, %v4563_v17  ;;  %v4567_v36 = vsub.f32 %v4337_v42, %v2440_v40  ;;  %2669 = vadd.xlane.f32.xlu1 %v3619_v16 }
 0x54e   :  { %v3621_v28 = vpop.eup %3620  ;;  %v2442_v9 = vpop.xlane.xlu1 %2441 }
 0x54f   :  { %3634 = vpow2.f32 %v2589_v33  ;;  %v2583_v50 = vmul.f32 1.442695, %v4567_v36  ;;  %v4571_v58 = vsub.f32 %v4342_v24, %v2442_v9  ;;  %2663 = vadd.xlane.f32.xlu0 %v3621_v28 }
 0x550   :  { %v3623_v38 = vpop.eup %3622  ;;  %v2452_v4 = vpop.xlane.xlu0 %2451 }
 0x551   :  { %3636 = vpow2.f32 %v2583_v50  ;;  %v2585_v2 = vmul.f32 1.442695, %v4571_v58  ;;  %v4575_v15 = vsub.f32 %v4349_v48, %v2452_v4  ;;  %2665 = vadd.xlane.f32.xlu1 %v3623_v38 }
 0x552   :  { %v3625_v42 = vpop.eup %3624  ;;  %v2454_v47 = vpop.xlane.xlu1 %2453 }
 0x553   :  { %3638 = vpow2.f32 %v2585_v2  ;;  %v2595_v19 = vmul.f32 1.442695, %v4575_v15  ;;  %v4579_v27 = vsub.f32 %v4355_v55, %v2454_v47  ;;  %2675 = vadd.xlane.f32.xlu0 %v3625_v42 }
 0x554   :  { %v3627_v24 = vpop.eup %3626  ;;  %v2448_v3 = vpop.xlane.xlu0 %2447 }
 0x555   :  { %3640 = vpow2.f32 %v2595_v19  ;;  %v2597_v16 = vmul.f32 1.442695, %v4579_v27  ;;  %v4583_v40 = vsub.f32 %v4360_v59, %v2448_v3  ;;  %2677 = vadd.xlane.f32.xlu1 %v3627_v24 }
 0x556   :  { %v3629_v48 = vpop.eup %3628  ;;  %v2450_v33 = vpop.xlane.xlu1 %2449 }
 0x557   :  { %3642 = vpow2.f32 %v2597_v16  ;;  %v2591_v28 = vmul.f32 1.442695, %v4583_v40  ;;  %v4587_v9 = vsub.f32 %v4365_v43, %v2450_v33  ;;  %2671 = vadd.xlane.f32.xlu0 %v3629_v48 }
 0x558   :  { %v3631_v55 = vpop.eup %3630  ;;  %v2460_v50 = vpop.xlane.xlu0 %2459 }
 0x559   :  { %3644 = vpow2.f32 %v2591_v28  ;;  %v2593_v38 = vmul.f32 1.442695, %v4587_v9  ;;  %v4591_v4 = vsub.f32 %v4371_v61, %v2460_v50  ;;  %2673 = vadd.xlane.f32.xlu1 %v3631_v55 }
 0x55a   :  { %v3633_v59 = vpop.eup %3632  ;;  %v2462_v2 = vpop.xlane.xlu1 %2461 }
 0x55b   :  { %3646 = vpow2.f32 %v2593_v38  ;;  %v2603_v42 = vmul.f32 1.442695, %v4591_v4  ;;  %v4595_v47 = vsub.f32 %v4377_v12, %v2462_v2  ;;  %2683 = vadd.xlane.f32.xlu0 %v3633_v59 }
 0x55c   :  { %v3635_v43 = vpop.eup %3634  ;;  %v2456_v19 = vpop.xlane.xlu0 %2455 }
 0x55d   :  { %3648 = vpow2.f32 %v2603_v42  ;;  %v2605_v24 = vmul.f32 1.442695, %v4595_v47  ;;  %v4599_v3 = vsub.f32 %v4382_v63, %v2456_v19  ;;  %2685 = vadd.xlane.f32.xlu1 %v3635_v43 }
 0x55e   :  { %v3637_v61 = vpop.eup %3636  ;;  %v2458_v16 = vpop.xlane.xlu1 %2457 }
 0x55f   :  { %3650 = vpow2.f32 %v2605_v24  ;;  %v2599_v48 = vmul.f32 1.442695, %v4599_v3  ;;  %v4603_v33 = vsub.f32 %v4387_v8, %v2458_v16  ;;  %2679 = vadd.xlane.f32.xlu0 %v3637_v61 }
 0x560   :  { %v3639_v12 = vpop.eup %3638  ;;  %v2468_v28 = vpop.xlane.xlu0 %2467 }
 0x561   :  { %3652 = vpow2.f32 %v2599_v48  ;;  %v2601_v55 = vmul.f32 1.442695, %v4603_v33  ;;  %v4607_v50 = vsub.f32 %v4392_v25, %v2468_v28  ;;  %2681 = vadd.xlane.f32.xlu1 %v3639_v12 }
 0x562   :  { %v3641_v63 = vpop.eup %3640  ;;  %v2470_v38 = vpop.xlane.xlu1 %2469 }
 0x563   :  { %3654 = vpow2.f32 %v2601_v55  ;;  %v2611_v59 = vmul.f32 1.442695, %v4607_v50  ;;  %v4611_v2 = vsub.f32 %v4397_v32, %v2470_v38  ;;  %2691 = vadd.xlane.f32.xlu0 %v3641_v63 }
 0x564   :  { %v3643_v8 = vpop.eup %3642  ;;  %v2464_v42 = vpop.xlane.xlu0 %2463 }
 0x565   :  { %3656 = vpow2.f32 %v2611_v59  ;;  %v2613_v43 = vmul.f32 1.442695, %v4611_v2  ;;  %v4615_v19 = vsub.f32 %v4402_v30, %v2464_v42  ;;  %2693 = vadd.xlane.f32.xlu1 %v3643_v8 }
 0x566   :  { %v3645_v25 = vpop.eup %3644  ;;  %v2466_v24 = vpop.xlane.xlu1 %2465 }
 0x567   :  { %3658 = vpow2.f32 %v2613_v43  ;;  %v2607_v61 = vmul.f32 1.442695, %v4615_v19  ;;  %v4619_v16 = vsub.f32 %v4407_v44, %v2466_v24  ;;  %2687 = vadd.xlane.f32.xlu0 %v3645_v25 }
 0x568   :  { %v3647_v32 = vpop.eup %3646  ;;  %v2476_v48 = vpop.xlane.xlu0 %2475 }
 0x569   :  { %3660 = vpow2.f32 %v2607_v61  ;;  %v2609_v12 = vmul.f32 1.442695, %v4619_v16  ;;  %v4623_v28 = vsub.f32 %v4412_v51, %v2476_v48  ;;  %2689 = vadd.xlane.f32.xlu1 %v3647_v32 }
 0x56a   :  { %v3649_v30 = vpop.eup %3648  ;;  %v2478_v55 = vpop.xlane.xlu1 %2477 }
 0x56b   :  { %3662 = vpow2.f32 %v2609_v12  ;;  %v2619_v63 = vmul.f32 1.442695, %v4623_v28  ;;  %v4627_v38 = vsub.f32 %v4417_v54, %v2478_v55  ;;  %2699 = vadd.xlane.f32.xlu0 %v3649_v30 }
 0x56c   :  { %v3651_v44 = vpop.eup %3650  ;;  %v2472_v59 = vpop.xlane.xlu0 %2471 }
 0x56d   :  { %3664 = vpow2.f32 %v2619_v63  ;;  %v2621_v8 = vmul.f32 1.442695, %v4627_v38  ;;  %v4631_v42 = vsub.f32 %v4422_v1, %v2472_v59  ;;  %2701 = vadd.xlane.f32.xlu1 %v3651_v44 }
 0x56e   :  { %v3653_v51 = vpop.eup %3652  ;;  %v2474_v43 = vpop.xlane.xlu1 %2473 }
 0x56f   :  { %3666 = vpow2.f32 %v2621_v8  ;;  %v2615_v25 = vmul.f32 1.442695, %v4631_v42  ;;  %v4635_v24 = vsub.f32 %v4427_v7, %v2474_v43  ;;  %2695 = vadd.xlane.f32.xlu0 %v3653_v51 }
 0x570   :  { %v3655_v54 = vpop.eup %3654  ;;  %v2480_v61 = vpop.xlane.xlu0 %2479 }
 0x571   :  { %3668 = vpow2.f32 %v2615_v25  ;;  %v2617_v32 = vmul.f32 1.442695, %v4635_v24  ;;  %v4639_v48 = vsub.f32 %v4432_v56, %v2480_v61  ;;  %2697 = vadd.xlane.f32.xlu1 %v3655_v54 }
 0x572   :  { %v3657_v1 = vpop.eup %3656 }
 0x573   :  { %3670 = vpow2.f32 %v2617_v32  ;;  %v2623_v12 = vmul.f32 1.442695, %v4639_v48  ;;  %2707 = vadd.xlane.f32.xlu0 %v3657_v1 }
 0x574   :  { %v3659_v30 = vpop.eup %3658  ;;  %v2482_v55 = vpop.xlane.xlu1 %2481 }
 0x575   :  { %3672 = vpow2.f32 %v2623_v12  ;;  %v4643_v7 = vsub.f32 %v4437_v21, %v2482_v55  ;;  %v2484_v63 = vpop.xlane.xlu0 %2483  ;;  %2709 = vadd.xlane.f32.xlu1 %v3659_v30 }
 0x576   :  { %v3661_v44 = vpop.eup %3660  ;;  %v4646_v59 = vsub.f32 %v4442_v23, %v2484_v63 }
 0x577   :  { %v2625_v56 = vmul.f32 1.442695, %v4643_v7  ;;  %2703 = vadd.xlane.f32.xlu0 %v3661_v44 }
 0x578   :  { %v3663_v8 = vpop.eup %3662  ;;  %v2627_v51 = vmul.f32 1.442695, %v4646_v59 }
 0x579   :  { %3674 = vpow2.f32 %v2625_v56  ;;  %v2486_v43 = vpop.xlane.xlu1 %2485  ;;  %2705 = vadd.xlane.f32.xlu1 %v3663_v8 }
 0x57a   :  { %v3665_v25 = vpop.eup %3664  ;;  %3676 = vpow2.f32 %v2627_v51  ;;  %v4651_v21 = vsub.f32 %v4447_v37, %v2486_v43 }
 0x57b   :  { %2715 = vadd.xlane.f32.xlu0 %v3665_v25 }
 0x57c   :  { %v3667_v54 = vpop.eup %3666  ;;  %v2629_v61 = vmul.f32 1.442695, %v4651_v21 }
 0x57d   :  { %v2488_v23 = vpop.xlane.xlu0 %2487  ;;  %2717 = vadd.xlane.f32.xlu1 %v3667_v54 }
 0x57e   :  { %v3669_v32 = vpop.eup %3668  ;;  %3678 = vpow2.f32 %v2629_v61  ;;  %v4655_v1 = vsub.f32 %v4452_v49, %v2488_v23 }
 0x57f   :  { %2711 = vadd.xlane.f32.xlu0 %v3669_v32 }
 0x580   :  { %v3671_v12 = vpop.eup %3670  ;;  %v2631_v30 = vmul.f32 1.442695, %v4655_v1 }
 0x581   :  { %v2490_v55 = vpop.xlane.xlu1 %2489  ;;  %2713 = vadd.xlane.f32.xlu1 %v3671_v12 }
 0x582   :  { %v3673_v63 = vpop.eup %3672  ;;  %3680 = vpow2.f32 %v2631_v30  ;;  %v4659_v37 = vsub.f32 %v4457_v60, %v2490_v55 }
 0x583   :  { %2719 = vadd.xlane.f32.xlu0 %v3673_v63 }
 0x584   :  { %v2633_v44 = vmul.f32 1.442695, %v4659_v37 }
 0x585   :  { %v2492_v56 = vpop.xlane.xlu0 %2491 }
 0x586   :  { %v3675_v8 = vpop.eup %3674  ;;  %3682 = vpow2.f32 %v2633_v44  ;;  %v4663_v49 = vsub.f32 %v4462_v10, %v2492_v56 }
 0x587   :  { %v3677_v51 = vpop.eup %3676  ;;  %2721 = vadd.xlane.f32.xlu1 %v3675_v8 }
 0x588   :  { %v2635_v43 = vmul.f32 1.442695, %v4663_v49  ;;  %2723 = vadd.xlane.f32.xlu0 %v3677_v51 }
 0x589   :  { %v2494_v25 = vpop.xlane.xlu1 %2493 }
 0x58a   :  { %3684 = vpow2.f32 %v2635_v43  ;;  %v4667_v54 = vsub.f32 %v4467_v14, %v2494_v25 }
 0x58b   :  { %v3679_v60 = vpop.eup %3678 }
 0x58c   :  { %v2637_v61 = vmul.f32 1.442695, %v4667_v54  ;;  %2725 = vadd.xlane.f32.xlu1 %v3679_v60 }
 0x58d   :  { %v2496_v23 = vpop.xlane.xlu0 %2495 }
 0x58e   :  { %3686 = vpow2.f32 %v2637_v61  ;;  %v4671_v32 = vsub.f32 %v4472_v29, %v2496_v23 }
 0x58f   :  { %v3681_v10 = vpop.eup %3680 }
 0x590   :  { %v2639_v12 = vmul.f32 1.442695, %v4671_v32  ;;  %2727 = vadd.xlane.f32.xlu0 %v3681_v10 }
 0x591   :  { %v2498_v30 = vpop.xlane.xlu1 %2497 }
 0x592   :  { %3688 = vpow2.f32 %v2639_v12  ;;  %v4675_v55 = vsub.f32 %v4477_v45, %v2498_v30 }
 0x593   :  { %v3683_v14 = vpop.eup %3682 }
 0x594   :  { %v2641_v63 = vmul.f32 1.442695, %v4675_v55  ;;  %2729 = vadd.xlane.f32.xlu1 %v3683_v14 }
 0x595   :  { %v2500_v44 = vpop.xlane.xlu0 %2499 }
 0x596   :  { %3690 = vpow2.f32 %v2641_v63  ;;  %v4679_v56 = vsub.f32 %v4482_v57, %v2500_v44 }
 0x597   :  { %v3685_v29 = vpop.eup %3684 }
 0x598   :  { %v2643_v8 = vmul.f32 1.442695, %v4679_v56  ;;  %2731 = vadd.xlane.f32.xlu0 %v3685_v29 }
 0x599   :  { %v2502_v51 = vpop.xlane.xlu1 %2501 }
 0x59a   :  { %3692 = vpow2.f32 %v2643_v8  ;;  %v4683_v43 = vsub.f32 %v4487_v11, %v2502_v51 }
 0x59b   :  { %v3687_v45 = vpop.eup %3686 }
 0x59c   :  { %v2645_v25 = vmul.f32 1.442695, %v4683_v43  ;;  %2733 = vadd.xlane.f32.xlu1 %v3687_v45 }
 0x59d   :  { %v2504_v60 = vpop.xlane.xlu0 %2503 }
 0x59e   :  { %3694 = vpow2.f32 %v2645_v25  ;;  %v4687_v61 = vsub.f32 %v4492_v18, %v2504_v60 }
 0x59f   :  { %v3689_v57 = vpop.eup %3688 }
 0x5a0   :  { %v2647_v23 = vmul.f32 1.442695, %v4687_v61  ;;  %2735 = vadd.xlane.f32.xlu0 %v3689_v57 }
 0x5a1   :  { %v2506_v10 = vpop.xlane.xlu1 %2505 }
 0x5a2   :  { %3696 = vpow2.f32 %v2647_v23  ;;  %v4691_v12 = vsub.f32 %v4497_v22, %v2506_v10 }
 0x5a3   :  { %v3691_v11 = vpop.eup %3690 }
 0x5a4   :  { %v2649_v30 = vmul.f32 1.442695, %v4691_v12  ;;  %2737 = vadd.xlane.f32.xlu1 %v3691_v11 }
 0x5a5   :  { %v2508_v14 = vpop.xlane.xlu0 %2507 }
 0x5a6   :  { %3698 = vpow2.f32 %v2649_v30  ;;  %v4695_v63 = vsub.f32 %v4502_v53, %v2508_v14 }
 0x5a7   :  { %v3693_v18 = vpop.eup %3692 }
 0x5a8   :  { %v2651_v44 = vmul.f32 1.442695, %v4695_v63  ;;  %2739 = vadd.xlane.f32.xlu0 %v3693_v18 }
 0x5a9   :  { %v2510_v29 = vpop.xlane.xlu1 %2509 }
 0x5aa   :  { %3700 = vpow2.f32 %v2651_v44  ;;  %v4699_v8 = vsub.f32 %v4507_v6, %v2510_v29 }
 0x5ab   :  { %v3695_v22 = vpop.eup %3694 }
 0x5ac   :  { %v2653_v51 = vmul.f32 1.442695, %v4699_v8  ;;  %2741 = vadd.xlane.f32.xlu1 %v3695_v22 }
 0x5ae   :  { %3702 = vpow2.f32 %v2653_v51 }
 0x5af   :  { %v3697_v45 = vpop.eup %3696 }
 0x5b0   :  { %2743 = vadd.xlane.f32.xlu0 %v3697_v45 }
 0x5b3   :  { %v3699_v25 = vpop.eup %3698 }
 0x5b4   :  { %2745 = vadd.xlane.f32.xlu1 %v3699_v25 }
 0x5b7   :  { %v3701_v53 = vpop.eup %3700 }
 0x5b8   :  { %2747 = vadd.xlane.f32.xlu0 %v3701_v53 }
 0x5bb   :  { %v3703_v60 = vpop.eup %3702 }
 0x5bc   :  { %2749 = vadd.xlane.f32.xlu1 %v3703_v60 }
 0x5ca   :  { %v2660_v57 = vpop.xlane.xlu0 %2659 }
 0x5cb   :  { %3704 = vlog2.f32 %v2660_v57 }
 0x5ce   :  { %v2656_v23 = vpop.xlane.xlu0 %2655  ;;  %v2662_v10 = vpop.xlane.xlu1 %2661 }
 0x5cf   :  { %3706 = vlog2.f32 %v2656_v23 }
 0x5d0   :  { %3708 = vlog2.f32 %v2662_v10 }
 0x5d2   :  { %v2658_v6 = vpop.xlane.xlu1 %2657 }
 0x5d3   :  { %3710 = vlog2.f32 %v2658_v6 }
 0x5d4   :  { %v2668_v11 = vpop.xlane.xlu0 %2667 }
 0x5d5   :  { %3712 = vlog2.f32 %v2668_v11 }
 0x5d6   :  { %v2670_v30 = vpop.xlane.xlu1 %2669 }
 0x5d7   :  { %3714 = vlog2.f32 %v2670_v30 }
 0x5d8   :  { %v3705_v14 = vpop.eup %3704  ;;  %v2664_v18 = vpop.xlane.xlu0 %2663 }
 0x5d9   :  { %v2756_v44 = vmul.f32 0.6931472, %v3705_v14  ;;  %3716 = vlog2.f32 %v2664_v18 }
 0x5da   :  { %v2666_v29 = vpop.xlane.xlu1 %2665 }
 0x5db   :  { %v2849_v22 = vsub.f32 %v4511_v35, %v2756_v44  ;;  %3718 = vlog2.f32 %v2666_v29 }
 0x5dc   :  { %v3707_v51 = vpop.eup %3706  ;;  %v2676_v45 = vpop.xlane.xlu0 %2675 }
 0x5dd   :  { %v3709_v25 = vpop.eup %3708  ;;  %2897 = vst [vmem:[#allocation10 + $0x10] sm:$0xff] %v2849_v22  ;;  %v2752_v53 = vmul.f32 0.6931472, %v3707_v51  ;;  %3720 = vlog2.f32 %v2676_v45 }
 0x5de   :  { %v2758_v60 = vmul.f32 0.6931472, %v3709_v25  ;;  %v2678_v57 = vpop.xlane.xlu1 %2677 }
 0x5df   :  { %v2847_v23 = vsub.f32 %v4515_v26, %v2752_v53  ;;  %3722 = vlog2.f32 %v2678_v57 }
 0x5e0   :  { %v3711_v10 = vpop.eup %3710  ;;  %v2850_v6 = vsub.f32 %v4519_v31, %v2758_v60  ;;  %v2672_v11 = vpop.xlane.xlu0 %2671 }
 0x5e1   :  { %2895 = vst [vmem:[#allocation10] sm:$0xff] %v2847_v23  ;;  %v2754_v30 = vmul.f32 0.6931472, %v3711_v10  ;;  %3724 = vlog2.f32 %v2672_v11 }
 0x5e2   :  { %v3713_v35 = vpop.eup %3712  ;;  %2898 = vst [vmem:[#allocation10 + $0x18] sm:$0xff] %v2850_v6  ;;  %v2674_v14 = vpop.xlane.xlu1 %2673 }
 0x5e3   :  { %v2848_v18 = vsub.f32 %v4523_v39, %v2754_v30  ;;  %v2764_v44 = vmul.f32 0.6931472, %v3713_v35  ;;  %3726 = vlog2.f32 %v2674_v14 }
 0x5e4   :  { %v3715_v29 = vpop.eup %3714  ;;  %v2684_v22 = vpop.xlane.xlu0 %2683 }
 0x5e5   :  { %2896 = vst [vmem:[#allocation10 + $0x8] sm:$0xff] %v2848_v18  ;;  %v2853_v26 = vsub.f32 %v4527_v46, %v2764_v44  ;;  %v2766_v51 = vmul.f32 0.6931472, %v3715_v29  ;;  %3728 = vlog2.f32 %v2684_v22 }
 0x5e6   :  { %v3717_v45 = vpop.eup %3716  ;;  %v2686_v31 = vpop.xlane.xlu1 %2685 }
 0x5e7   :  { %2901 = vst [vmem:[#allocation10 + $0x30] sm:$0xff] %v2853_v26  ;;  %v2854_v25 = vsub.f32 %v4531_v41, %v2766_v51  ;;  %v2760_v53 = vmul.f32 0.6931472, %v3717_v45  ;;  %3730 = vlog2.f32 %v2686_v31 }
 0x5e8   :  { %v3719_v60 = vpop.eup %3718  ;;  %v2680_v57 = vpop.xlane.xlu0 %2679 }
 0x5e9   :  { %2902 = vst [vmem:[#allocation10 + $0x38] sm:$0xff] %v2854_v25  ;;  %v2851_v39 = vsub.f32 %v4535_v5, %v2760_v53  ;;  %v2762_v23 = vmul.f32 0.6931472, %v3719_v60  ;;  %3732 = vlog2.f32 %v2680_v57 }
 0x5ea   :  { %v3721_v10 = vpop.eup %3720  ;;  %v2682_v6 = vpop.xlane.xlu1 %2681 }
 0x5eb   :  { %2899 = vst [vmem:[#allocation10 + $0x20] sm:$0xff] %v2851_v39  ;;  %v2852_v46 = vsub.f32 %v4539_v62, %v2762_v23  ;;  %v2772_v11 = vmul.f32 0.6931472, %v3721_v10  ;;  %3734 = vlog2.f32 %v2682_v6 }
 0x5ec   :  { %v3723_v30 = vpop.eup %3722  ;;  %v2692_v35 = vpop.xlane.xlu0 %2691 }
 0x5ed   :  { %2900 = vst [vmem:[#allocation10 + $0x28] sm:$0xff] %v2852_v46  ;;  %v2857_v41 = vsub.f32 %v4543_v13, %v2772_v11  ;;  %v2774_v14 = vmul.f32 0.6931472, %v3723_v30  ;;  %3736 = vlog2.f32 %v2692_v35 }
 0x5ee   :  { %v3725_v18 = vpop.eup %3724  ;;  %v2694_v44 = vpop.xlane.xlu1 %2693 }
 0x5ef   :  { %2905 = vst [vmem:[#allocation10 + $0x50] sm:$0xff] %v2857_v41  ;;  %v2858_v5 = vsub.f32 %v4547_v34, %v2774_v14  ;;  %v2768_v29 = vmul.f32 0.6931472, %v3725_v18  ;;  %3738 = vlog2.f32 %v2694_v44 }
 0x5f0   :  { %v3727_v22 = vpop.eup %3726  ;;  %v2688_v26 = vpop.xlane.xlu0 %2687 }
 0x5f1   :  { %2906 = vst [vmem:[#allocation10 + $0x58] sm:$0xff] %v2858_v5  ;;  %v2855_v62 = vsub.f32 %v4551_v0, %v2768_v29  ;;  %v2770_v51 = vmul.f32 0.6931472, %v3727_v22  ;;  %3740 = vlog2.f32 %v2688_v26 }
 0x5f2   :  { %v3729_v45 = vpop.eup %3728  ;;  %v2690_v31 = vpop.xlane.xlu1 %2689 }
 0x5f3   :  { %2903 = vst [vmem:[#allocation10 + $0x40] sm:$0xff] %v2855_v62  ;;  %v2856_v13 = vsub.f32 %v4555_v52, %v2770_v51  ;;  %v2780_v25 = vmul.f32 0.6931472, %v3729_v45  ;;  %3742 = vlog2.f32 %v2690_v31 }
 0x5f4   :  { %v3731_v53 = vpop.eup %3730  ;;  %v2700_v60 = vpop.xlane.xlu0 %2699 }
 0x5f5   :  { %2904 = vst [vmem:[#allocation10 + $0x48] sm:$0xff] %v2856_v13  ;;  %v2861_v34 = vsub.f32 %v4559_v20, %v2780_v25  ;;  %v2782_v57 = vmul.f32 0.6931472, %v3731_v53  ;;  %3744 = vlog2.f32 %v2700_v60 }
 0x5f6   :  { %v3733_v39 = vpop.eup %3732  ;;  %v2702_v23 = vpop.xlane.xlu1 %2701 }
 0x5f7   :  { %2909 = vst [vmem:[#allocation10 + $0x70] sm:$0xff] %v2861_v34  ;;  %v2862_v0 = vsub.f32 %v4563_v17, %v2782_v57  ;;  %v2776_v10 = vmul.f32 0.6931472, %v3733_v39  ;;  %3746 = vlog2.f32 %v2702_v23 }
 0x5f8   :  { %v3735_v6 = vpop.eup %3734  ;;  %v2696_v46 = vpop.xlane.xlu0 %2695 }
 0x5f9   :  { %2910 = vst [vmem:[#allocation10 + $0x78] sm:$0xff] %v2862_v0  ;;  %v2859_v52 = vsub.f32 %v4567_v36, %v2776_v10  ;;  %v2778_v11 = vmul.f32 0.6931472, %v3735_v6  ;;  %3748 = vlog2.f32 %v2696_v46 }
 0x5fa   :  { %v3737_v30 = vpop.eup %3736  ;;  %v2698_v35 = vpop.xlane.xlu1 %2697 }
 0x5fb   :  { %2907 = vst [vmem:[#allocation10 + $0x60] sm:$0xff] %v2859_v52  ;;  %v2860_v20 = vsub.f32 %v4571_v58, %v2778_v11  ;;  %v2788_v41 = vmul.f32 0.6931472, %v3737_v30  ;;  %3750 = vlog2.f32 %v2698_v35 }
 0x5fc   :  { %v3739_v14 = vpop.eup %3738  ;;  %v2708_v18 = vpop.xlane.xlu0 %2707 }
 0x5fd   :  { %2908 = vst [vmem:[#allocation10 + $0x68] sm:$0xff] %v2860_v20  ;;  %v2865_v17 = vsub.f32 %v4575_v15, %v2788_v41  ;;  %v2790_v44 = vmul.f32 0.6931472, %v3739_v14  ;;  %3752 = vlog2.f32 %v2708_v18 }
 0x5fe   :  { %v3741_v5 = vpop.eup %3740  ;;  %v2710_v29 = vpop.xlane.xlu1 %2709 }
 0x5ff   :  { %2913 = vst [vmem:[#allocation10 + $0x90] sm:$0xff] %v2865_v17  ;;  %v2866_v36 = vsub.f32 %v4579_v27, %v2790_v44  ;;  %v2784_v22 = vmul.f32 0.6931472, %v3741_v5  ;;  %3754 = vlog2.f32 %v2710_v29 }
 0x600   :  { %v3743_v26 = vpop.eup %3742  ;;  %v2704_v62 = vpop.xlane.xlu0 %2703 }
 0x601   :  { %2914 = vst [vmem:[#allocation10 + $0x98] sm:$0xff] %v2866_v36  ;;  %v2863_v58 = vsub.f32 %v4583_v40, %v2784_v22  ;;  %v2786_v51 = vmul.f32 0.6931472, %v3743_v26  ;;  %3756 = vlog2.f32 %v2704_v62 }
 0x602   :  { %v3745_v45 = vpop.eup %3744  ;;  %v2706_v31 = vpop.xlane.xlu1 %2705 }
 0x603   :  { %2911 = vst [vmem:[#allocation10 + $0x80] sm:$0xff] %v2863_v58  ;;  %v2864_v15 = vsub.f32 %v4587_v9, %v2786_v51  ;;  %v2796_v13 = vmul.f32 0.6931472, %v3745_v45  ;;  %3758 = vlog2.f32 %v2706_v31 }
 0x604   :  { %v3747_v25 = vpop.eup %3746  ;;  %v2716_v53 = vpop.xlane.xlu0 %2715 }
 0x605   :  { %2912 = vst [vmem:[#allocation10 + $0x88] sm:$0xff] %v2864_v15  ;;  %v2869_v27 = vsub.f32 %v4591_v4, %v2796_v13  ;;  %v2798_v60 = vmul.f32 0.6931472, %v3747_v25  ;;  %3760 = vlog2.f32 %v2716_v53 }
 0x606   :  { %v3749_v34 = vpop.eup %3748  ;;  %v2718_v57 = vpop.xlane.xlu1 %2717 }
 0x607   :  { %2917 = vst [vmem:[#allocation10 + $0xb0] sm:$0xff] %v2869_v27  ;;  %v2870_v40 = vsub.f32 %v4595_v47, %v2798_v60  ;;  %v2792_v39 = vmul.f32 0.6931472, %v3749_v34  ;;  %3762 = vlog2.f32 %v2718_v57 }
 0x608   :  { %v3751_v23 = vpop.eup %3750  ;;  %v2712_v0 = vpop.xlane.xlu0 %2711 }
 0x609   :  { %2918 = vst [vmem:[#allocation10 + $0xb8] sm:$0xff] %v2870_v40  ;;  %v2867_v9 = vsub.f32 %v4599_v3, %v2792_v39  ;;  %v2794_v10 = vmul.f32 0.6931472, %v3751_v23  ;;  %3764 = vlog2.f32 %v2712_v0 }
 0x60a   :  { %v3753_v6 = vpop.eup %3752  ;;  %v2714_v46 = vpop.xlane.xlu1 %2713 }
 0x60b   :  { %2915 = vst [vmem:[#allocation10 + $0xa0] sm:$0xff] %v2867_v9  ;;  %v2868_v4 = vsub.f32 %v4603_v33, %v2794_v10  ;;  %v2804_v52 = vmul.f32 0.6931472, %v3753_v6  ;;  %3766 = vlog2.f32 %v2714_v46 }
 0x60c   :  { %v3755_v11 = vpop.eup %3754  ;;  %v2720_v30 = vpop.xlane.xlu0 %2719 }
 0x60d   :  { %2916 = vst [vmem:[#allocation10 + $0xa8] sm:$0xff] %v2868_v4  ;;  %v2873_v47 = vsub.f32 %v4607_v50, %v2804_v52  ;;  %v2806_v35 = vmul.f32 0.6931472, %v3755_v11  ;;  %3768 = vlog2.f32 %v2720_v30 }
 0x60e   :  { %v3757_v20 = vpop.eup %3756 }
 0x60f   :  { %2921 = vst [vmem:[#allocation10 + $0xd0] sm:$0xff] %v2873_v47  ;;  %v2874_v3 = vsub.f32 %v4611_v2, %v2806_v35  ;;  %v2800_v41 = vmul.f32 0.6931472, %v3757_v20 }
 0x610   :  { %v3759_v14 = vpop.eup %3758  ;;  %v2722_v18 = vpop.xlane.xlu1 %2721 }
 0x611   :  { %2922 = vst [vmem:[#allocation10 + $0xd8] sm:$0xff] %v2874_v3  ;;  %v2871_v17 = vsub.f32 %v4615_v19, %v2800_v41  ;;  %v2802_v33 = vmul.f32 0.6931472, %v3759_v14  ;;  %3770 = vlog2.f32 %v2722_v18  ;;  %v2724_v44 = vpop.xlane.xlu0 %2723 }
 0x612   :  { %v3761_v5 = vpop.eup %3760  ;;  %3772 = vlog2.f32 %v2724_v44 }
 0x613   :  { %2919 = vst [vmem:[#allocation10 + $0xc0] sm:$0xff] %v2871_v17  ;;  %v2872_v50 = vsub.f32 %v4619_v16, %v2802_v33  ;;  %v2812_v29 = vmul.f32 0.6931472, %v3761_v5 }
 0x614   :  { %v3763_v36 = vpop.eup %3762 }
 0x615   :  { %2920 = vst [vmem:[#allocation10 + $0xc8] sm:$0xff] %v2872_v50  ;;  %v2877_v22 = vsub.f32 %v4623_v28, %v2812_v29  ;;  %v2814_v2 = vmul.f32 0.6931472, %v3763_v36  ;;  %v2726_v26 = vpop.xlane.xlu1 %2725 }
 0x616   :  { %v3765_v62 = vpop.eup %3764  ;;  %3774 = vlog2.f32 %v2726_v26 }
 0x617   :  { %2925 = vst [vmem:[#allocation10 + $0xf0] sm:$0xff] %v2877_v22  ;;  %v2878_v19 = vsub.f32 %v4627_v38, %v2814_v2  ;;  %v2808_v58 = vmul.f32 0.6931472, %v3765_v62 }
 0x618   :  { %v3767_v51 = vpop.eup %3766 }
 0x619   :  { %2926 = vst [vmem:[#allocation10 + $0xf8] sm:$0xff] %v2878_v19  ;;  %v2875_v45 = vsub.f32 %v4631_v42, %v2808_v58  ;;  %v2810_v31 = vmul.f32 0.6931472, %v3767_v51  ;;  %v2728_v15 = vpop.xlane.xlu0 %2727 }
 0x61a   :  { %v3769_v16 = vpop.eup %3768  ;;  %3776 = vlog2.f32 %v2728_v15 }
 0x61b   :  { %2923 = vst [vmem:[#allocation10 + $0xe0] sm:$0xff] %v2875_v45  ;;  %v2876_v13 = vsub.f32 %v4635_v24, %v2810_v31  ;;  %v2816_v28 = vmul.f32 0.6931472, %v3769_v16 }
 0x61d   :  { %2924 = vst [vmem:[#allocation10 + $0xe8] sm:$0xff] %v2876_v13  ;;  %v2879_v25 = vsub.f32 %v4639_v48, %v2816_v28  ;;  %v2730_v53 = vpop.xlane.xlu1 %2729 }
 0x61e   :  { %v3771_v27 = vpop.eup %3770  ;;  %3778 = vlog2.f32 %v2730_v53 }
 0x61f   :  { %v3773_v38 = vpop.eup %3772  ;;  %2927 = vst [vmem:[#allocation10 + $0x100] sm:$0xff] %v2879_v25  ;;  %v2818_v60 = vmul.f32 0.6931472, %v3771_v27 }
 0x620   :  { %v2820_v34 = vmul.f32 0.6931472, %v3773_v38 }
 0x621   :  { %v2880_v42 = vsub.f32 %v4643_v7, %v2818_v60  ;;  %v2732_v57 = vpop.xlane.xlu0 %2731 }
 0x622   :  { %v2881_v40 = vsub.f32 %v4646_v59, %v2820_v34  ;;  %3780 = vlog2.f32 %v2732_v57 }
 0x623   :  { %v3775_v39 = vpop.eup %3774  ;;  %2928 = vst [vmem:[#allocation10 + $0x108] sm:$0xff] %v2880_v42 }
 0x624   :  { %2929 = vst [vmem:[#allocation10 + $0x110] sm:$0xff] %v2881_v40  ;;  %v2822_v24 = vmul.f32 0.6931472, %v3775_v39 }
 0x625   :  { %v2734_v23 = vpop.xlane.xlu1 %2733 }
 0x626   :  { %v2882_v48 = vsub.f32 %v4651_v21, %v2822_v24  ;;  %3782 = vlog2.f32 %v2734_v23 }
 0x627   :  { %v3777_v0 = vpop.eup %3776 }
 0x628   :  { %2930 = vst [vmem:[#allocation10 + $0x118] sm:$0xff] %v2882_v48  ;;  %v2824_v9 = vmul.f32 0.6931472, %v3777_v0 }
 0x629   :  { %v2736_v10 = vpop.xlane.xlu0 %2735 }
 0x62a   :  { %v2883_v6 = vsub.f32 %v4655_v1, %v2824_v9  ;;  %3784 = vlog2.f32 %v2736_v10 }
 0x62b   :  { %v3779_v7 = vpop.eup %3778 }
 0x62c   :  { %2931 = vst [vmem:[#allocation10 + $0x120] sm:$0xff] %v2883_v6  ;;  %v2826_v46 = vmul.f32 0.6931472, %v3779_v7 }
 0x62d   :  { %v2738_v59 = vpop.xlane.xlu1 %2737 }
 0x62e   :  { %v2884_v4 = vsub.f32 %v4659_v37, %v2826_v46  ;;  %3786 = vlog2.f32 %v2738_v59 }
 0x62f   :  { %v3781_v52 = vpop.eup %3780 }
 0x630   :  { %2932 = vst [vmem:[#allocation10 + $0x128] sm:$0xff] %v2884_v4  ;;  %v2828_v11 = vmul.f32 0.6931472, %v3781_v52 }
 0x631   :  { %v2740_v30 = vpop.xlane.xlu0 %2739 }
 0x632   :  { %v2885_v21 = vsub.f32 %v4663_v49, %v2828_v11  ;;  %3788 = vlog2.f32 %v2740_v30 }
 0x633   :  { %v3783_v47 = vpop.eup %3782 }
 0x634   :  { %2933 = vst [vmem:[#allocation10 + $0x130] sm:$0xff] %v2885_v21  ;;  %v2830_v35 = vmul.f32 0.6931472, %v3783_v47 }
 0x635   :  { %v2742_v20 = vpop.xlane.xlu1 %2741 }
 0x636   :  { %v2886_v1 = vsub.f32 %v4667_v54, %v2830_v35  ;;  %3790 = vlog2.f32 %v2742_v20 }
 0x637   :  { %v3785_v3 = vpop.eup %3784 }
 0x638   :  { %2934 = vst [vmem:[#allocation10 + $0x138] sm:$0xff] %v2886_v1  ;;  %v2832_v41 = vmul.f32 0.6931472, %v3785_v3 }
 0x639   :  { %v2744_v14 = vpop.xlane.xlu0 %2743 }
 0x63a   :  { %v2887_v37 = vsub.f32 %v4671_v32, %v2832_v41  ;;  %3792 = vlog2.f32 %v2744_v14 }
 0x63b   :  { %v3787_v18 = vpop.eup %3786 }
 0x63c   :  { %2935 = vst [vmem:[#allocation10 + $0x140] sm:$0xff] %v2887_v37  ;;  %v2834_v17 = vmul.f32 0.6931472, %v3787_v18 }
 0x63d   :  { %v2746_v33 = vpop.xlane.xlu1 %2745 }
 0x63e   :  { %v2888_v49 = vsub.f32 %v4675_v55, %v2834_v17  ;;  %3794 = vlog2.f32 %v2746_v33 }
 0x63f   :  { %v3789_v44 = vpop.eup %3788 }
 0x640   :  { %2936 = vst [vmem:[#allocation10 + $0x148] sm:$0xff] %v2888_v49  ;;  %v2836_v5 = vmul.f32 0.6931472, %v3789_v44 }
 0x641   :  { %v2748_v50 = vpop.xlane.xlu0 %2747 }
 0x642   :  { %v2889_v54 = vsub.f32 %v4679_v56, %v2836_v5  ;;  %3796 = vlog2.f32 %v2748_v50 }
 0x643   :  { %v3791_v29 = vpop.eup %3790 }
 0x644   :  { %2937 = vst [vmem:[#allocation10 + $0x150] sm:$0xff] %v2889_v54  ;;  %v2838_v36 = vmul.f32 0.6931472, %v3791_v29 }
 0x645   :  { %v2750_v22 = vpop.xlane.xlu1 %2749 }
 0x646   :  { %v2890_v32 = vsub.f32 %v4683_v43, %v2838_v36  ;;  %3798 = vlog2.f32 %v2750_v22 }
 0x647   :  { %v3793_v2 = vpop.eup %3792 }
 0x648   :  { %2938 = vst [vmem:[#allocation10 + $0x158] sm:$0xff] %v2890_v32  ;;  %v2840_v26 = vmul.f32 0.6931472, %v3793_v2 }
 0x64a   :  { %v2891_v55 = vsub.f32 %v4687_v61, %v2840_v26 }
 0x64b   :  { %v3795_v62 = vpop.eup %3794 }
 0x64c   :  { %2939 = vst [vmem:[#allocation10 + $0x160] sm:$0xff] %v2891_v55  ;;  %v2842_v19 = vmul.f32 0.6931472, %v3795_v62 }
 0x64e   :  { %v2892_v58 = vsub.f32 %v4691_v12, %v2842_v19 }
 0x64f   :  { %v3797_v51 = vpop.eup %3796 }
 0x650   :  { %2940 = vst [vmem:[#allocation10 + $0x168] sm:$0xff] %v2892_v58  ;;  %v2844_v56 = vmul.f32 0.6931472, %v3797_v51 }
 0x652   :  { %v2893_v45 = vsub.f32 %v4695_v63, %v2844_v56 }
 0x653   :  { %v3799_v31 = vpop.eup %3798 }
 0x654   :  { %2941 = vst [vmem:[#allocation10 + $0x170] sm:$0xff] %v2893_v45  ;;  %v2846_v43 = vmul.f32 0.6931472, %v3799_v31 }
 0x656   :  { %v2894_v15 = vsub.f32 %v4699_v8, %v2846_v43 }
 0x658   :  { %2942 = vst [vmem:[#allocation10 + $0x178] sm:$0xff] %v2894_v15 }
 0x659   :  { %3962 = shalt.err (!%p3959_p10)
}
 0x65a   :  { %s3989_s22 = smov 128   ;;  %s3990_s23 = smov 8  }
 0x65b   :  { %2954 = dma.vmem_to_hbm [thread:$0]  %s2949_s20, 6144, %s4759_s6, [#allocation4], %s3989_s22, %s3989_s22, %s3990_s23  }
 0x65c   :  { %3977 = dma.done.wait [#allocation4], 6144  }
 0x65d   :  { %3978 = vsyncadd [#allocation4], 4294961152 }
 0x65e   :  { %2958 = vsyncpa [#allocation3], 1 }
 0x65f   :  { %2959 = vsyncpa [#allocation6], 1 }
 0x660   :  { %2960 = vsyncpa [#allocation9], 1 }
 0x661   :  { %2961 = vsyncpa [#allocation4], 1 }

</bundles_post_ra>
